<compile_context>
chip_gen: v6e
topology: v6e:2x2x1
jax: 0.10.0
libtpu: 0.0.40
codegen_flags: <defaults>
</compile_context>

<pallas_src>
import functools

import jax
import jax.numpy as jnp
from jax.experimental import pallas as pl
from jax.experimental.pallas import tpu as pltpu


# ----------------------------- tiling helpers ------------------------------

def _pick_tile(dim, target, align):
    """Largest tile <= target that divides dim and is a multiple of align,
    falling back to the full dim (full-extent blocks are always legal)."""
    if dim <= target:
        return dim
    t = (target // align) * align
    while t >= align:
        if dim % t == 0:
            return t
        t -= align
    return dim


# ----------------------------- fused matmul kernel --------------------------

def _fused_matmul_kernel(*refs, nk, has_ln, has_bias, has_res, activation):
    pos = 0
    x_ref = refs[pos]; pos += 1
    w_ref = refs[pos]; pos += 1
    if has_ln:
        g_ref = refs[pos]
        beta_ref = refs[pos + 1]
        pos += 2
    if has_bias:
        bias_ref = refs[pos]; pos += 1
    if has_res:
        res_ref = refs[pos]; pos += 1
    o_ref = refs[pos]
    acc_ref = refs[pos + 1]

    k_id = pl.program_id(2)

    @pl.when(k_id == 0)
    def _init():
        acc_ref[...] = jnp.zeros_like(acc_ref)

    x = x_ref[...]
    if has_ln:
        # LayerNorm prologue (needs the full contraction row -> nk == 1)
        xf = x.astype(jnp.float32)
        mu = jnp.mean(xf, axis=-1, keepdims=True)
        xc = xf - mu
        var = jnp.mean(xc * xc, axis=-1, keepdims=True)
        xf = xc * jax.lax.rsqrt(var + 1e-5) * g_ref[...] + beta_ref[...]
        x = xf.astype(w_ref.dtype)

    acc_ref[...] += jnp.dot(x, w_ref[...], preferred_element_type=jnp.float32)

    @pl.when(k_id == nk - 1)
    def _finalize():
        r = acc_ref[...]
        if has_bias:
            r = r + bias_ref[...]
        if activation == "quickgelu":
            r = r * jax.nn.sigmoid(1.702 * r)          # CLIP QuickGELU
        if has_res:
            r = r + res_ref[...].astype(jnp.float32)   # fused residual add
        o_ref[...] = r.astype(o_ref.dtype)


def fused_matmul(x, w, bias=None, *, ln=None, residual=None, activation=None,
                 out_dtype=jnp.bfloat16, tm=256, tn=512, tk=512):
    """y = act(LN(x) @ w + bias) + residual, tiled + pipelined, bf16 in / f32 acc."""
    M, K = x.shape
    K2, N = w.shape
    assert K == K2
    if x.dtype != w.dtype:
        x = x.astype(w.dtype)

    tm_eff = _pick_tile(M, tm, 8)
    tn_eff = _pick_tile(N, tn, 128)
    tk_eff = K if ln is not None else _pick_tile(K, tk, 128)
    nk = K // tk_eff
    grid = (M // tm_eff, N // tn_eff, nk)

    in_specs = [pl.BlockSpec((tm_eff, tk_eff), lambda i, j, k: (i, k)),
                pl.BlockSpec((tk_eff, tn_eff), lambda i, j, k: (k, j))]
    args = [x, w]
    if ln is not None:
        gamma, beta = ln
        in_specs += [pl.BlockSpec((1, K), lambda i, j, k: (0, 0)),
                     pl.BlockSpec((1, K), lambda i, j, k: (0, 0))]
        args += [gamma.reshape(1, K).astype(jnp.float32),
                 beta.reshape(1, K).astype(jnp.float32)]
    if bias is not None:
        in_specs.append(pl.BlockSpec((1, tn_eff), lambda i, j, k: (0, j)))
        args.append(bias.reshape(1, N).astype(jnp.float32))
    if residual is not None:
        in_specs.append(pl.BlockSpec((tm_eff, tn_eff), lambda i, j, k: (i, j)))
        args.append(residual)

    kernel = functools.partial(
        _fused_matmul_kernel, nk=nk, has_ln=ln is not None,
        has_bias=bias is not None, has_res=residual is not None,
        activation=activation)

    return pl.pallas_call(
        kernel,
        out_shape=jax.ShapeDtypeStruct((M, N), out_dtype),
        grid=grid,
        in_specs=in_specs,
        out_specs=pl.BlockSpec((tm_eff, tn_eff), lambda i, j, k: (i, j)),
        scratch_shapes=[pltpu.VMEM((tm_eff, tn_eff), jnp.float32)],
        compiler_params=pltpu.CompilerParams(
            dimension_semantics=("parallel", "parallel", "arbitrary"),
            vmem_limit_bytes=32 * 1024 * 1024),
    )(*args)


# ----------------------------- layernorm kernel -----------------------------

def _layernorm_kernel(x_ref, g_ref, b_ref, o_ref):
    x = x_ref[...].astype(jnp.float32)
    mu = jnp.mean(x, axis=-1, keepdims=True)
    xc = x - mu
    var = jnp.mean(xc * xc, axis=-1, keepdims=True)
    o_ref[...] = (xc * jax.lax.rsqrt(var + 1e-5) * g_ref[...] + b_ref[...]).astype(o_ref.dtype)


def layernorm(x, gamma, beta, *, out_dtype=jnp.bfloat16, tm=256):
    M, D = x.shape
    tm_eff = _pick_tile(M, tm, 8)
    return pl.pallas_call(
        _layernorm_kernel,
        out_shape=jax.ShapeDtypeStruct((M, D), out_dtype),
        grid=(M // tm_eff,),
        in_specs=[pl.BlockSpec((tm_eff, D), lambda i: (i, 0)),
                  pl.BlockSpec((1, D), lambda i: (0, 0)),
                  pl.BlockSpec((1, D), lambda i: (0, 0))],
        out_specs=pl.BlockSpec((tm_eff, D), lambda i: (i, 0)),
        compiler_params=pltpu.CompilerParams(dimension_semantics=("parallel",)),
    )(x, gamma.reshape(1, D).astype(jnp.float32), beta.reshape(1, D).astype(jnp.float32))


# ----------------------------- attention kernel -----------------------------

def _attn_kernel(q_ref, k_ref, v_ref, o_ref, *, scale, hs, hd, n_real):
    n_pad = q_ref.shape[1]
    q_all = q_ref[0]          # (n_pad, hs*hd) bf16
    k_all = k_ref[0]
    v_all = v_ref[0]
    outs = []
    for h in range(hs):                          # static unrolled head loop
        lo, hi = h * hd, (h + 1) * hd
        q = q_all[:, lo:hi]
        k = k_all[:, lo:hi]
        v = v_all[:, lo:hi]
        s = jax.lax.dot_general(q, k, (((1,), (1,)), ((), ())),
                                preferred_element_type=jnp.float32) * scale
        if n_real < n_pad:                       # mask padded key tokens
            kidx = jax.lax.broadcasted_iota(jnp.int32, s.shape, 1)
            s = jnp.where(kidx < n_real, s, -1e30)
        s = s - jnp.max(s, axis=-1, keepdims=True)
        p = jnp.exp(s)
        p = p * pl.reciprocal(jnp.sum(p, axis=-1, keepdims=True), approx=True)
        outs.append(jnp.dot(p.astype(v.dtype), v, preferred_element_type=jnp.float32))
    o_ref[0] = jnp.concatenate(outs, axis=-1).astype(o_ref.dtype)


def attention_from_qkv(qkv, *, heads, hd, n_real):
    """qkv: (B, N_pad, 3*D). Returns (B, N_pad, D). Heads are grouped so each
    grid step reads/writes a lane-aligned (>=128-wide) slab; no JAX transposes."""
    B, n_pad, three_d = qkv.shape
    D = three_d // 3
    hs = heads
    for cand in range(1, heads + 1):             # smallest head group w/ 128-lane slab
        if heads % cand == 0 and (cand * hd) % 128 == 0:
            hs = cand
            break
    w_blk = hs * hd
    G = D // w_blk                               # head-groups per q/k/v section

    def make_spec(section):
        return pl.BlockSpec((1, n_pad, w_blk),
                            lambda b, g, s=section: (b, 0, s * G + g))

    return pl.pallas_call(
        functools.partial(_attn_kernel, scale=1.0 / float(hd) ** 0.5,
                          hs=hs, hd=hd, n_real=n_real),
        out_shape=jax.ShapeDtypeStruct((B, n_pad, D), jnp.bfloat16),
        grid=(B, heads // hs),
        in_specs=[make_spec(0), make_spec(1), make_spec(2)],
        out_specs=pl.BlockSpec((1, n_pad, w_blk), lambda b, g: (b, 0, g)),
        compiler_params=pltpu.CompilerParams(
            dimension_semantics=("parallel", "parallel")),
    )(qkv, qkv, qkv)


# ----------------------------- JAX glue -------------------------------------

def _cubic_weight(t, a=-0.75):
    t = jnp.abs(t)
    t2 = t * t
    t3 = t2 * t
    w1 = (a + 2.0) * t3 - (a + 3.0) * t2 + 1.0
    w2 = a * t3 - 5.0 * a * t2 + 8.0 * a * t - 4.0 * a
    return jnp.where(t <= 1.0, w1, jnp.where(t < 2.0, w2, 0.0))


def resize_bicubic_align_corners(x, out_h, out_w):
    # TODO(synk): gather-based bicubic interpolation (kornia resize, align_corners=True,
    # antialias=False — the module default) stays in plain JAX; no clean Pallas gather.
    B, C, H, W = x.shape

    def axis(in_size, out_size):
        if out_size == 1:
            src = jnp.zeros((1,), jnp.float32)
        else:
            src = jnp.arange(out_size, dtype=jnp.float32) * (in_size - 1) / (out_size - 1)
        i0 = jnp.floor(src).astype(jnp.int32)
        idx = i0[:, None] + jnp.arange(-1, 3, dtype=jnp.int32)[None, :]   # (out, 4)
        w = _cubic_weight(src[:, None] - idx.astype(jnp.float32))          # (out, 4)
        return jnp.clip(idx, 0, in_size - 1), w

    iy, wy = axis(H, out_h)
    ix, wx = axis(W, out_w)
    xg = x[:, :, iy, :]                                   # (B, C, out_h, 4, W)
    xh = jnp.einsum('bchqw,hq->bchw', xg, wy)             # (B, C, out_h, W)
    xg2 = xh[:, :, :, ix]                                 # (B, C, out_h, out_w, 4)
    return jnp.einsum('bchwq,wq->bchw', xg2, wx)          # (B, C, out_h, out_w)


def patchify(x, patch):
    # NCHW -> (B, num_patches, C*patch*patch), channel-major within a patch
    # (matches torch conv1.weight.reshape(D, -1) flattening order).
    B, C, H, W = x.shape
    gh, gw = H // patch, W // patch
    x = x.reshape(B, C, gh, patch, gw, patch)
    x = x.transpose(0, 2, 4, 1, 3, 5)
    return x.reshape(B, gh * gw, C * patch * patch)


def init_clip_vit_params(key, *, width, layers, patch, image_size, channels, out_dim):
    grid = image_size // patch
    seq = grid * grid + 1
    s = 0.02
    ks = jax.random.split(key, 4 + layers)
    params = {
        'conv_w': jax.random.normal(ks[0], (channels * patch * patch, width), jnp.float32) * s,
        'class_emb': jax.random.normal(ks[1], (width,), jnp.float32) * s,
        'pos_emb': jax.random.normal(ks[2], (seq, width), jnp.float32) * s,
        'ln_pre_g': jnp.ones((width,), jnp.float32),
        'ln_pre_b': jnp.zeros((width,), jnp.float32),
        'ln_post_g': jnp.ones((width,), jnp.float32),
        'ln_post_b': jnp.zeros((width,), jnp.float32),
        'proj': jax.random.normal(ks[3], (width, out_dim), jnp.float32) * s,
        'blocks': [],
    }
    for l in range(layers):
        kb = jax.random.split(ks[4 + l], 4)
        params['blocks'].append({
            'ln1_g': jnp.ones((width,), jnp.float32), 'ln1_b': jnp.zeros((width,), jnp.float32),
            'ln2_g': jnp.ones((width,), jnp.float32), 'ln2_b': jnp.zeros((width,), jnp.float32),
            'qkv_w': jax.random.normal(kb[0], (width, 3 * width), jnp.float32) * s,
            'qkv_b': jnp.zeros((3 * width,), jnp.float32),
            'out_w': jax.random.normal(kb[1], (width, width), jnp.float32) * s,
            'out_b': jnp.zeros((width,), jnp.float32),
            'fc_w': jax.random.normal(kb[2], (width, 4 * width), jnp.float32) * s,
            'fc_b': jnp.zeros((4 * width,), jnp.float32),
            'mlp_proj_w': jax.random.normal(kb[3], (4 * width, width), jnp.float32) * s,
            'mlp_proj_b': jnp.zeros((width,), jnp.float32),
        })
    return params


def prepare_params(params, mean, std, *, channels, patch):
    """One-time (frozen model): fold the preprocess affine into conv1 and cast
    all matmul weights to bf16 (f32 kept for biases / LN params)."""
    scale = 0.5 / std                       # (C,)  from (x+1)/2 then (x-mean)/std
    bias = (0.5 - mean) / std               # (C,)
    pp = patch * patch
    s_vec = jnp.repeat(scale, pp)           # channel-major, matches patchify order
    b_vec = jnp.repeat(bias, pp)
    w_f = params['conv_w'].astype(jnp.float32)
    conv_w_fold = (s_vec[:, None] * w_f).astype(jnp.bfloat16)
    conv_b_fold = b_vec @ w_f               # (D,) f32

    out = {
        'conv_w_fold': conv_w_fold,
        'conv_b_fold': conv_b_fold,
        'class_emb': params['class_emb'],
        'pos_emb': params['pos_emb'],
        'ln_pre_g': params['ln_pre_g'], 'ln_pre_b': params['ln_pre_b'],
        'ln_post_g': params['ln_post_g'], 'ln_post_b': params['ln_post_b'],
        'proj': params['proj'].astype(jnp.bfloat16),
        'blocks': [],
    }
    for blk in params['blocks']:
        out['blocks'].append({
            'ln1_g': blk['ln1_g'], 'ln1_b': blk['ln1_b'],
            'ln2_g': blk['ln2_g'], 'ln2_b': blk['ln2_b'],
            'qkv_w': blk['qkv_w'].astype(jnp.bfloat16), 'qkv_b': blk['qkv_b'],
            'out_w': blk['out_w'].astype(jnp.bfloat16), 'out_b': blk['out_b'],
            'fc_w': blk['fc_w'].astype(jnp.bfloat16), 'fc_b': blk['fc_b'],
            'mlp_proj_w': blk['mlp_proj_w'].astype(jnp.bfloat16),
            'mlp_proj_b': blk['mlp_proj_b'],
        })
    return out


def residual_block(xs, blk, *, B, n_pad, n_real, heads):
    # x = x + attn(ln_1(x)); x = x + mlp(ln_2(x)) — LN / bias / GELU / residual fused.
    M, D = xs.shape
    hd = D // heads
    qkv = fused_matmul(xs, blk['qkv_w'], bias=blk['qkv_b'],
                       ln=(blk['ln1_g'], blk['ln1_b']))              # (M, 3D)
    attn = attention_from_qkv(qkv.reshape(B, n_pad, 3 * D),
                              heads=heads, hd=hd, n_real=n_real)     # (B, n_pad, D)
    xs = fused_matmul(attn.reshape(M, D), blk['out_w'], bias=blk['out_b'],
                      residual=xs)                                   # + residual
    h = fused_matmul(xs, blk['fc_w'], bias=blk['fc_b'],
                     ln=(blk['ln2_g'], blk['ln2_b']), activation="quickgelu")
    xs = fused_matmul(h, blk['mlp_proj_w'], bias=blk['mlp_proj_b'],
                      residual=xs)                                   # + residual
    return xs


def encode_image(x_resized, params, *, patch, heads):
    B, C, H, W = x_resized.shape
    patches = patchify(x_resized, patch)                  # (B, np, C*p*p)
    npatch, pdim = patches.shape[1], patches.shape[2]
    D = params['conv_w_fold'].shape[1]

    # patch embed (conv1, preprocess folded in) + positional embedding in epilogue
    pos = params['pos_emb']
    pos_patch = jnp.broadcast_to(pos[1:][None], (B, npatch, D)) \
                   .reshape(B * npatch, D).astype(jnp.bfloat16)
    emb = fused_matmul(patches.reshape(B * npatch, pdim).astype(jnp.bfloat16),
                       params['conv_w_fold'], bias=params['conv_b_fold'],
                       residual=pos_patch)                # (B*np, D) bf16
    emb = emb.reshape(B, npatch, D)

    cls = (params['class_emb'] + pos[0]).astype(jnp.bfloat16)
    cls = jnp.broadcast_to(cls[None, None, :], (B, 1, D))
    tok = jnp.concatenate([cls, emb], axis=1)             # (B, N, D)
    n_real = npatch + 1
    n_pad = ((n_real + 7) // 8) * 8                       # (8,128)-friendly row count
    if n_pad != n_real:
        tok = jnp.pad(tok, ((0, 0), (0, n_pad - n_real), (0, 0)))

    xs = layernorm(tok.reshape(B * n_pad, D), params['ln_pre_g'], params['ln_pre_b'])
    for blk in params['blocks']:
        xs = residual_block(xs, blk, B=B, n_pad=n_pad, n_real=n_real, heads=heads)

    cls_out = xs.reshape(B, n_pad, D)[:, 0, :]            # (B, D) — only real row used
    cls_out = layernorm(cls_out, params['ln_post_g'], params['ln_post_b'])
    return fused_matmul(cls_out, params['proj'], out_dtype=jnp.float32)   # no bias


def frozen_clip_image_embedder(x, params, *, image_size, patch, heads):
    xr = resize_bicubic_align_corners(x, image_size, image_size)
    # channel normalize is folded into conv_w_fold/conv_b_fold (frozen, linear)
    return encode_image(xr, params, patch=patch, heads=heads)


# ------------------------------- main ----------------------------------------

if __name__ == "__main__":
    key = jax.random.PRNGKey(0)
    k_img, k_par = jax.random.split(key)

    # small stand-ins for CLIP ViT: 224->32 image, 14->8 patch, width 768->128
    B, C, Hin, Win = 2, 3, 16, 16
    IMG, PATCH, WIDTH, HEADS, LAYERS, OUT_DIM = 32, 8, 128, 2, 2, 64

    x = jax.random.uniform(k_img, (B, C, Hin, Win), jnp.float32, -1.0, 1.0)

    mean = jnp.array([0.48145466, 0.4578275, 0.40821073], jnp.float32)
    std = jnp.array([0.26862954, 0.26130258, 0.27577711], jnp.float32)

    raw_params = init_clip_vit_params(
        k_par, width=WIDTH, layers=LAYERS, patch=PATCH,
        image_size=IMG, channels=C, out_dim=OUT_DIM)
    params = prepare_params(raw_params, mean, std, channels=C, patch=PATCH)

    fwd = jax.jit(functools.partial(frozen_clip_image_embedder,
                                    image_size=IMG, patch=PATCH, heads=HEADS))
    out = jax.block_until_ready(fwd(x, params))

    assert out.shape == (B, OUT_DIM), out.shape
    assert out.dtype == jnp.float32
    assert bool(jnp.all(jnp.isfinite(out)))
    print("KERNEL_OK")
</pallas_src>

<mosaic_0001>
module attributes {stable_mosaic.version = 11 : i64} {
  func.func @_fused_matmul_kernel(%arg0: i32, %arg1: i32, %arg2: i32, %arg3: memref<32x192xbf16, #tpu.memory_space<vmem>>, %arg4: memref<192x128xbf16, #tpu.memory_space<vmem>>, %arg5: memref<1x128xf32, #tpu.memory_space<vmem>>, %arg6: memref<32x128xbf16, #tpu.memory_space<vmem>>, %arg7: memref<32x128xbf16, #tpu.memory_space<vmem>>, %arg8: memref<32x128xf32, #tpu.memory_space<vmem>>) attributes {dimension_semantics = [#tpu.dimension_semantics<parallel>, #tpu.dimension_semantics<parallel>, #tpu.dimension_semantics<arbitrary>], iteration_bounds = array<i64: 1, 1, 1>, scalar_prefetch = 0 : i64, scratch_operands = 1 : i64, tpu.core_type = #tpu.core_type<tc>, window_params = [{transform_indices = @transform_0, window_bounds = array<i64: 32, 192>}, {transform_indices = @transform_1, window_bounds = array<i64: 192, 128>}, {transform_indices = @transform_2, window_bounds = array<i64: 1, 128>}, {transform_indices = @transform_3, window_bounds = array<i64: 32, 128>}, {transform_indices = @transform_4, window_bounds = array<i64: 32, 128>}]} {
    %c0_i32 = arith.constant 0 : i32
    %0 = arith.cmpi eq, %arg2, %c0_i32 : i32
    %1 = arith.extui %0 : i1 to i32
    %c0_i32_0 = arith.constant 0 : i32
    %2 = arith.cmpi ne, %1, %c0_i32_0 : i32
    scf.if %2 {
      %cst_10 = arith.constant 0.000000e+00 : f32
      %12 = vector.broadcast %cst_10 : f32 to vector<32x128xf32>
      %c0_11 = arith.constant 0 : index
      %c0_12 = arith.constant 0 : index
      %13 = vector.load %arg8[%c0_11, %c0_12] : memref<32x128xf32, #tpu.memory_space<vmem>>, vector<32x128xf32>
      tpu.vector_store %arg8[%c0_11, %c0_12], %12 {strides = array<i32>} : memref<32x128xf32, #tpu.memory_space<vmem>>, vector<32x128xf32>,
    } else {
    }
    %c0 = arith.constant 0 : index
    %c0_1 = arith.constant 0 : index
    %3 = vector.load %arg3[%c0, %c0_1] : memref<32x192xbf16, #tpu.memory_space<vmem>>, vector<32x192xbf16>
    %c0_2 = arith.constant 0 : index
    %c0_3 = arith.constant 0 : index
    %4 = vector.load %arg8[%c0_2, %c0_3] : memref<32x128xf32, #tpu.memory_space<vmem>>, vector<32x128xf32>
    %c0_4 = arith.constant 0 : index
    %c0_5 = arith.constant 0 : index
    %5 = vector.load %arg4[%c0_4, %c0_5] : memref<192x128xbf16, #tpu.memory_space<vmem>>, vector<192x128xbf16>
    %cst = arith.constant dense<0.000000e+00> : vector<32x128xf32>
    %6 = tpu.matmul %3, %5, %cst {dimension_numbers = #tpu.dot_dimension_numbers<[1], [0], [0], [1], [0, 0, 1, 1], [], []>} : vector<32x192xbf16>, vector<192x128xbf16>, vector<32x128xf32> -> vector<32x128xf32>
    %7 = arith.addf %4, %6 : vector<32x128xf32>
    %c0_6 = arith.constant 0 : index
    %c0_7 = arith.constant 0 : index
    %8 = vector.load %arg8[%c0_6, %c0_7] : memref<32x128xf32, #tpu.memory_space<vmem>>, vector<32x128xf32>
    tpu.vector_store %arg8[%c0_6, %c0_7], %7 {strides = array<i32>} : memref<32x128xf32, #tpu.memory_space<vmem>>, vector<32x128xf32>,
    %c0_i32_8 = arith.constant 0 : i32
    %9 = arith.cmpi eq, %arg2, %c0_i32_8 : i32
    %10 = arith.extui %9 : i1 to i32
    %c0_i32_9 = arith.constant 0 : i32
    %11 = arith.cmpi ne, %10, %c0_i32_9 : i32
    scf.if %11 {
      %c0_10 = arith.constant 0 : index
      %c0_11 = arith.constant 0 : index
      %12 = vector.load %arg8[%c0_10, %c0_11] : memref<32x128xf32, #tpu.memory_space<vmem>>, vector<32x128xf32>
      %c0_12 = arith.constant 0 : index
      %c0_13 = arith.constant 0 : index
      %13 = vector.load %arg5[%c0_12, %c0_13] : memref<1x128xf32, #tpu.memory_space<vmem>>, vector<1x128xf32>
      %14 = vector.broadcast %13 : vector<1x128xf32> to vector<32x128xf32>
      %15 = arith.addf %12, %14 : vector<32x128xf32>
      %c0_14 = arith.constant 0 : index
      %c0_15 = arith.constant 0 : index
      %16 = vector.load %arg6[%c0_14, %c0_15] : memref<32x128xbf16, #tpu.memory_space<vmem>>, vector<32x128xbf16>
      %17 = arith.extf %16 : vector<32x128xbf16> to vector<32x128xf32>
      %18 = arith.addf %15, %17 : vector<32x128xf32>
      %19 = arith.truncf %18 : vector<32x128xf32> to vector<32x128xbf16>
      %c0_16 = arith.constant 0 : index
      %c0_17 = arith.constant 0 : index
      %20 = vector.load %arg7[%c0_16, %c0_17] : memref<32x128xbf16, #tpu.memory_space<vmem>>, vector<32x128xbf16>
      tpu.vector_store %arg7[%c0_16, %c0_17], %19 {strides = array<i32>} : memref<32x128xbf16, #tpu.memory_space<vmem>>, vector<32x128xbf16>,
    } else {
    }
    return
  }
  func.func @transform_0(%arg0: i32, %arg1: i32, %arg2: i32) -> (i32, i32) {
    %c0_i32 = arith.constant 0 : i32
    return %arg0, %arg2 : i32, i32
  }
  func.func @transform_1(%arg0: i32, %arg1: i32, %arg2: i32) -> (i32, i32) {
    %c0_i32 = arith.constant 0 : i32
    return %arg2, %arg1 : i32, i32
  }
  func.func @transform_2(%arg0: i32, %arg1: i32, %arg2: i32) -> (i32, i32) {
    %c0_i32 = arith.constant 0 : i32
    %c0_i32_0 = arith.constant 0 : i32
    return %c0_i32, %arg1 : i32, i32
  }
  func.func @transform_3(%arg0: i32, %arg1: i32, %arg2: i32) -> (i32, i32) {
    %c0_i32 = arith.constant 0 : i32
    return %arg0, %arg1 : i32, i32
  }
  func.func @transform_4(%arg0: i32, %arg1: i32, %arg2: i32) -> (i32, i32) {
    %c0_i32 = arith.constant 0 : i32
    return %arg0, %arg1 : i32, i32
  }
}

module attributes {stable_mosaic.version = 11 : i64} {
  func.func @_layernorm_kernel(%arg0: i32, %arg1: memref<48x128xbf16, #tpu.memory_space<vmem>>, %arg2: memref<1x128xf32, #tpu.memory_space<vmem>>, %arg3: memref<1x128xf32, #tpu.memory_space<vmem>>, %arg4: memref<48x128xbf16, #tpu.memory_space<vmem>>) attributes {dimension_semantics = [#tpu.dimension_semantics<parallel>], iteration_bounds = array<i64: 1>, scalar_prefetch = 0 : i64, scratch_operands = 0 : i64, tpu.core_type = #tpu.core_type<tc>, window_params = [{transform_indices = @transform_0, window_bounds = array<i64: 48, 128>}, {pipeline_mode = #tpu.pipeline_mode<synchronous>, transform_indices = @transform_1, window_bounds = array<i64: 1, 128>}, {pipeline_mode = #tpu.pipeline_mode<synchronous>, transform_indices = @transform_2, window_bounds = array<i64: 1, 128>}, {transform_indices = @transform_3, window_bounds = array<i64: 48, 128>}]} {
    %c0 = arith.constant 0 : index
    %c0_0 = arith.constant 0 : index
    %0 = vector.load %arg1[%c0, %c0_0] : memref<48x128xbf16, #tpu.memory_space<vmem>>, vector<48x128xbf16>
    %1 = arith.extf %0 : vector<48x128xbf16> to vector<48x128xf32>
    %cst = arith.constant dense<0.000000e+00> : vector<48xf32>
    %2 = vector.multi_reduction <add>, %1, %cst [1] : vector<48x128xf32> to vector<48xf32>
    %3 = vector.shape_cast %2 : vector<48xf32> to vector<48x1xf32>
    %cst_1 = arith.constant 1.280000e+02 : f32
    %4 = vector.broadcast %cst_1 : f32 to vector<48x1xf32>
    %5 = arith.divf %3, %4 : vector<48x1xf32>
    %6 = vector.broadcast %5 : vector<48x1xf32> to vector<48x128xf32>
    %7 = arith.subf %1, %6 : vector<48x128xf32>
    %8 = arith.mulf %7, %7 : vector<48x128xf32>
    %cst_2 = arith.constant dense<0.000000e+00> : vector<48xf32>
    %9 = vector.multi_reduction <add>, %8, %cst_2 [1] : vector<48x128xf32> to vector<48xf32>
    %10 = vector.shape_cast %9 : vector<48xf32> to vector<48x1xf32>
    %cst_3 = arith.constant 1.280000e+02 : f32
    %11 = vector.broadcast %cst_3 : f32 to vector<48x1xf32>
    %12 = arith.divf %10, %11 : vector<48x1xf32>
    %cst_4 = arith.constant 9.99999974E-6 : f32
    %13 = vector.broadcast %cst_4 : f32 to vector<48x1xf32>
    %14 = arith.addf %12, %13 : vector<48x1xf32>
    %15 = math.rsqrt %14 : vector<48x1xf32>
    %16 = vector.broadcast %15 : vector<48x1xf32> to vector<48x128xf32>
    %17 = arith.mulf %7, %16 : vector<48x128xf32>
    %c0_5 = arith.constant 0 : index
    %c0_6 = arith.constant 0 : index
    %18 = vector.load %arg2[%c0_5, %c0_6] : memref<1x128xf32, #tpu.memory_space<vmem>>, vector<1x128xf32>
    %19 = vector.broadcast %18 : vector<1x128xf32> to vector<48x128xf32>
    %20 = arith.mulf %17, %19 : vector<48x128xf32>
    %c0_7 = arith.constant 0 : index
    %c0_8 = arith.constant 0 : index
    %21 = vector.load %arg3[%c0_7, %c0_8] : memref<1x128xf32, #tpu.memory_space<vmem>>, vector<1x128xf32>
    %22 = vector.broadcast %21 : vector<1x128xf32> to vector<48x128xf32>
    %23 = arith.addf %20, %22 : vector<48x128xf32>
    %24 = arith.truncf %23 : vector<48x128xf32> to vector<48x128xbf16>
    %c0_9 = arith.constant 0 : index
    %c0_10 = arith.constant 0 : index
    %25 = vector.load %arg4[%c0_9, %c0_10] : memref<48x128xbf16, #tpu.memory_space<vmem>>, vector<48x128xbf16>
    tpu.vector_store %arg4[%c0_9, %c0_10], %24 {strides = array<i32>} : memref<48x128xbf16, #tpu.memory_space<vmem>>, vector<48x128xbf16>,
    return
  }
  func.func @transform_0(%arg0: i32) -> (i32, i32) {
    %c0_i32 = arith.constant 0 : i32
    %c0_i32_0 = arith.constant 0 : i32
    return %arg0, %c0_i32 : i32, i32
  }
  func.func @transform_1(%arg0: i32) -> (i32, i32) {
    %c0_i32 = arith.constant 0 : i32
    %c0_i32_0 = arith.constant 0 : i32
    %c0_i32_1 = arith.constant 0 : i32
    return %c0_i32, %c0_i32_0 : i32, i32
  }
  func.func @transform_2(%arg0: i32) -> (i32, i32) {
    %c0_i32 = arith.constant 0 : i32
    %c0_i32_0 = arith.constant 0 : i32
    %c0_i32_1 = arith.constant 0 : i32
    return %c0_i32, %c0_i32_0 : i32, i32
  }
  func.func @transform_3(%arg0: i32) -> (i32, i32) {
    %c0_i32 = arith.constant 0 : i32
    %c0_i32_0 = arith.constant 0 : i32
    return %arg0, %c0_i32 : i32, i32
  }
}

module attributes {stable_mosaic.version = 11 : i64} {
  func.func @_fused_matmul_kernel(%arg0: i32, %arg1: i32, %arg2: i32, %arg3: memref<48x128xbf16, #tpu.memory_space<vmem>>, %arg4: memref<128x384xbf16, #tpu.memory_space<vmem>>, %arg5: memref<1x128xf32, #tpu.memory_space<vmem>>, %arg6: memref<1x128xf32, #tpu.memory_space<vmem>>, %arg7: memref<1x384xf32, #tpu.memory_space<vmem>>, %arg8: memref<48x384xbf16, #tpu.memory_space<vmem>>, %arg9: memref<48x384xf32, #tpu.memory_space<vmem>>) attributes {dimension_semantics = [#tpu.dimension_semantics<parallel>, #tpu.dimension_semantics<parallel>, #tpu.dimension_semantics<arbitrary>], iteration_bounds = array<i64: 1, 1, 1>, scalar_prefetch = 0 : i64, scratch_operands = 1 : i64, tpu.core_type = #tpu.core_type<tc>, window_params = [{transform_indices = @transform_0, window_bounds = array<i64: 48, 128>}, {transform_indices = @transform_1, window_bounds = array<i64: 128, 384>}, {pipeline_mode = #tpu.pipeline_mode<synchronous>, transform_indices = @transform_2, window_bounds = array<i64: 1, 128>}, {pipeline_mode = #tpu.pipeline_mode<synchronous>, transform_indices = @transform_3, window_bounds = array<i64: 1, 128>}, {transform_indices = @transform_4, window_bounds = array<i64: 1, 384>}, {transform_indices = @transform_5, window_bounds = array<i64: 48, 384>}]} {
    %c0_i32 = arith.constant 0 : i32
    %0 = arith.cmpi eq, %arg2, %c0_i32 : i32
    %1 = arith.extui %0 : i1 to i32
    %c0_i32_0 = arith.constant 0 : i32
    %2 = arith.cmpi ne, %1, %c0_i32_0 : i32
    scf.if %2 {
      %cst_19 = arith.constant 0.000000e+00 : f32
      %36 = vector.broadcast %cst_19 : f32 to vector<48x384xf32>
      %c0_20 = arith.constant 0 : index
      %c0_21 = arith.constant 0 : index
      %37 = vector.load %arg9[%c0_20, %c0_21] : memref<48x384xf32, #tpu.memory_space<vmem>>, vector<48x384xf32>
      tpu.vector_store %arg9[%c0_20, %c0_21], %36 {strides = array<i32>} : memref<48x384xf32, #tpu.memory_space<vmem>>, vector<48x384xf32>,
    } else {
    }
    %c0 = arith.constant 0 : index
    %c0_1 = arith.constant 0 : index
    %3 = vector.load %arg3[%c0, %c0_1] : memref<48x128xbf16, #tpu.memory_space<vmem>>, vector<48x128xbf16>
    %4 = arith.extf %3 : vector<48x128xbf16> to vector<48x128xf32>
    %cst = arith.constant dense<0.000000e+00> : vector<48xf32>
    %5 = vector.multi_reduction <add>, %4, %cst [1] : vector<48x128xf32> to vector<48xf32>
    %6 = vector.shape_cast %5 : vector<48xf32> to vector<48x1xf32>
    %cst_2 = arith.constant 1.280000e+02 : f32
    %7 = vector.broadcast %cst_2 : f32 to vector<48x1xf32>
    %8 = arith.divf %6, %7 : vector<48x1xf32>
    %9 = vector.broadcast %8 : vector<48x1xf32> to vector<48x128xf32>
    %10 = arith.subf %4, %9 : vector<48x128xf32>
    %11 = arith.mulf %10, %10 : vector<48x128xf32>
    %cst_3 = arith.constant dense<0.000000e+00> : vector<48xf32>
    %12 = vector.multi_reduction <add>, %11, %cst_3 [1] : vector<48x128xf32> to vector<48xf32>
    %13 = vector.shape_cast %12 : vector<48xf32> to vector<48x1xf32>
    %cst_4 = arith.constant 1.280000e+02 : f32
    %14 = vector.broadcast %cst_4 : f32 to vector<48x1xf32>
    %15 = arith.divf %13, %14 : vector<48x1xf32>
    %cst_5 = arith.constant 9.99999974E-6 : f32
    %16 = vector.broadcast %cst_5 : f32 to vector<48x1xf32>
    %17 = arith.addf %15, %16 : vector<48x1xf32>
    %18 = math.rsqrt %17 : vector<48x1xf32>
    %19 = vector.broadcast %18 : vector<48x1xf32> to vector<48x128xf32>
    %20 = arith.mulf %10, %19 : vector<48x128xf32>
    %c0_6 = arith.constant 0 : index
    %c0_7 = arith.constant 0 : index
    %21 = vector.load %arg5[%c0_6, %c0_7] : memref<1x128xf32, #tpu.memory_space<vmem>>, vector<1x128xf32>
    %22 = vector.broadcast %21 : vector<1x128xf32> to vector<48x128xf32>
    %23 = arith.mulf %20, %22 : vector<48x128xf32>
    %c0_8 = arith.constant 0 : index
    %c0_9 = arith.constant 0 : index
    %24 = vector.load %arg6[%c0_8, %c0_9] : memref<1x128xf32, #tpu.memory_space<vmem>>, vector<1x128xf32>
    %25 = vector.broadcast %24 : vector<1x128xf32> to vector<48x128xf32>
    %26 = arith.addf %23, %25 : vector<48x128xf32>
    %27 = arith.truncf %26 : vector<48x128xf32> to vector<48x128xbf16>
    %c0_10 = arith.constant 0 : index
    %c0_11 = arith.constant 0 : index
    %28 = vector.load %arg9[%c0_10, %c0_11] : memref<48x384xf32, #tpu.memory_space<vmem>>, vector<48x384xf32>
    %c0_12 = arith.constant 0 : index
    %c0_13 = arith.constant 0 : index
    %29 = vector.load %arg4[%c0_12, %c0_13] : memref<128x384xbf16, #tpu.memory_space<vmem>>, vector<128x384xbf16>
    %cst_14 = arith.constant dense<0.000000e+00> : vector<48x384xf32>
    %30 = tpu.matmul %27, %29, %cst_14 {dimension_numbers = #tpu.dot_dimension_numbers<[1], [0], [0], [1], [0, 0, 1, 1], [], []>} : vector<48x128xbf16>, vector<128x384xbf16>, vector<48x384xf32> -> vector<48x384xf32>
    %31 = arith.addf %28, %30 : vector<48x384xf32>
    %c0_15 = arith.constant 0 : index
    %c0_16 = arith.constant 0 : index
    %32 = vector.load %arg9[%c0_15, %c0_16] : memref<48x384xf32, #tpu.memory_space<vmem>>, vector<48x384xf32>
    tpu.vector_store %arg9[%c0_15, %c0_16], %31 {strides = array<i32>} : memref<48x384xf32, #tpu.memory_space<vmem>>, vector<48x384xf32>,
    %c0_i32_17 = arith.constant 0 : i32
    %33 = arith.cmpi eq, %arg2, %c0_i32_17 : i32
    %34 = arith.extui %33 : i1 to i32
    %c0_i32_18 = arith.constant 0 : i32
    %35 = arith.cmpi ne, %34, %c0_i32_18 : i32
    scf.if %35 {
      %c0_19 = arith.constant 0 : index
      %c0_20 = arith.constant 0 : index
      %36 = vector.load %arg9[%c0_19, %c0_20] : memref<48x384xf32, #tpu.memory_space<vmem>>, vector<48x384xf32>
      %c0_21 = arith.constant 0 : index
      %c0_22 = arith.constant 0 : index
      %37 = vector.load %arg7[%c0_21, %c0_22] : memref<1x384xf32, #tpu.memory_space<vmem>>, vector<1x384xf32>
      %38 = vector.broadcast %37 : vector<1x384xf32> to vector<48x384xf32>
      %39 = arith.addf %36, %38 : vector<48x384xf32>
      %40 = arith.truncf %39 : vector<48x384xf32> to vector<48x384xbf16>
      %c0_23 = arith.constant 0 : index
      %c0_24 = arith.constant 0 : index
      %41 = vector.load %arg8[%c0_23, %c0_24] : memref<48x384xbf16, #tpu.memory_space<vmem>>, vector<48x384xbf16>
      tpu.vector_store %arg8[%c0_23, %c0_24], %40 {strides = array<i32>} : memref<48x384xbf16, #tpu.memory_space<vmem>>, vector<48x384xbf16>,
    } else {
    }
    return
  }
  func.func @transform_0(%arg0: i32, %arg1: i32, %arg2: i32) -> (i32, i32) {
    %c0_i32 = arith.constant 0 : i32
    return %arg0, %arg2 : i32, i32
  }
  func.func @transform_1(%arg0: i32, %arg1: i32, %arg2: i32) -> (i32, i32) {
    %c0_i32 = arith.constant 0 : i32
    return %arg2, %arg1 : i32, i32
  }
  func.func @transform_2(%arg0: i32, %arg1: i32, %arg2: i32) -> (i32, i32) {
    %c0_i32 = arith.constant 0 : i32
    %c0_i32_0 = arith.constant 0 : i32
    %c0_i32_1 = arith.constant 0 : i32
    return %c0_i32, %c0_i32_0 : i32, i32
  }
  func.func @transform_3(%arg0: i32, %arg1: i32, %arg2: i32) -> (i32, i32) {
    %c0_i32 = arith.constant 0 : i32
    %c0_i32_0 = arith.constant 0 : i32
    %c0_i32_1 = arith.constant 0 : i32
    return %c0_i32, %c0_i32_0 : i32, i32
  }
  func.func @transform_4(%arg0: i32, %arg1: i32, %arg2: i32) -> (i32, i32) {
    %c0_i32 = arith.constant 0 : i32
    %c0_i32_0 = arith.constant 0 : i32
    return %c0_i32, %arg1 : i32, i32
  }
  func.func @transform_5(%arg0: i32, %arg1: i32, %arg2: i32) -> (i32, i32) {
    %c0_i32 = arith.constant 0 : i32
    return %arg0, %arg1 : i32, i32
  }
}

module attributes {stable_mosaic.version = 11 : i64} {
  func.func @_fused_matmul_kernel(%arg0: i32, %arg1: i32, %arg2: i32, %arg3: memref<48x128xbf16, #tpu.memory_space<vmem>>, %arg4: memref<128x128xbf16, #tpu.memory_space<vmem>>, %arg5: memref<1x128xf32, #tpu.memory_space<vmem>>, %arg6: memref<48x128xbf16, #tpu.memory_space<vmem>>, %arg7: memref<48x128xbf16, #tpu.memory_space<vmem>>, %arg8: memref<48x128xf32, #tpu.memory_space<vmem>>) attributes {dimension_semantics = [#tpu.dimension_semantics<parallel>, #tpu.dimension_semantics<parallel>, #tpu.dimension_semantics<arbitrary>], iteration_bounds = array<i64: 1, 1, 1>, scalar_prefetch = 0 : i64, scratch_operands = 1 : i64, tpu.core_type = #tpu.core_type<tc>, window_params = [{transform_indices = @transform_0, window_bounds = array<i64: 48, 128>}, {transform_indices = @transform_1, window_bounds = array<i64: 128, 128>}, {transform_indices = @transform_2, window_bounds = array<i64: 1, 128>}, {transform_indices = @transform_3, window_bounds = array<i64: 48, 128>}, {transform_indices = @transform_4, window_bounds = array<i64: 48, 128>}]} {
    %c0_i32 = arith.constant 0 : i32
    %0 = arith.cmpi eq, %arg2, %c0_i32 : i32
    %1 = arith.extui %0 : i1 to i32
    %c0_i32_0 = arith.constant 0 : i32
    %2 = arith.cmpi ne, %1, %c0_i32_0 : i32
    scf.if %2 {
      %cst_10 = arith.constant 0.000000e+00 : f32
      %12 = vector.broadcast %cst_10 : f32 to vector<48x128xf32>
      %c0_11 = arith.constant 0 : index
      %c0_12 = arith.constant 0 : index
      %13 = vector.load %arg8[%c0_11, %c0_12] : memref<48x128xf32, #tpu.memory_space<vmem>>, vector<48x128xf32>
      tpu.vector_store %arg8[%c0_11, %c0_12], %12 {strides = array<i32>} : memref<48x128xf32, #tpu.memory_space<vmem>>, vector<48x128xf32>,
    } else {
    }
    %c0 = arith.constant 0 : index
    %c0_1 = arith.constant 0 : index
    %3 = vector.load %arg3[%c0, %c0_1] : memref<48x128xbf16, #tpu.memory_space<vmem>>, vector<48x128xbf16>
    %c0_2 = arith.constant 0 : index
    %c0_3 = arith.constant 0 : index
    %4 = vector.load %arg8[%c0_2, %c0_3] : memref<48x128xf32, #tpu.memory_space<vmem>>, vector<48x128xf32>
    %c0_4 = arith.constant 0 : index
    %c0_5 = arith.constant 0 : index
    %5 = vector.load %arg4[%c0_4, %c0_5] : memref<128x128xbf16, #tpu.memory_space<vmem>>, vector<128x128xbf16>
    %cst = arith.constant dense<0.000000e+00> : vector<48x128xf32>
    %6 = tpu.matmul %3, %5, %cst {dimension_numbers = #tpu.dot_dimension_numbers<[1], [0], [0], [1], [0, 0, 1, 1], [], []>} : vector<48x128xbf16>, vector<128x128xbf16>, vector<48x128xf32> -> vector<48x128xf32>
    %7 = arith.addf %4, %6 : vector<48x128xf32>
    %c0_6 = arith.constant 0 : index
    %c0_7 = arith.constant 0 : index
    %8 = vector.load %arg8[%c0_6, %c0_7] : memref<48x128xf32, #tpu.memory_space<vmem>>, vector<48x128xf32>
    tpu.vector_store %arg8[%c0_6, %c0_7], %7 {strides = array<i32>} : memref<48x128xf32, #tpu.memory_space<vmem>>, vector<48x128xf32>,
    %c0_i32_8 = arith.constant 0 : i32
    %9 = arith.cmpi eq, %arg2, %c0_i32_8 : i32
    %10 = arith.extui %9 : i1 to i32
    %c0_i32_9 = arith.constant 0 : i32
    %11 = arith.cmpi ne, %10, %c0_i32_9 : i32
    scf.if %11 {
      %c0_10 = arith.constant 0 : index
      %c0_11 = arith.constant 0 : index
      %12 = vector.load %arg8[%c0_10, %c0_11] : memref<48x128xf32, #tpu.memory_space<vmem>>, vector<48x128xf32>
      %c0_12 = arith.constant 0 : index
      %c0_13 = arith.constant 0 : index
      %13 = vector.load %arg5[%c0_12, %c0_13] : memref<1x128xf32, #tpu.memory_space<vmem>>, vector<1x128xf32>
      %14 = vector.broadcast %13 : vector<1x128xf32> to vector<48x128xf32>
      %15 = arith.addf %12, %14 : vector<48x128xf32>
      %c0_14 = arith.constant 0 : index
      %c0_15 = arith.constant 0 : index
      %16 = vector.load %arg6[%c0_14, %c0_15] : memref<48x128xbf16, #tpu.memory_space<vmem>>, vector<48x128xbf16>
      %17 = arith.extf %16 : vector<48x128xbf16> to vector<48x128xf32>
      %18 = arith.addf %15, %17 : vector<48x128xf32>
      %19 = arith.truncf %18 : vector<48x128xf32> to vector<48x128xbf16>
      %c0_16 = arith.constant 0 : index
      %c0_17 = arith.constant 0 : index
      %20 = vector.load %arg7[%c0_16, %c0_17] : memref<48x128xbf16, #tpu.memory_space<vmem>>, vector<48x128xbf16>
      tpu.vector_store %arg7[%c0_16, %c0_17], %19 {strides = array<i32>} : memref<48x128xbf16, #tpu.memory_space<vmem>>, vector<48x128xbf16>,
    } else {
    }
    return
  }
  func.func @transform_0(%arg0: i32, %arg1: i32, %arg2: i32) -> (i32, i32) {
    %c0_i32 = arith.constant 0 : i32
    return %arg0, %arg2 : i32, i32
  }
  func.func @transform_1(%arg0: i32, %arg1: i32, %arg2: i32) -> (i32, i32) {
    %c0_i32 = arith.constant 0 : i32
    return %arg2, %arg1 : i32, i32
  }
  func.func @transform_2(%arg0: i32, %arg1: i32, %arg2: i32) -> (i32, i32) {
    %c0_i32 = arith.constant 0 : i32
    %c0_i32_0 = arith.constant 0 : i32
    return %c0_i32, %arg1 : i32, i32
  }
  func.func @transform_3(%arg0: i32, %arg1: i32, %arg2: i32) -> (i32, i32) {
    %c0_i32 = arith.constant 0 : i32
    return %arg0, %arg1 : i32, i32
  }
  func.func @transform_4(%arg0: i32, %arg1: i32, %arg2: i32) -> (i32, i32) {
    %c0_i32 = arith.constant 0 : i32
    return %arg0, %arg1 : i32, i32
  }
}

module attributes {stable_mosaic.version = 11 : i64} {
  func.func @_attn_kernel(%arg0: i32, %arg1: i32, %arg2: memref<1x24x128xbf16, #tpu.memory_space<vmem>>, %arg3: memref<1x24x128xbf16, #tpu.memory_space<vmem>>, %arg4: memref<1x24x128xbf16, #tpu.memory_space<vmem>>, %arg5: memref<1x24x128xbf16, #tpu.memory_space<vmem>>) attributes {dimension_semantics = [#tpu.dimension_semantics<parallel>, #tpu.dimension_semantics<parallel>], iteration_bounds = array<i64: 2, 1>, scalar_prefetch = 0 : i64, scratch_operands = 0 : i64, tpu.core_type = #tpu.core_type<tc>, window_params = [{transform_indices = @transform_0, window_bounds = array<i64: 1, 24, 128>}, {transform_indices = @transform_1, window_bounds = array<i64: 1, 24, 128>}, {transform_indices = @transform_2, window_bounds = array<i64: 1, 24, 128>}, {transform_indices = @transform_3, window_bounds = array<i64: 1, 24, 128>}]} {
    %c0 = arith.constant 0 : index
    %c0_0 = arith.constant 0 : index
    %c0_1 = arith.constant 0 : index
    %0 = vector.load %arg2[%c0, %c0_0, %c0_1] : memref<1x24x128xbf16, #tpu.memory_space<vmem>>, vector<1x24x128xbf16>
    %1 = vector.shape_cast %0 : vector<1x24x128xbf16> to vector<24x128xbf16>
    %c0_2 = arith.constant 0 : index
    %c0_3 = arith.constant 0 : index
    %c0_4 = arith.constant 0 : index
    %2 = vector.load %arg3[%c0_2, %c0_3, %c0_4] : memref<1x24x128xbf16, #tpu.memory_space<vmem>>, vector<1x24x128xbf16>
    %3 = vector.shape_cast %2 : vector<1x24x128xbf16> to vector<24x128xbf16>
    %c0_5 = arith.constant 0 : index
    %c0_6 = arith.constant 0 : index
    %c0_7 = arith.constant 0 : index
    %4 = vector.load %arg4[%c0_5, %c0_6, %c0_7] : memref<1x24x128xbf16, #tpu.memory_space<vmem>>, vector<1x24x128xbf16>
    %5 = vector.shape_cast %4 : vector<1x24x128xbf16> to vector<24x128xbf16>
    %6 = vector.extract_strided_slice %1 {offsets = [0, 0], sizes = [24, 64], strides = [1, 1]} : vector<24x128xbf16> to vector<24x64xbf16>
    %7 = vector.extract_strided_slice %3 {offsets = [0, 0], sizes = [24, 64], strides = [1, 1]} : vector<24x128xbf16> to vector<24x64xbf16>
    %8 = vector.extract_strided_slice %5 {offsets = [0, 0], sizes = [24, 64], strides = [1, 1]} : vector<24x128xbf16> to vector<24x64xbf16>
    %cst = arith.constant dense<0.000000e+00> : vector<24x24xf32>
    %9 = tpu.matmul %6, %7, %cst {dimension_numbers = #tpu.dot_dimension_numbers<[1], [1], [0], [0], [0, 0, 1, 0], [], []>} : vector<24x64xbf16>, vector<24x64xbf16>, vector<24x24xf32> -> vector<24x24xf32>
    %cst_8 = arith.constant 1.250000e-01 : f32
    %10 = vector.broadcast %cst_8 : f32 to vector<24x24xf32>
    %11 = arith.mulf %9, %10 : vector<24x24xf32>
    %12 = tpu.iota {dimensions = array<i32: 1>} : vector<24x24xi32>
    %c17_i32 = arith.constant 17 : i32
    %13 = vector.broadcast %c17_i32 : i32 to vector<24x24xi32>
    %14 = arith.cmpi slt, %12, %13 : vector<24x24xi32>
    %cst_9 = arith.constant -1.000000e+30 : f32
    %15 = vector.broadcast %cst_9 : f32 to vector<24x24xf32>
    %16 = arith.select %14, %11, %15 : vector<24x24xi1>, vector<24x24xf32>
    %cst_10 = arith.constant dense<0xFF800000> : vector<24xf32>
    %17 = vector.multi_reduction <maximumf>, %16, %cst_10 [1] : vector<24x24xf32> to vector<24xf32>
    %18 = vector.shape_cast %17 : vector<24xf32> to vector<24x1xf32>
    %19 = vector.broadcast %18 : vector<24x1xf32> to vector<24x24xf32>
    %20 = arith.subf %16, %19 : vector<24x24xf32>
    %21 = math.exp %20 : vector<24x24xf32>
    %cst_11 = arith.constant dense<0.000000e+00> : vector<24xf32>
    %22 = vector.multi_reduction <add>, %21, %cst_11 [1] : vector<24x24xf32> to vector<24xf32>
    %23 = vector.shape_cast %22 : vector<24xf32> to vector<24x1xf32>
    %24 = tpu.reciprocal %23 {approx = true} : vector<24x1xf32> -> vector<24x1xf32>
    %25 = vector.broadcast %24 : vector<24x1xf32> to vector<24x24xf32>
    %26 = arith.mulf %21, %25 : vector<24x24xf32>
    %27 = arith.truncf %26 : vector<24x24xf32> to vector<24x24xbf16>
    %cst_12 = arith.constant dense<0.000000e+00> : vector<24x64xf32>
    %28 = tpu.matmul %27, %8, %cst_12 {dimension_numbers = #tpu.dot_dimension_numbers<[1], [0], [0], [1], [0, 0, 1, 1], [], []>} : vector<24x24xbf16>, vector<24x64xbf16>, vector<24x64xf32> -> vector<24x64xf32>
    %29 = vector.extract_strided_slice %1 {offsets = [0, 64], sizes = [24, 64], strides = [1, 1]} : vector<24x128xbf16> to vector<24x64xbf16>
    %30 = vector.extract_strided_slice %3 {offsets = [0, 64], sizes = [24, 64], strides = [1, 1]} : vector<24x128xbf16> to vector<24x64xbf16>
    %31 = vector.extract_strided_slice %5 {offsets = [0, 64], sizes = [24, 64], strides = [1, 1]} : vector<24x128xbf16> to vector<24x64xbf16>
    %cst_13 = arith.constant dense<0.000000e+00> : vector<24x24xf32>
    %32 = tpu.matmul %29, %30, %cst_13 {dimension_numbers = #tpu.dot_dimension_numbers<[1], [1], [0], [0], [0, 0, 1, 0], [], []>} : vector<24x64xbf16>, vector<24x64xbf16>, vector<24x24xf32> -> vector<24x24xf32>
    %cst_14 = arith.constant 1.250000e-01 : f32
    %33 = vector.broadcast %cst_14 : f32 to vector<24x24xf32>
    %34 = arith.mulf %32, %33 : vector<24x24xf32>
    %35 = tpu.iota {dimensions = array<i32: 1>} : vector<24x24xi32>
    %c17_i32_15 = arith.constant 17 : i32
    %36 = vector.broadcast %c17_i32_15 : i32 to vector<24x24xi32>
    %37 = arith.cmpi slt, %35, %36 : vector<24x24xi32>
    %cst_16 = arith.constant -1.000000e+30 : f32
    %38 = vector.broadcast %cst_16 : f32 to vector<24x24xf32>
    %39 = arith.select %37, %34, %38 : vector<24x24xi1>, vector<24x24xf32>
    %cst_17 = arith.constant dense<0xFF800000> : vector<24xf32>
    %40 = vector.multi_reduction <maximumf>, %39, %cst_17 [1] : vector<24x24xf32> to vector<24xf32>
    %41 = vector.shape_cast %40 : vector<24xf32> to vector<24x1xf32>
    %42 = vector.broadcast %41 : vector<24x1xf32> to vector<24x24xf32>
    %43 = arith.subf %39, %42 : vector<24x24xf32>
    %44 = math.exp %43 : vector<24x24xf32>
    %cst_18 = arith.constant dense<0.000000e+00> : vector<24xf32>
    %45 = vector.multi_reduction <add>, %44, %cst_18 [1] : vector<24x24xf32> to vector<24xf32>
    %46 = vector.shape_cast %45 : vector<24xf32> to vector<24x1xf32>
    %47 = tpu.reciprocal %46 {approx = true} : vector<24x1xf32> -> vector<24x1xf32>
    %48 = vector.broadcast %47 : vector<24x1xf32> to vector<24x24xf32>
    %49 = arith.mulf %44, %48 : vector<24x24xf32>
    %50 = arith.truncf %49 : vector<24x24xf32> to vector<24x24xbf16>
    %cst_19 = arith.constant dense<0.000000e+00> : vector<24x64xf32>
    %51 = tpu.matmul %50, %31, %cst_19 {dimension_numbers = #tpu.dot_dimension_numbers<[1], [0], [0], [1], [0, 0, 1, 1], [], []>} : vector<24x24xbf16>, vector<24x64xbf16>, vector<24x64xf32> -> vector<24x64xf32>
    %52 = tpu.concatenate %28, %51 in 1 : vector<24x64xf32>, vector<24x64xf32> -> vector<24x128xf32>
    %53 = arith.truncf %52 : vector<24x128xf32> to vector<24x128xbf16>
    %c0_20 = arith.constant 0 : index
    %c0_21 = arith.constant 0 : index
    %c0_22 = arith.constant 0 : index
    %54 = vector.load %arg5[%c0_20, %c0_21, %c0_22] : memref<1x24x128xbf16, #tpu.memory_space<vmem>>, vector<1x24x128xbf16>
    %55 = vector.shape_cast %54 : vector<1x24x128xbf16> to vector<24x128xbf16>
    %56 = vector.shape_cast %53 : vector<24x128xbf16> to vector<1x24x128xbf16>
    tpu.vector_store %arg5[%c0_20, %c0_21, %c0_22], %56 {strides = array<i32>} : memref<1x24x128xbf16, #tpu.memory_space<vmem>>, vector<1x24x128xbf16>,
    return
  }
  func.func @transform_0(%arg0: i32, %arg1: i32) -> (i32, i32, i32) {
    %c0_i32 = arith.constant 0 : i32
    %0 = arith.addi %c0_i32, %arg1 : i32
    %c0_i32_0 = arith.constant 0 : i32
    %c0_i32_1 = arith.constant 0 : i32
    return %arg0, %c0_i32_0, %0 : i32, i32, i32
  }
  func.func @transform_1(%arg0: i32, %arg1: i32) -> (i32, i32, i32) {
    %c1_i32 = arith.constant 1 : i32
    %0 = arith.addi %c1_i32, %arg1 : i32
    %c0_i32 = arith.constant 0 : i32
    %c0_i32_0 = arith.constant 0 : i32
    return %arg0, %c0_i32, %0 : i32, i32, i32
  }
  func.func @transform_2(%arg0: i32, %arg1: i32) -> (i32, i32, i32) {
    %c2_i32 = arith.constant 2 : i32
    %0 = arith.addi %c2_i32, %arg1 : i32
    %c0_i32 = arith.constant 0 : i32
    %c0_i32_0 = arith.constant 0 : i32
    return %arg0, %c0_i32, %0 : i32, i32, i32
  }
  func.func @transform_3(%arg0: i32, %arg1: i32) -> (i32, i32, i32) {
    %c0_i32 = arith.constant 0 : i32
    %c0_i32_0 = arith.constant 0 : i32
    return %arg0, %c0_i32, %arg1 : i32, i32, i32
  }
}

module attributes {stable_mosaic.version = 11 : i64} {
  func.func @_layernorm_kernel(%arg0: i32, %arg1: memref<2x128xbf16, #tpu.memory_space<vmem>>, %arg2: memref<1x128xf32, #tpu.memory_space<vmem>>, %arg3: memref<1x128xf32, #tpu.memory_space<vmem>>, %arg4: memref<2x128xbf16, #tpu.memory_space<vmem>>) attributes {dimension_semantics = [#tpu.dimension_semantics<parallel>], iteration_bounds = array<i64: 1>, scalar_prefetch = 0 : i64, scratch_operands = 0 : i64, tpu.core_type = #tpu.core_type<tc>, window_params = [{transform_indices = @transform_0, window_bounds = array<i64: 2, 128>}, {pipeline_mode = #tpu.pipeline_mode<synchronous>, transform_indices = @transform_1, window_bounds = array<i64: 1, 128>}, {pipeline_mode = #tpu.pipeline_mode<synchronous>, transform_indices = @transform_2, window_bounds = array<i64: 1, 128>}, {transform_indices = @transform_3, window_bounds = array<i64: 2, 128>}]} {
    %c0 = arith.constant 0 : index
    %c0_0 = arith.constant 0 : index
    %0 = vector.load %arg1[%c0, %c0_0] : memref<2x128xbf16, #tpu.memory_space<vmem>>, vector<2x128xbf16>
    %1 = arith.extf %0 : vector<2x128xbf16> to vector<2x128xf32>
    %cst = arith.constant dense<0.000000e+00> : vector<2xf32>
    %2 = vector.multi_reduction <add>, %1, %cst [1] : vector<2x128xf32> to vector<2xf32>
    %3 = vector.shape_cast %2 : vector<2xf32> to vector<2x1xf32>
    %cst_1 = arith.constant 1.280000e+02 : f32
    %4 = vector.broadcast %cst_1 : f32 to vector<2x1xf32>
    %5 = arith.divf %3, %4 : vector<2x1xf32>
    %6 = vector.broadcast %5 : vector<2x1xf32> to vector<2x128xf32>
    %7 = arith.subf %1, %6 : vector<2x128xf32>
    %8 = arith.mulf %7, %7 : vector<2x128xf32>
    %cst_2 = arith.constant dense<0.000000e+00> : vector<2xf32>
    %9 = vector.multi_reduction <add>, %8, %cst_2 [1] : vector<2x128xf32> to vector<2xf32>
    %10 = vector.shape_cast %9 : vector<2xf32> to vector<2x1xf32>
    %cst_3 = arith.constant 1.280000e+02 : f32
    %11 = vector.broadcast %cst_3 : f32 to vector<2x1xf32>
    %12 = arith.divf %10, %11 : vector<2x1xf32>
    %cst_4 = arith.constant 9.99999974E-6 : f32
    %13 = vector.broadcast %cst_4 : f32 to vector<2x1xf32>
    %14 = arith.addf %12, %13 : vector<2x1xf32>
    %15 = math.rsqrt %14 : vector<2x1xf32>
    %16 = vector.broadcast %15 : vector<2x1xf32> to vector<2x128xf32>
    %17 = arith.mulf %7, %16 : vector<2x128xf32>
    %c0_5 = arith.constant 0 : index
    %c0_6 = arith.constant 0 : index
    %18 = vector.load %arg2[%c0_5, %c0_6] : memref<1x128xf32, #tpu.memory_space<vmem>>, vector<1x128xf32>
    %19 = vector.broadcast %18 : vector<1x128xf32> to vector<2x128xf32>
    %20 = arith.mulf %17, %19 : vector<2x128xf32>
    %c0_7 = arith.constant 0 : index
    %c0_8 = arith.constant 0 : index
    %21 = vector.load %arg3[%c0_7, %c0_8] : memref<1x128xf32, #tpu.memory_space<vmem>>, vector<1x128xf32>
    %22 = vector.broadcast %21 : vector<1x128xf32> to vector<2x128xf32>
    %23 = arith.addf %20, %22 : vector<2x128xf32>
    %24 = arith.truncf %23 : vector<2x128xf32> to vector<2x128xbf16>
    %c0_9 = arith.constant 0 : index
    %c0_10 = arith.constant 0 : index
    %25 = vector.load %arg4[%c0_9, %c0_10] : memref<2x128xbf16, #tpu.memory_space<vmem>>, vector<2x128xbf16>
    tpu.vector_store %arg4[%c0_9, %c0_10], %24 {strides = array<i32>} : memref<2x128xbf16, #tpu.memory_space<vmem>>, vector<2x128xbf16>,
    return
  }
  func.func @transform_0(%arg0: i32) -> (i32, i32) {
    %c0_i32 = arith.constant 0 : i32
    %c0_i32_0 = arith.constant 0 : i32
    return %arg0, %c0_i32 : i32, i32
  }
  func.func @transform_1(%arg0: i32) -> (i32, i32) {
    %c0_i32 = arith.constant 0 : i32
    %c0_i32_0 = arith.constant 0 : i32
    %c0_i32_1 = arith.constant 0 : i32
    return %c0_i32, %c0_i32_0 : i32, i32
  }
  func.func @transform_2(%arg0: i32) -> (i32, i32) {
    %c0_i32 = arith.constant 0 : i32
    %c0_i32_0 = arith.constant 0 : i32
    %c0_i32_1 = arith.constant 0 : i32
    return %c0_i32, %c0_i32_0 : i32, i32
  }
  func.func @transform_3(%arg0: i32) -> (i32, i32) {
    %c0_i32 = arith.constant 0 : i32
    %c0_i32_0 = arith.constant 0 : i32
    return %arg0, %c0_i32 : i32, i32
  }
}

module attributes {stable_mosaic.version = 11 : i64} {
  func.func @_fused_matmul_kernel(%arg0: i32, %arg1: i32, %arg2: i32, %arg3: memref<48x512xbf16, #tpu.memory_space<vmem>>, %arg4: memref<512x128xbf16, #tpu.memory_space<vmem>>, %arg5: memref<1x128xf32, #tpu.memory_space<vmem>>, %arg6: memref<48x128xbf16, #tpu.memory_space<vmem>>, %arg7: memref<48x128xbf16, #tpu.memory_space<vmem>>, %arg8: memref<48x128xf32, #tpu.memory_space<vmem>>) attributes {dimension_semantics = [#tpu.dimension_semantics<parallel>, #tpu.dimension_semantics<parallel>, #tpu.dimension_semantics<arbitrary>], iteration_bounds = array<i64: 1, 1, 1>, scalar_prefetch = 0 : i64, scratch_operands = 1 : i64, tpu.core_type = #tpu.core_type<tc>, window_params = [{transform_indices = @transform_0, window_bounds = array<i64: 48, 512>}, {transform_indices = @transform_1, window_bounds = array<i64: 512, 128>}, {transform_indices = @transform_2, window_bounds = array<i64: 1, 128>}, {transform_indices = @transform_3, window_bounds = array<i64: 48, 128>}, {transform_indices = @transform_4, window_bounds = array<i64: 48, 128>}]} {
    %c0_i32 = arith.constant 0 : i32
    %0 = arith.cmpi eq, %arg2, %c0_i32 : i32
    %1 = arith.extui %0 : i1 to i32
    %c0_i32_0 = arith.constant 0 : i32
    %2 = arith.cmpi ne, %1, %c0_i32_0 : i32
    scf.if %2 {
      %cst_10 = arith.constant 0.000000e+00 : f32
      %12 = vector.broadcast %cst_10 : f32 to vector<48x128xf32>
      %c0_11 = arith.constant 0 : index
      %c0_12 = arith.constant 0 : index
      %13 = vector.load %arg8[%c0_11, %c0_12] : memref<48x128xf32, #tpu.memory_space<vmem>>, vector<48x128xf32>
      tpu.vector_store %arg8[%c0_11, %c0_12], %12 {strides = array<i32>} : memref<48x128xf32, #tpu.memory_space<vmem>>, vector<48x128xf32>,
    } else {
    }
    %c0 = arith.constant 0 : index
    %c0_1 = arith.constant 0 : index
    %3 = vector.load %arg3[%c0, %c0_1] : memref<48x512xbf16, #tpu.memory_space<vmem>>, vector<48x512xbf16>
    %c0_2 = arith.constant 0 : index
    %c0_3 = arith.constant 0 : index
    %4 = vector.load %arg8[%c0_2, %c0_3] : memref<48x128xf32, #tpu.memory_space<vmem>>, vector<48x128xf32>
    %c0_4 = arith.constant 0 : index
    %c0_5 = arith.constant 0 : index
    %5 = vector.load %arg4[%c0_4, %c0_5] : memref<512x128xbf16, #tpu.memory_space<vmem>>, vector<512x128xbf16>
    %cst = arith.constant dense<0.000000e+00> : vector<48x128xf32>
    %6 = tpu.matmul %3, %5, %cst {dimension_numbers = #tpu.dot_dimension_numbers<[1], [0], [0], [1], [0, 0, 1, 1], [], []>} : vector<48x512xbf16>, vector<512x128xbf16>, vector<48x128xf32> -> vector<48x128xf32>
    %7 = arith.addf %4, %6 : vector<48x128xf32>
    %c0_6 = arith.constant 0 : index
    %c0_7 = arith.constant 0 : index
    %8 = vector.load %arg8[%c0_6, %c0_7] : memref<48x128xf32, #tpu.memory_space<vmem>>, vector<48x128xf32>
    tpu.vector_store %arg8[%c0_6, %c0_7], %7 {strides = array<i32>} : memref<48x128xf32, #tpu.memory_space<vmem>>, vector<48x128xf32>,
    %c0_i32_8 = arith.constant 0 : i32
    %9 = arith.cmpi eq, %arg2, %c0_i32_8 : i32
    %10 = arith.extui %9 : i1 to i32
    %c0_i32_9 = arith.constant 0 : i32
    %11 = arith.cmpi ne, %10, %c0_i32_9 : i32
    scf.if %11 {
      %c0_10 = arith.constant 0 : index
      %c0_11 = arith.constant 0 : index
      %12 = vector.load %arg8[%c0_10, %c0_11] : memref<48x128xf32, #tpu.memory_space<vmem>>, vector<48x128xf32>
      %c0_12 = arith.constant 0 : index
      %c0_13 = arith.constant 0 : index
      %13 = vector.load %arg5[%c0_12, %c0_13] : memref<1x128xf32, #tpu.memory_space<vmem>>, vector<1x128xf32>
      %14 = vector.broadcast %13 : vector<1x128xf32> to vector<48x128xf32>
      %15 = arith.addf %12, %14 : vector<48x128xf32>
      %c0_14 = arith.constant 0 : index
      %c0_15 = arith.constant 0 : index
      %16 = vector.load %arg6[%c0_14, %c0_15] : memref<48x128xbf16, #tpu.memory_space<vmem>>, vector<48x128xbf16>
      %17 = arith.extf %16 : vector<48x128xbf16> to vector<48x128xf32>
      %18 = arith.addf %15, %17 : vector<48x128xf32>
      %19 = arith.truncf %18 : vector<48x128xf32> to vector<48x128xbf16>
      %c0_16 = arith.constant 0 : index
      %c0_17 = arith.constant 0 : index
      %20 = vector.load %arg7[%c0_16, %c0_17] : memref<48x128xbf16, #tpu.memory_space<vmem>>, vector<48x128xbf16>
      tpu.vector_store %arg7[%c0_16, %c0_17], %19 {strides = array<i32>} : memref<48x128xbf16, #tpu.memory_space<vmem>>, vector<48x128xbf16>,
    } else {
    }
    return
  }
  func.func @transform_0(%arg0: i32, %arg1: i32, %arg2: i32) -> (i32, i32) {
    %c0_i32 = arith.constant 0 : i32
    return %arg0, %arg2 : i32, i32
  }
  func.func @transform_1(%arg0: i32, %arg1: i32, %arg2: i32) -> (i32, i32) {
    %c0_i32 = arith.constant 0 : i32
    return %arg2, %arg1 : i32, i32
  }
  func.func @transform_2(%arg0: i32, %arg1: i32, %arg2: i32) -> (i32, i32) {
    %c0_i32 = arith.constant 0 : i32
    %c0_i32_0 = arith.constant 0 : i32
    return %c0_i32, %arg1 : i32, i32
  }
  func.func @transform_3(%arg0: i32, %arg1: i32, %arg2: i32) -> (i32, i32) {
    %c0_i32 = arith.constant 0 : i32
    return %arg0, %arg1 : i32, i32
  }
  func.func @transform_4(%arg0: i32, %arg1: i32, %arg2: i32) -> (i32, i32) {
    %c0_i32 = arith.constant 0 : i32
    return %arg0, %arg1 : i32, i32
  }
}

module attributes {stable_mosaic.version = 11 : i64} {
  func.func @_fused_matmul_kernel(%arg0: i32, %arg1: i32, %arg2: i32, %arg3: memref<48x128xbf16, #tpu.memory_space<vmem>>, %arg4: memref<128x512xbf16, #tpu.memory_space<vmem>>, %arg5: memref<1x128xf32, #tpu.memory_space<vmem>>, %arg6: memref<1x128xf32, #tpu.memory_space<vmem>>, %arg7: memref<1x512xf32, #tpu.memory_space<vmem>>, %arg8: memref<48x512xbf16, #tpu.memory_space<vmem>>, %arg9: memref<48x512xf32, #tpu.memory_space<vmem>>) attributes {dimension_semantics = [#tpu.dimension_semantics<parallel>, #tpu.dimension_semantics<parallel>, #tpu.dimension_semantics<arbitrary>], iteration_bounds = array<i64: 1, 1, 1>, scalar_prefetch = 0 : i64, scratch_operands = 1 : i64, tpu.core_type = #tpu.core_type<tc>, window_params = [{transform_indices = @transform_0, window_bounds = array<i64: 48, 128>}, {transform_indices = @transform_1, window_bounds = array<i64: 128, 512>}, {pipeline_mode = #tpu.pipeline_mode<synchronous>, transform_indices = @transform_2, window_bounds = array<i64: 1, 128>}, {pipeline_mode = #tpu.pipeline_mode<synchronous>, transform_indices = @transform_3, window_bounds = array<i64: 1, 128>}, {transform_indices = @transform_4, window_bounds = array<i64: 1, 512>}, {transform_indices = @transform_5, window_bounds = array<i64: 48, 512>}]} {
    %c0_i32 = arith.constant 0 : i32
    %0 = arith.cmpi eq, %arg2, %c0_i32 : i32
    %1 = arith.extui %0 : i1 to i32
    %c0_i32_0 = arith.constant 0 : i32
    %2 = arith.cmpi ne, %1, %c0_i32_0 : i32
    scf.if %2 {
      %cst_19 = arith.constant 0.000000e+00 : f32
      %36 = vector.broadcast %cst_19 : f32 to vector<48x512xf32>
      %c0_20 = arith.constant 0 : index
      %c0_21 = arith.constant 0 : index
      %37 = vector.load %arg9[%c0_20, %c0_21] : memref<48x512xf32, #tpu.memory_space<vmem>>, vector<48x512xf32>
      tpu.vector_store %arg9[%c0_20, %c0_21], %36 {strides = array<i32>} : memref<48x512xf32, #tpu.memory_space<vmem>>, vector<48x512xf32>,
    } else {
    }
    %c0 = arith.constant 0 : index
    %c0_1 = arith.constant 0 : index
    %3 = vector.load %arg3[%c0, %c0_1] : memref<48x128xbf16, #tpu.memory_space<vmem>>, vector<48x128xbf16>
    %4 = arith.extf %3 : vector<48x128xbf16> to vector<48x128xf32>
    %cst = arith.constant dense<0.000000e+00> : vector<48xf32>
    %5 = vector.multi_reduction <add>, %4, %cst [1] : vector<48x128xf32> to vector<48xf32>
    %6 = vector.shape_cast %5 : vector<48xf32> to vector<48x1xf32>
    %cst_2 = arith.constant 1.280000e+02 : f32
    %7 = vector.broadcast %cst_2 : f32 to vector<48x1xf32>
    %8 = arith.divf %6, %7 : vector<48x1xf32>
    %9 = vector.broadcast %8 : vector<48x1xf32> to vector<48x128xf32>
    %10 = arith.subf %4, %9 : vector<48x128xf32>
    %11 = arith.mulf %10, %10 : vector<48x128xf32>
    %cst_3 = arith.constant dense<0.000000e+00> : vector<48xf32>
    %12 = vector.multi_reduction <add>, %11, %cst_3 [1] : vector<48x128xf32> to vector<48xf32>
    %13 = vector.shape_cast %12 : vector<48xf32> to vector<48x1xf32>
    %cst_4 = arith.constant 1.280000e+02 : f32
    %14 = vector.broadcast %cst_4 : f32 to vector<48x1xf32>
    %15 = arith.divf %13, %14 : vector<48x1xf32>
    %cst_5 = arith.constant 9.99999974E-6 : f32
    %16 = vector.broadcast %cst_5 : f32 to vector<48x1xf32>
    %17 = arith.addf %15, %16 : vector<48x1xf32>
    %18 = math.rsqrt %17 : vector<48x1xf32>
    %19 = vector.broadcast %18 : vector<48x1xf32> to vector<48x128xf32>
    %20 = arith.mulf %10, %19 : vector<48x128xf32>
    %c0_6 = arith.constant 0 : index
    %c0_7 = arith.constant 0 : index
    %21 = vector.load %arg5[%c0_6, %c0_7] : memref<1x128xf32, #tpu.memory_space<vmem>>, vector<1x128xf32>
    %22 = vector.broadcast %21 : vector<1x128xf32> to vector<48x128xf32>
    %23 = arith.mulf %20, %22 : vector<48x128xf32>
    %c0_8 = arith.constant 0 : index
    %c0_9 = arith.constant 0 : index
    %24 = vector.load %arg6[%c0_8, %c0_9] : memref<1x128xf32, #tpu.memory_space<vmem>>, vector<1x128xf32>
    %25 = vector.broadcast %24 : vector<1x128xf32> to vector<48x128xf32>
    %26 = arith.addf %23, %25 : vector<48x128xf32>
    %27 = arith.truncf %26 : vector<48x128xf32> to vector<48x128xbf16>
    %c0_10 = arith.constant 0 : index
    %c0_11 = arith.constant 0 : index
    %28 = vector.load %arg9[%c0_10, %c0_11] : memref<48x512xf32, #tpu.memory_space<vmem>>, vector<48x512xf32>
    %c0_12 = arith.constant 0 : index
    %c0_13 = arith.constant 0 : index
    %29 = vector.load %arg4[%c0_12, %c0_13] : memref<128x512xbf16, #tpu.memory_space<vmem>>, vector<128x512xbf16>
    %cst_14 = arith.constant dense<0.000000e+00> : vector<48x512xf32>
    %30 = tpu.matmul %27, %29, %cst_14 {dimension_numbers = #tpu.dot_dimension_numbers<[1], [0], [0], [1], [0, 0, 1, 1], [], []>} : vector<48x128xbf16>, vector<128x512xbf16>, vector<48x512xf32> -> vector<48x512xf32>
    %31 = arith.addf %28, %30 : vector<48x512xf32>
    %c0_15 = arith.constant 0 : index
    %c0_16 = arith.constant 0 : index
    %32 = vector.load %arg9[%c0_15, %c0_16] : memref<48x512xf32, #tpu.memory_space<vmem>>, vector<48x512xf32>
    tpu.vector_store %arg9[%c0_15, %c0_16], %31 {strides = array<i32>} : memref<48x512xf32, #tpu.memory_space<vmem>>, vector<48x512xf32>,
    %c0_i32_17 = arith.constant 0 : i32
    %33 = arith.cmpi eq, %arg2, %c0_i32_17 : i32
    %34 = arith.extui %33 : i1 to i32
    %c0_i32_18 = arith.constant 0 : i32
    %35 = arith.cmpi ne, %34, %c0_i32_18 : i32
    scf.if %35 {
      %c0_19 = arith.constant 0 : index
      %c0_20 = arith.constant 0 : index
      %36 = vector.load %arg9[%c0_19, %c0_20] : memref<48x512xf32, #tpu.memory_space<vmem>>, vector<48x512xf32>
      %c0_21 = arith.constant 0 : index
      %c0_22 = arith.constant 0 : index
      %37 = vector.load %arg7[%c0_21, %c0_22] : memref<1x512xf32, #tpu.memory_space<vmem>>, vector<1x512xf32>
      %38 = vector.broadcast %37 : vector<1x512xf32> to vector<48x512xf32>
      %39 = arith.addf %36, %38 : vector<48x512xf32>
      %cst_23 = arith.constant 1.702000e+00 : f32
      %40 = vector.broadcast %cst_23 : f32 to vector<48x512xf32>
      %41 = arith.mulf %40, %39 : vector<48x512xf32>
      %42 = arith.negf %41 : vector<48x512xf32>
      %43 = math.exp %42 : vector<48x512xf32>
      %cst_24 = arith.constant 1.000000e+00 : f32
      %44 = vector.broadcast %cst_24 : f32 to vector<48x512xf32>
      %45 = arith.addf %44, %43 : vector<48x512xf32>
      %46 = arith.divf %44, %45 : vector<48x512xf32>
      %47 = arith.mulf %39, %46 : vector<48x512xf32>
      %48 = arith.truncf %47 : vector<48x512xf32> to vector<48x512xbf16>
      %c0_25 = arith.constant 0 : index
      %c0_26 = arith.constant 0 : index
      %49 = vector.load %arg8[%c0_25, %c0_26] : memref<48x512xbf16, #tpu.memory_space<vmem>>, vector<48x512xbf16>
      tpu.vector_store %arg8[%c0_25, %c0_26], %48 {strides = array<i32>} : memref<48x512xbf16, #tpu.memory_space<vmem>>, vector<48x512xbf16>,
    } else {
    }
    return
  }
  func.func @transform_0(%arg0: i32, %arg1: i32, %arg2: i32) -> (i32, i32) {
    %c0_i32 = arith.constant 0 : i32
    return %arg0, %arg2 : i32, i32
  }
  func.func @transform_1(%arg0: i32, %arg1: i32, %arg2: i32) -> (i32, i32) {
    %c0_i32 = arith.constant 0 : i32
    return %arg2, %arg1 : i32, i32
  }
  func.func @transform_2(%arg0: i32, %arg1: i32, %arg2: i32) -> (i32, i32) {
    %c0_i32 = arith.constant 0 : i32
    %c0_i32_0 = arith.constant 0 : i32
    %c0_i32_1 = arith.constant 0 : i32
    return %c0_i32, %c0_i32_0 : i32, i32
  }
  func.func @transform_3(%arg0: i32, %arg1: i32, %arg2: i32) -> (i32, i32) {
    %c0_i32 = arith.constant 0 : i32
    %c0_i32_0 = arith.constant 0 : i32
    %c0_i32_1 = arith.constant 0 : i32
    return %c0_i32, %c0_i32_0 : i32, i32
  }
  func.func @transform_4(%arg0: i32, %arg1: i32, %arg2: i32) -> (i32, i32) {
    %c0_i32 = arith.constant 0 : i32
    %c0_i32_0 = arith.constant 0 : i32
    return %c0_i32, %arg1 : i32, i32
  }
  func.func @transform_5(%arg0: i32, %arg1: i32, %arg2: i32) -> (i32, i32) {
    %c0_i32 = arith.constant 0 : i32
    return %arg0, %arg1 : i32, i32
  }
}

module attributes {stable_mosaic.version = 11 : i64} {
  func.func @_fused_matmul_kernel(%arg0: i32, %arg1: i32, %arg2: i32, %arg3: memref<2x128xbf16, #tpu.memory_space<vmem>>, %arg4: memref<128x64xbf16, #tpu.memory_space<vmem>>, %arg5: memref<2x64xf32, #tpu.memory_space<vmem>>, %arg6: memref<2x64xf32, #tpu.memory_space<vmem>>) attributes {dimension_semantics = [#tpu.dimension_semantics<parallel>, #tpu.dimension_semantics<parallel>, #tpu.dimension_semantics<arbitrary>], iteration_bounds = array<i64: 1, 1, 1>, scalar_prefetch = 0 : i64, scratch_operands = 1 : i64, tpu.core_type = #tpu.core_type<tc>, window_params = [{transform_indices = @transform_0, window_bounds = array<i64: 2, 128>}, {transform_indices = @transform_1, window_bounds = array<i64: 128, 64>}, {transform_indices = @transform_2, window_bounds = array<i64: 2, 64>}]} {
    %c0_i32 = arith.constant 0 : i32
    %0 = arith.cmpi eq, %arg2, %c0_i32 : i32
    %1 = arith.extui %0 : i1 to i32
    %c0_i32_0 = arith.constant 0 : i32
    %2 = arith.cmpi ne, %1, %c0_i32_0 : i32
    scf.if %2 {
      %cst_10 = arith.constant 0.000000e+00 : f32
      %12 = vector.broadcast %cst_10 : f32 to vector<2x64xf32>
      %c0_11 = arith.constant 0 : index
      %c0_12 = arith.constant 0 : index
      %13 = vector.load %arg6[%c0_11, %c0_12] : memref<2x64xf32, #tpu.memory_space<vmem>>, vector<2x64xf32>
      tpu.vector_store %arg6[%c0_11, %c0_12], %12 {strides = array<i32>} : memref<2x64xf32, #tpu.memory_space<vmem>>, vector<2x64xf32>,
    } else {
    }
    %c0 = arith.constant 0 : index
    %c0_1 = arith.constant 0 : index
    %3 = vector.load %arg3[%c0, %c0_1] : memref<2x128xbf16, #tpu.memory_space<vmem>>, vector<2x128xbf16>
    %c0_2 = arith.constant 0 : index
    %c0_3 = arith.constant 0 : index
    %4 = vector.load %arg6[%c0_2, %c0_3] : memref<2x64xf32, #tpu.memory_space<vmem>>, vector<2x64xf32>
    %c0_4 = arith.constant 0 : index
    %c0_5 = arith.constant 0 : index
    %5 = vector.load %arg4[%c0_4, %c0_5] : memref<128x64xbf16, #tpu.memory_space<vmem>>, vector<128x64xbf16>
    %cst = arith.constant dense<0.000000e+00> : vector<2x64xf32>
    %6 = tpu.matmul %3, %5, %cst {dimension_numbers = #tpu.dot_dimension_numbers<[1], [0], [0], [1], [0, 0, 1, 1], [], []>} : vector<2x128xbf16>, vector<128x64xbf16>, vector<2x64xf32> -> vector<2x64xf32>
    %7 = arith.addf %4, %6 : vector<2x64xf32>
    %c0_6 = arith.constant 0 : index
    %c0_7 = arith.constant 0 : index
    %8 = vector.load %arg6[%c0_6, %c0_7] : memref<2x64xf32, #tpu.memory_space<vmem>>, vector<2x64xf32>
    tpu.vector_store %arg6[%c0_6, %c0_7], %7 {strides = array<i32>} : memref<2x64xf32, #tpu.memory_space<vmem>>, vector<2x64xf32>,
    %c0_i32_8 = arith.constant 0 : i32
    %9 = arith.cmpi eq, %arg2, %c0_i32_8 : i32
    %10 = arith.extui %9 : i1 to i32
    %c0_i32_9 = arith.constant 0 : i32
    %11 = arith.cmpi ne, %10, %c0_i32_9 : i32
    scf.if %11 {
      %c0_10 = arith.constant 0 : index
      %c0_11 = arith.constant 0 : index
      %12 = vector.load %arg6[%c0_10, %c0_11] : memref<2x64xf32, #tpu.memory_space<vmem>>, vector<2x64xf32>
      %c0_12 = arith.constant 0 : index
      %c0_13 = arith.constant 0 : index
      %13 = vector.load %arg5[%c0_12, %c0_13] : memref<2x64xf32, #tpu.memory_space<vmem>>, vector<2x64xf32>
      tpu.vector_store %arg5[%c0_12, %c0_13], %12 {strides = array<i32>} : memref<2x64xf32, #tpu.memory_space<vmem>>, vector<2x64xf32>,
    } else {
    }
    return
  }
  func.func @transform_0(%arg0: i32, %arg1: i32, %arg2: i32) -> (i32, i32) {
    %c0_i32 = arith.constant 0 : i32
    return %arg0, %arg2 : i32, i32
  }
  func.func @transform_1(%arg0: i32, %arg1: i32, %arg2: i32) -> (i32, i32) {
    %c0_i32 = arith.constant 0 : i32
    return %arg2, %arg1 : i32, i32
  }
  func.func @transform_2(%arg0: i32, %arg1: i32, %arg2: i32) -> (i32, i32) {
    %c0_i32 = arith.constant 0 : i32
    return %arg0, %arg1 : i32, i32
  }
}

</mosaic_0001>

<bundles_post_ra>
// kernel: frozen_clip_image_embedder.15
= control target key start
LH: loop header
LB: loop body
LE: loop exit
PB: predicated region body
PF: predicated region fallthrough
CT: control target
= control target key end

     0   :  { %s254_s0 = inlined_call_operand.vmem [shape: bf16[48,128], index: 0, kind: input, shape index: {}]   ;;  %s255_s1 = inlined_call_operand.vmem [shape: f32[1,128], index: 1, kind: input, shape index: {}]   ;;  %s256_s2 = inlined_call_operand.vmem [shape: f32[1,128], index: 2, kind: input, shape index: {}]   ;;  %s257_s3 = inlined_call_operand.vmem [shape: bf16[48,128], index: 3, kind: output, shape index: {}]  }
   0x1   :  { %v168_v0 = vld [vmem:[%s254_s0] sm:$0xff]   ;;  %v194_v1 = vld [vmem:[%s254_s0 + $0x8] sm:$0xff]   ;;  %v195_v6 = vld [vmem:[%s254_s0 + $0x10] sm:$0xff]  }
   0x2   :  { %v169_v2 = vunpack.c.l.bf16 %v168_v0  ;;  %v173_v3 = vunpack.c.l.bf16 %v194_v1  ;;  %v170_v4 = vunpack.c.h.bf16 %v168_v0  ;;  %v174_v5 = vunpack.c.h.bf16 %v194_v1  ;;  %v153_v53 = vld [vmem:[%s255_s1] ss:$0 sm:$0xff] }
   0x3   :  { %v177_v7 = vunpack.c.l.bf16 %v195_v6  ;;  %v178_v8 = vunpack.c.h.bf16 %v195_v6  ;;  %v154_v58 = vld [vmem:[%s256_s2] ss:$0 sm:$0xff] }
   0x4   :  { %26 = vadd.xlane.f32.xlu0 %v169_v2  ;;  %30 = vadd.xlane.f32.xlu1 %v173_v3 }
   0x8   :  { %28 = vadd.xlane.f32.xlu0 %v170_v4  ;;  %32 = vadd.xlane.f32.xlu1 %v174_v5 }
   0xc   :  { %34 = vadd.xlane.f32.xlu0 %v177_v7  ;;  %36 = vadd.xlane.f32.xlu1 %v178_v8 }
  0x8d   :  { %v27_v9 = vpop.xlane.xlu0 %26  ;;  %v31_v10 = vpop.xlane.xlu1 %30 }
  0x8e   :  { %v39_v11 = vmul.f32 0.0078125, %v27_v9  ;;  %v41_v12 = vmul.f32 0.0078125, %v31_v10 }
  0x90   :  { %v45_v13 = vsub.f32 %v169_v2, %v39_v11  ;;  %v47_v14 = vsub.f32 %v173_v3, %v41_v12 }
  0x91   :  { %v29_v15 = vpop.xlane.xlu0 %28  ;;  %v33_v16 = vpop.xlane.xlu1 %32 }
  0x92   :  { %v40_v17 = vmul.f32 0.0078125, %v29_v15  ;;  %v51_v18 = vmul.f32 %v45_v13, %v45_v13  ;;  %v42_v19 = vmul.f32 0.0078125, %v33_v16  ;;  %v53_v22 = vmul.f32 %v47_v14, %v47_v14 }
  0x94   :  { %v46_v20 = vsub.f32 %v170_v4, %v40_v17  ;;  %57 = vadd.xlane.f32.xlu0 %v51_v18  ;;  %v48_v21 = vsub.f32 %v174_v5, %v42_v19 }
  0x95   :  { %v35_v23 = vpop.xlane.xlu0 %34  ;;  %v37_v24 = vpop.xlane.xlu1 %36 }
  0x96   :  { %v43_v25 = vmul.f32 0.0078125, %v35_v23  ;;  %v52_v26 = vmul.f32 %v46_v20, %v46_v20  ;;  %v44_v27 = vmul.f32 0.0078125, %v37_v24  ;;  %v54_v30 = vmul.f32 %v48_v21, %v48_v21 }
  0x98   :  { %v49_v28 = vsub.f32 %v177_v7, %v43_v25  ;;  %61 = vadd.xlane.f32.xlu0 %v53_v22  ;;  %59 = vadd.xlane.f32.xlu1 %v52_v26  ;;  %v50_v29 = vsub.f32 %v178_v8, %v44_v27 }
  0x9a   :  { %v55_v31 = vmul.f32 %v49_v28, %v49_v28  ;;  %v56_v32 = vmul.f32 %v50_v29, %v50_v29 }
  0x9c   :  { %63 = vadd.xlane.f32.xlu1 %v54_v30  ;;  %65 = vadd.xlane.f32.xlu0 %v55_v31 }
  0xa0   :  { %67 = vadd.xlane.f32.xlu1 %v56_v32 }
 0x11d   :  { %v58_v33 = vpop.xlane.xlu0 %57 }
 0x11e   :  { %v69_v34 = vmul.f32 0.0078125, %v58_v33 }
 0x120   :  { %v75_v35 = vadd.f32 1e-05, %v69_v34 }
 0x121   :  { %v60_v36 = vpop.xlane.xlu1 %59  ;;  %v62_v37 = vpop.xlane.xlu0 %61 }
 0x122   :  { %198 = vrsqrt.f32 %v75_v35  ;;  %v70_v38 = vmul.f32 0.0078125, %v60_v36  ;;  %v71_v39 = vmul.f32 0.0078125, %v62_v37 }
 0x124   :  { %v76_v40 = vadd.f32 1e-05, %v70_v38  ;;  %v77_v41 = vadd.f32 1e-05, %v71_v39 }
 0x125   :  { %v64_v42 = vpop.xlane.xlu1 %63  ;;  %v66_v43 = vpop.xlane.xlu0 %65 }
 0x126   :  { %200 = vrsqrt.f32 %v76_v40  ;;  %v72_v44 = vmul.f32 0.0078125, %v64_v42  ;;  %v73_v45 = vmul.f32 0.0078125, %v66_v43 }
 0x127   :  { %202 = vrsqrt.f32 %v77_v41 }
 0x128   :  { %v78_v46 = vadd.f32 1e-05, %v72_v44  ;;  %v79_v47 = vadd.f32 1e-05, %v73_v45 }
 0x129   :  { %v68_v48 = vpop.xlane.xlu1 %67 }
 0x12a   :  { %204 = vrsqrt.f32 %v78_v46  ;;  %v74_v49 = vmul.f32 0.0078125, %v68_v48 }
 0x12b   :  { %206 = vrsqrt.f32 %v79_v47 }
 0x12c   :  { %v80_v50 = vadd.f32 1e-05, %v74_v49 }
 0x12e   :  { %208 = vrsqrt.f32 %v80_v50 }
 0x12f   :  { %v199_v51 = vpop.eup %198 }
 0x130   :  { %v87_v52 = vmul.f32 %v199_v51, %v45_v13 }
 0x132   :  { %v100_v56 = vmul.f32 %v153_v53, %v87_v52 }
 0x133   :  { %v201_v54 = vpop.eup %200 }
 0x134   :  { %v203_v55 = vpop.eup %202  ;;  %v88_v57 = vmul.f32 %v201_v54, %v46_v20  ;;  %v113_v63 = vadd.f32 %v154_v58, %v100_v56 }
 0x135   :  { %v89_v59 = vmul.f32 %v203_v55, %v47_v14 }
 0x136   :  { %v101_v60 = vmul.f32 %v153_v53, %v88_v57 }
 0x137   :  { %v205_v61 = vpop.eup %204  ;;  %v102_v1 = vmul.f32 %v153_v53, %v89_v59 }
 0x138   :  { %v207_v62 = vpop.eup %206  ;;  %v114_v0 = vadd.f32 %v154_v58, %v101_v60  ;;  %v90_v2 = vmul.f32 %v205_v61, %v48_v21 }
 0x139   :  { %v91_v3 = vmul.f32 %v207_v62, %v49_v28  ;;  %v115_v7 = vadd.f32 %v154_v58, %v102_v1 }
 0x13a   :  { %v182_v4 = vpack.c.bf16 %v114_v0, %v113_v63  ;;  %v103_v5 = vmul.f32 %v153_v53, %v90_v2 }
 0x13b   :  { %v209_v6 = vpop.eup %208  ;;  %v104_v9 = vmul.f32 %v153_v53, %v91_v3 }
 0x13c   :  { %183 = vst [vmem:[%s257_s3] sm:$0xff] %v182_v4   ;;  %v116_v8 = vadd.f32 %v154_v58, %v103_v5  ;;  %v92_v10 = vmul.f32 %v209_v6, %v50_v29 }
 0x13d   :  { %v117_v13 = vadd.f32 %v154_v58, %v104_v9 }
 0x13e   :  { %v187_v11 = vpack.c.bf16 %v116_v8, %v115_v7  ;;  %v105_v12 = vmul.f32 %v153_v53, %v92_v10 }
 0x140   :  { %196 = vst [vmem:[%s257_s3 + $0x8] sm:$0xff] %v187_v11   ;;  %v118_v14 = vadd.f32 %v154_v58, %v105_v12 }
 0x142   :  { %v192_v15 = vpack.c.bf16 %v118_v14, %v117_v13 }
 0x144   :  { %197 = vst [vmem:[%s257_s3 + $0x10] sm:$0xff] %v192_v15  }

// kernel: frozen_clip_image_embedder.14
= control target key start
LH: loop header
LB: loop body
LE: loop exit
PB: predicated region body
PF: predicated region fallthrough
CT: control target
= control target key end

     0   :  { %v356_v0 = vmov 0   ;;  %vm148_vm0 = vcmask 523264   ;;  %s469_s1 = inlined_call_operand.vmem [shape: bf16[192,128], index: 1, kind: input, shape index: {}]   ;;  %s470_s0 = inlined_call_operand.vmem [shape: bf16[32,192], index: 0, kind: input, shape index: {}]   ;;  %s471_s3 = inlined_call_operand.vmem [shape: bf16[32,128], index: 3, kind: input, shape index: {}]   ;;  %s472_s2 = inlined_call_operand.vmem [shape: f32[1,128], index: 2, kind: input, shape index: {}]   ;;  %s473_s4 = inlined_call_operand.vmem [shape: bf16[32,128], index: 4, kind: output, shape index: {}]  }
   0x1   :  { %155 = vmatprep.subr.bf16.mxu0 %v356_v0  ;;  %313 = vmatprep.subr.bf16.mxu1 %v356_v0  ;;  %v338_v1 = vld [vmem:[%s469_s1 + $0x38] sm:$0xff]   ;;  %v339_v2 = vld [vmem:[%s469_s1 + $0x30] sm:$0xff]   ;;  %v340_v3 = vld [vmem:[%s469_s1 + $0x28] sm:$0xff]  }
   0x2   :  { %156 = vmatpush1.bf16.msra.mxu0 %v338_v1  ;;  %325 = vmatpush1.bf16.msra.mxu1 %v338_v1  ;;  %v341_v4 = vld [vmem:[%s469_s1 + $0x20] sm:$0xff]   ;;  %v342_v6 = vld [vmem:[%s469_s1 + $0x18] sm:$0xff]   ;;  %v343_v8 = vld [vmem:[%s469_s1 + $0x10] sm:$0xff]  }
   0x3   :  { %157 = vmatprep.subr.bf16.mxu0 %v356_v0  ;;  %314 = vmatprep.subr.bf16.mxu1 %v356_v0  ;;  %v352_v5 = vld [vmem:[%s470_s0 + $0x4] ss:$8 sps:$4 sm:$0xff]   ;;  %v355_v7 = vld [vmem:[%s470_s0 + $0x14] ss:$8 sps:$4 sm:$0xff]   ;;  %v350_v15 = vld [vmem:[%s470_s0] ss:$8 sps:$4 sm:$0xff]  }
   0x4   :  { %282 = vmatprep.mubr.msk.bf16.mxu0 %vm148_vm0, %v352_v5  ;;  %283 = vmatprep.mubr.msk.bf16.mxu1 %vm148_vm0, %v355_v7  ;;  %v344_v9 = vld [vmem:[%s469_s1 + $0x8] sm:$0xff]   ;;  %v345_v10 = vld [vmem:[%s469_s1] sm:$0xff]   ;;  %v346_v11 = vld [vmem:[%s469_s1 + $0x58] sm:$0xff]  }
   0x5   :  { %v347_v12 = vld [vmem:[%s469_s1 + $0x50] sm:$0xff]   ;;  %v348_v13 = vld [vmem:[%s469_s1 + $0x48] sm:$0xff]   ;;  %v349_v14 = vld [vmem:[%s469_s1 + $0x40] sm:$0xff]  }
   0x6   :  { %158 = vmatpush1.bf16.msra.mxu0 %v339_v2  ;;  %326 = vmatpush1.bf16.msra.mxu1 %v339_v2  ;;  %v353_v16 = vld [vmem:[%s470_s0 + $0x10] ss:$8 sps:$4 sm:$0xff]   ;;  %v294_v17 = vld [vmem:[%s471_s3] sm:$0xff]   ;;  %v311_v18 = vld [vmem:[%s471_s3 + $0x8] sm:$0xff]  }
   0x7   :  { %159 = vmatprep.subr.bf16.mxu0 %v356_v0  ;;  %315 = vmatprep.subr.bf16.mxu1 %v356_v0  ;;  %v284_v20 = vld [vmem:[%s472_s2] ss:$0 sm:$0xff]  ;;  %v295_v22 = vunpack.c.l.bf16 %v294_v17  ;;  %v299_v23 = vunpack.c.l.bf16 %v311_v18  ;;  %v296_v28 = vunpack.c.h.bf16 %v294_v17  ;;  %v300_v29 = vunpack.c.h.bf16 %v311_v18 }
   0xa   :  { %160 = vmatpush1.bf16.msra.mxu0 %v340_v3  ;;  %327 = vmatpush1.bf16.msra.mxu1 %v340_v3 }
   0xb   :  { %161 = vmatprep.subr.bf16.mxu0 %v356_v0  ;;  %316 = vmatprep.subr.bf16.mxu1 %v356_v0 }
   0xe   :  { %162 = vmatpush1.bf16.msra.mxu0 %v341_v4  ;;  %328 = vmatpush1.bf16.msra.mxu1 %v341_v4 }
   0xf   :  { %163 = vmatprep.subr.bf16.mxu0 %v356_v0  ;;  %317 = vmatprep.subr.bf16.mxu1 %v356_v0 }
  0x12   :  { %164 = vmatpush1.bf16.msra.mxu0 %v342_v6  ;;  %329 = vmatpush1.bf16.msra.mxu1 %v342_v6 }
  0x13   :  { %165 = vmatprep.subr.bf16.mxu0 %v356_v0  ;;  %318 = vmatprep.subr.bf16.mxu1 %v356_v0 }
  0x16   :  { %166 = vmatpush1.bf16.msra.mxu0 %v343_v8  ;;  %330 = vmatpush1.bf16.msra.mxu1 %v343_v8 }
  0x17   :  { %167 = vmatprep.subr.bf16.mxu0 %v356_v0  ;;  %319 = vmatprep.subr.bf16.mxu1 %v356_v0 }
  0x1a   :  { %168 = vmatpush1.bf16.msra.mxu0 %v344_v9  ;;  %331 = vmatpush1.bf16.msra.mxu1 %v344_v9 }
  0x1b   :  { %169 = vmatprep.subr.bf16.mxu0 %v356_v0  ;;  %320 = vmatprep.subr.bf16.mxu1 %v356_v0 }
  0x1e   :  { %170 = vmatpush1.bf16.msra.mxu0 %v345_v10  ;;  %332 = vmatpush1.bf16.msra.mxu1 %v345_v10 }
  0x1f   :  { %179 = vmatprep.subr.bf16.mxu0 %v356_v0  ;;  %321 = vmatprep.subr.bf16.mxu1 %v356_v0 }
  0x22   :  { %180 = vmatpush2.bf16.msra.mxu0 %v346_v11  ;;  %333 = vmatpush2.bf16.msra.mxu1 %v346_v11 }
  0x23   :  { %181 = vmatprep.subr.bf16.mxu0 %v356_v0  ;;  %322 = vmatprep.subr.bf16.mxu1 %v356_v0 }
  0x26   :  { %182 = vmatpush2.bf16.msra.mxu0 %v347_v12  ;;  %334 = vmatpush2.bf16.msra.mxu1 %v347_v12 }
  0x27   :  { %183 = vmatprep.subr.bf16.mxu0 %v356_v0  ;;  %323 = vmatprep.subr.bf16.mxu1 %v356_v0 }
  0x2a   :  { %184 = vmatpush2.bf16.msra.mxu0 %v348_v13  ;;  %335 = vmatpush2.bf16.msra.mxu1 %v348_v13 }
  0x2b   :  { %185 = vmatprep.subr.bf16.mxu0 %v356_v0  ;;  %324 = vmatprep.subr.bf16.mxu1 %v356_v0 }
  0x2e   :  { %186 = vmatpush2.bf16.msra.mxu0 %v349_v14  ;;  %336 = vmatpush2.bf16.msra.mxu1 %v349_v14 }
  0x31   :  { %188 = vmatmul.mubr.bf16.vlgmr.msra.gmra.mxu0 %v350_v15  ;;  %196 = vmatmul.mubr.bf16.vlgmr.msra.gmra.mxu1 %v353_v16 }
  0xf1   :  { %v189_v19 = vpop.f32.mrf.mxu0  ;;  %v197_v21 = vpop.f32.mrf.mxu1 }
  0xf2   :  { %v226_v26 = vadd.f32 %v284_v20, %v189_v19  ;;  %v228_v27 = vadd.f32 %v284_v20, %v197_v21 }
  0xf3   :  { %v191_v24 = vpop.f32.mrf.mxu0  ;;  %v199_v25 = vpop.f32.mrf.mxu1 }
  0xf4   :  { %v238_v36 = vadd.f32 %v295_v22, %v226_v26  ;;  %v240_v37 = vadd.f32 %v299_v23, %v228_v27 }
  0xf5   :  { %v192_v30 = vpop.f32.mrf.mxu0  ;;  %v200_v31 = vpop.f32.mrf.mxu1 }
  0xf6   :  { %v227_v32 = vadd.f32 %v284_v20, %v192_v30  ;;  %v229_v33 = vadd.f32 %v284_v20, %v200_v31 }
  0xf7   :  { %v194_v34 = vpop.f32.mrf.mxu0  ;;  %v202_v35 = vpop.f32.mrf.mxu1 }
  0xf8   :  { %v239_v38 = vadd.f32 %v296_v28, %v227_v32  ;;  %v241_v39 = vadd.f32 %v300_v29, %v229_v33 }
  0xfa   :  { %v304_v40 = vpack.c.bf16 %v239_v38, %v238_v36  ;;  %v309_v41 = vpack.c.bf16 %v241_v39, %v240_v37 }
  0xfc   :  { %305 = vst [vmem:[%s473_s4] sm:$0xff] %v304_v40   ;;  %312 = vst [vmem:[%s473_s4 + $0x8] sm:$0xff] %v309_v41  }

// kernel: frozen_clip_image_embedder.16
= control target key start
LH: loop header
LB: loop body
LE: loop exit
PB: predicated region body
PF: predicated region fallthrough
CT: control target
= control target key end

     0   :  { %v767_v10 = vmov 0.0   ;;  %v768_v56 = vmov 0   ;;  %vm769_vm0 = vmmov 0   ;;  %s989_s0 = inlined_call_operand.vmem [shape: bf16[48,128], index: 0, kind: input, shape index: {}]   ;;  %s990_s1 = inlined_call_operand.vmem [shape: bf16[128,384], index: 1, kind: input, shape index: {}]   ;;  %s991_s2 = inlined_call_operand.vmem [shape: f32[1,128], index: 2, kind: input, shape index: {}]   ;;  %s992_s3 = inlined_call_operand.vmem [shape: f32[1,128], index: 3, kind: input, shape index: {}]   ;;  %s993_s4 = inlined_call_operand.vmem [shape: f32[1,384], index: 4, kind: input, shape index: {}]   ;;  %s994_s5 = inlined_call_operand.vmem [shape: bf16[48,384], index: 5, kind: output, shape index: {}]  }
   0x1   :  { %v668_v0 = vld [vmem:[%s989_s0] sm:$0xff]   ;;  %v679_v1 = vld [vmem:[%s989_s0 + $0x8] sm:$0xff]   ;;  %v680_v6 = vld [vmem:[%s989_s0 + $0x10] sm:$0xff]   ;;  %692 = vmatprep.subr.bf16.mxu1 %v767_v10  ;;  %361 = vmatprep.mubr.bf16.mxu0 %v768_v56 }
   0x2   :  { %v669_v2 = vunpack.c.l.bf16 %v668_v0  ;;  %v673_v3 = vunpack.c.l.bf16 %v679_v1  ;;  %v670_v4 = vunpack.c.h.bf16 %v668_v0  ;;  %v674_v5 = vunpack.c.h.bf16 %v679_v1  ;;  %v723_v9 = vld [vmem:[%s990_s1 + $0xac] ss:$12 sps:$4 sm:$0xff]   ;;  %v725_v11 = vld [vmem:[%s990_s1 + $0xa8] ss:$12 sps:$4 sm:$0xff]   ;;  %v726_v12 = vld [vmem:[%s990_s1 + $0xb0] ss:$12 sps:$4 sm:$0xff]   ;;  %708 = vmatprep.mubr.msk.bf16.mxu1 %vm769_vm0, %v767_v10 }
   0x3   :  { %v677_v7 = vunpack.c.l.bf16 %v680_v6  ;;  %v678_v8 = vunpack.c.h.bf16 %v680_v6  ;;  %329 = vmatprep.subr.bf16.mxu0 %v723_v9  ;;  %693 = vmatpush3.bf16.msra.mxu1 %v726_v12  ;;  %v727_v37 = vld [vmem:[%s990_s1 + $0x94] ss:$12 sps:$4 sm:$0xff]   ;;  %v729_v38 = vld [vmem:[%s990_s1 + $0x90] ss:$12 sps:$4 sm:$0xff]   ;;  %v730_v39 = vld [vmem:[%s990_s1 + $0x98] ss:$12 sps:$4 sm:$0xff]  }
   0x4   :  { %55 = vadd.xlane.f32.xlu0 %v669_v2  ;;  %59 = vadd.xlane.f32.xlu1 %v673_v3  ;;  %v731_v40 = vld [vmem:[%s990_s1 + $0x7c] ss:$12 sps:$4 sm:$0xff]   ;;  %v733_v41 = vld [vmem:[%s990_s1 + $0x78] ss:$12 sps:$4 sm:$0xff]   ;;  %v734_v42 = vld [vmem:[%s990_s1 + $0x80] ss:$12 sps:$4 sm:$0xff]  }
   0x5   :  { %330 = vmatpush1.bf16.msra.mxu0 %v725_v11  ;;  %694 = vmatprep.subr.bf16.mxu1 %v767_v10  ;;  %v735_v43 = vld [vmem:[%s990_s1 + $0x64] ss:$12 sps:$4 sm:$0xff]   ;;  %v737_v44 = vld [vmem:[%s990_s1 + $0x60] ss:$12 sps:$4 sm:$0xff]   ;;  %v738_v45 = vld [vmem:[%s990_s1 + $0x68] ss:$12 sps:$4 sm:$0xff]  }
   0x6   :  { %331 = vmatprep.subr.bf16.mxu0 %v727_v37  ;;  %v739_v46 = vld [vmem:[%s990_s1 + $0x4c] ss:$12 sps:$4 sm:$0xff]   ;;  %v741_v47 = vld [vmem:[%s990_s1 + $0x48] ss:$12 sps:$4 sm:$0xff]   ;;  %v742_v48 = vld [vmem:[%s990_s1 + $0x50] ss:$12 sps:$4 sm:$0xff]  }
   0x7   :  { %695 = vmatpush3.bf16.msra.mxu1 %v730_v39  ;;  %v743_v49 = vld [vmem:[%s990_s1 + $0x34] ss:$12 sps:$4 sm:$0xff]   ;;  %v745_v50 = vld [vmem:[%s990_s1 + $0x30] ss:$12 sps:$4 sm:$0xff]   ;;  %v746_v51 = vld [vmem:[%s990_s1 + $0x38] ss:$12 sps:$4 sm:$0xff]  }
   0x8   :  { %57 = vadd.xlane.f32.xlu0 %v670_v4  ;;  %61 = vadd.xlane.f32.xlu1 %v674_v5  ;;  %v747_v52 = vld [vmem:[%s990_s1 + $0x1c] ss:$12 sps:$4 sm:$0xff]   ;;  %v749_v53 = vld [vmem:[%s990_s1 + $0x18] ss:$12 sps:$4 sm:$0xff]   ;;  %v750_v54 = vld [vmem:[%s990_s1 + $0x20] ss:$12 sps:$4 sm:$0xff]  }
   0x9   :  { %332 = vmatpush1.bf16.msra.mxu0 %v729_v38  ;;  %696 = vmatprep.subr.bf16.mxu1 %v767_v10  ;;  %v751_v55 = vld [vmem:[%s990_s1 + $0x4] ss:$12 sps:$4 sm:$0xff]   ;;  %v753_v57 = vld [vmem:[%s990_s1] ss:$12 sps:$4 sm:$0xff]   ;;  %v754_v58 = vld [vmem:[%s990_s1 + $0x8] ss:$12 sps:$4 sm:$0xff]  }
   0xa   :  { %333 = vmatprep.subr.bf16.mxu0 %v731_v40 }
   0xb   :  { %697 = vmatpush3.bf16.msra.mxu1 %v734_v42 }
   0xc   :  { %63 = vadd.xlane.f32.xlu0 %v677_v7  ;;  %65 = vadd.xlane.f32.xlu1 %v678_v8 }
   0xd   :  { %334 = vmatpush1.bf16.msra.mxu0 %v733_v41  ;;  %698 = vmatprep.subr.bf16.mxu1 %v767_v10 }
   0xe   :  { %335 = vmatprep.subr.bf16.mxu0 %v735_v43 }
   0xf   :  { %699 = vmatpush3.bf16.msra.mxu1 %v738_v45  ;;  %v508_v45 = vlaneseq }
  0x10   :  { %700 = vmatprep.subr.bf16.mxu1 %v767_v10 }
  0x11   :  { %336 = vmatpush1.bf16.msra.mxu0 %v737_v44 }
  0x12   :  { %337 = vmatprep.subr.bf16.mxu0 %v739_v46 }
  0x13   :  { %701 = vmatpush3.bf16.msra.mxu1 %v742_v48 }
  0x14   :  { %702 = vmatprep.subr.bf16.mxu1 %v767_v10 }
  0x15   :  { %338 = vmatpush1.bf16.msra.mxu0 %v741_v47 }
  0x16   :  { %339 = vmatprep.subr.bf16.mxu0 %v743_v49 }
  0x17   :  { %703 = vmatpush3.bf16.msra.mxu1 %v746_v51 }
  0x18   :  { %704 = vmatprep.subr.bf16.mxu1 %v767_v10 }
  0x19   :  { %340 = vmatpush1.bf16.msra.mxu0 %v745_v50 }
  0x1a   :  { %341 = vmatprep.subr.bf16.mxu0 %v747_v52 }
  0x1b   :  { %705 = vmatpush3.bf16.msra.mxu1 %v750_v54 }
  0x1c   :  { %706 = vmatprep.subr.bf16.mxu1 %v767_v10 }
  0x1d   :  { %342 = vmatpush1.bf16.msra.mxu0 %v749_v53 }
  0x1e   :  { %343 = vmatprep.subr.bf16.mxu0 %v751_v55 }
  0x1f   :  { %707 = vmatpush3.bf16.msra.mxu1 %v754_v58 }
  0x21   :  { %344 = vmatpush1.bf16.msra.mxu0 %v753_v57 }
  0x8d   :  { %v56_v13 = vpop.xlane.xlu0 %55  ;;  %v60_v14 = vpop.xlane.xlu1 %59 }
  0x8e   :  { %v68_v15 = vmul.f32 0.0078125, %v56_v13  ;;  %v70_v16 = vmul.f32 0.0078125, %v60_v14 }
  0x90   :  { %v820_v17 = vsub.f32 %v669_v2, %v68_v15  ;;  %v822_v18 = vsub.f32 %v673_v3, %v70_v16  ;;  %v617_v16 = vld [vmem:[%s991_s2] ss:$0 sm:$0xff] }
  0x91   :  { %v58_v19 = vpop.xlane.xlu0 %57  ;;  %v62_v20 = vpop.xlane.xlu1 %61 }
  0x92   :  { %v69_v21 = vmul.f32 0.0078125, %v58_v19  ;;  %v80_v22 = vmul.f32 %v820_v17, %v820_v17  ;;  %v71_v23 = vmul.f32 0.0078125, %v62_v20  ;;  %v82_v26 = vmul.f32 %v822_v18, %v822_v18 }
  0x94   :  { %v826_v24 = vsub.f32 %v670_v4, %v69_v21  ;;  %86 = vadd.xlane.f32.xlu0 %v80_v22  ;;  %v828_v25 = vsub.f32 %v674_v5, %v71_v23  ;;  %v618_v23 = vld [vmem:[%s992_s3] ss:$0 sm:$0xff] }
  0x95   :  { %v64_v27 = vpop.xlane.xlu0 %63  ;;  %v66_v28 = vpop.xlane.xlu1 %65 }
  0x96   :  { %v72_v29 = vmul.f32 0.0078125, %v64_v27  ;;  %v81_v30 = vmul.f32 %v826_v24, %v826_v24  ;;  %v73_v31 = vmul.f32 0.0078125, %v66_v28  ;;  %v83_v34 = vmul.f32 %v828_v25, %v828_v25 }
  0x98   :  { %v834_v32 = vsub.f32 %v677_v7, %v72_v29  ;;  %90 = vadd.xlane.f32.xlu0 %v82_v26  ;;  %88 = vadd.xlane.f32.xlu1 %v81_v30  ;;  %v836_v33 = vsub.f32 %v678_v8, %v73_v31 }
  0x9a   :  { %v84_v35 = vmul.f32 %v834_v32, %v834_v32  ;;  %v85_v36 = vmul.f32 %v836_v33, %v836_v33 }
  0x9c   :  { %92 = vadd.xlane.f32.xlu1 %v83_v34  ;;  %94 = vadd.xlane.f32.xlu0 %v84_v35 }
  0xa0   :  { %96 = vadd.xlane.f32.xlu1 %v85_v36 }
 0x11d   :  { %v87_v59 = vpop.xlane.xlu0 %86 }
 0x11e   :  { %v98_v60 = vmul.f32 0.0078125, %v87_v59 }
 0x120   :  { %v104_v61 = vadd.f32 1e-05, %v98_v60 }
 0x121   :  { %v89_v62 = vpop.xlane.xlu1 %88  ;;  %v91_v63 = vpop.xlane.xlu0 %90 }
 0x122   :  { %755 = vrsqrt.f32 %v104_v61  ;;  %v99_v0 = vmul.f32 0.0078125, %v89_v62  ;;  %v100_v1 = vmul.f32 0.0078125, %v91_v63 }
 0x124   :  { %v105_v2 = vadd.f32 1e-05, %v99_v0  ;;  %v106_v3 = vadd.f32 1e-05, %v100_v1 }
 0x125   :  { %v93_v4 = vpop.xlane.xlu1 %92  ;;  %v95_v5 = vpop.xlane.xlu0 %94 }
 0x126   :  { %757 = vrsqrt.f32 %v105_v2  ;;  %v101_v6 = vmul.f32 0.0078125, %v93_v4  ;;  %v102_v8 = vmul.f32 0.0078125, %v95_v5 }
 0x127   :  { %759 = vrsqrt.f32 %v106_v3 }
 0x128   :  { %v107_v7 = vadd.f32 1e-05, %v101_v6  ;;  %v108_v12 = vadd.f32 1e-05, %v102_v8 }
 0x129   :  { %v97_v9 = vpop.xlane.xlu1 %96 }
 0x12a   :  { %761 = vrsqrt.f32 %v107_v7  ;;  %v103_v11 = vmul.f32 0.0078125, %v97_v9 }
 0x12c   :  { %v109_v13 = vadd.f32 1e-05, %v103_v11 }
 0x12e   :  { %763 = vrsqrt.f32 %v109_v13 }
 0x12f   :  { %v756_v14 = vpop.eup %755  ;;  %765 = vrsqrt.f32 %v108_v12 }
 0x130   :  { %v116_v15 = vmul.f32 %v756_v14, %v820_v17 }
 0x132   :  { %v129_v21 = vmul.f32 %v617_v16, %v116_v15 }
 0x133   :  { %v758_v19 = vpop.eup %757 }
 0x134   :  { %v117_v20 = vmul.f32 %v758_v19, %v826_v24  ;;  %v760_v22 = vpop.eup %759  ;;  %v142_v28 = vadd.f32 %v618_v23, %v129_v21 }
 0x135   :  { %v118_v30 = vmul.f32 %v760_v22, %v822_v18 }
 0x136   :  { %v130_v26 = vmul.f32 %v617_v16, %v117_v20 }
 0x137   :  { %v762_v27 = vpop.eup %761  ;;  %v131_v24 = vmul.f32 %v617_v16, %v118_v30 }
 0x138   :  { %v143_v29 = vadd.f32 %v618_v23, %v130_v26  ;;  %v119_v17 = vmul.f32 %v762_v27, %v828_v25 }
 0x139   :  { %v144_v39 = vadd.f32 %v618_v23, %v131_v24 }
 0x13a   :  { %v148_v31 = vpack.c.bf16 %v143_v29, %v142_v28  ;;  %v132_v34 = vmul.f32 %v617_v16, %v119_v17 }
 0x13b   :  { %v764_v35 = vpop.eup %763 }
 0x13c   :  { %362 = vmatmul.mubr.bf16.vlgmr.msra.gmra.mxu0 %v148_v31  ;;  %709 = vmatmul.mubr.bf16.vlgmr.msra.gmra.mxu1 %v148_v31  ;;  %v766_v36 = vpop.eup %765  ;;  %v145_v37 = vadd.f32 %v618_v23, %v132_v34  ;;  %v121_v38 = vmul.f32 %v764_v35, %v836_v33  ;;  %v509_v33 = vshrl.u32 %v508_v45, 7 }
 0x13d   :  { %371 = vmatprep.mubr.bf16.mxu0 %v768_v56  ;;  %712 = vmatprep.mubr.msk.bf16.mxu1 %vm769_vm0, %v767_v10  ;;  %v120_v18 = vmul.f32 %v766_v36, %v834_v32  ;;  %v506_v32 = vld [vmem:[%s993_s4] sm:$0x7] }
 0x13e   :  { %v149_v40 = vpack.c.bf16 %v145_v37, %v144_v39  ;;  %v134_v25 = vmul.f32 %v617_v16, %v121_v38  ;;  %v518_v46 = vsub.s32 2, %v509_v33  ;;  %v510_v47 = vsub.s32 0, %v509_v33 }
 0x13f   :  { %v133_v41 = vmul.f32 %v617_v16, %v120_v18  ;;  %v514_v48 = vsub.s32 1, %v509_v33 }
 0x140   :  { %v147_v42 = vadd.f32 %v618_v23, %v134_v25  ;;  %v519_v49 = vrot.slane %v506_v32, %v518_v46  ;;  %v937_v50 = vrot.slane %v506_v32, %v510_v47 }
 0x141   :  { %v146_v43 = vadd.f32 %v618_v23, %v133_v41  ;;  %v939_v51 = vrot.slane %v506_v32, %v514_v48 }
 0x143   :  { %v150_v44 = vpack.c.bf16 %v147_v42, %v146_v43 }
 0x144   :  { %372 = vmatmul.mubr.bf16.gmra.mxu0 %v149_v40  ;;  %713 = vmatmul.mubr.bf16.gmra.mxu1 %v149_v40 }
 0x145   :  { %381 = vmatprep.mubr.bf16.mxu0 %v768_v56  ;;  %716 = vmatprep.mubr.msk.bf16.mxu1 %vm769_vm0, %v767_v10 }
 0x14c   :  { %382 = vmatmul.mubr.bf16.gmra.mxu0 %v150_v44  ;;  %717 = vmatmul.mubr.bf16.gmra.mxu1 %v150_v44 }
 0x1fc   :  { %v363_v10 = vpop.f32.mrf.mxu0  ;;  %v426_v52 = vpop.f32.mrf.mxu1 }
 0x1fd   :  { %v525_v53 = vadd.f32 %v519_v49, %v426_v52  ;;  %v523_v56 = vadd.f32 %v937_v50, %v363_v10 }
 0x1fe   :  { %v365_v54 = vpop.f32.mrf.mxu0  ;;  %v710_v55 = vpop.f32.mrf.mxu1 }
 0x1ff   :  { %v656_v57 = vpack.c.bf16 %v525_v53, %v525_v53  ;;  %v524_v58 = vadd.f32 %v939_v51, %v365_v54 }
 0x200   :  { %v367_v59 = vpop.f32.mrf.mxu0  ;;  %v429_v60 = vpop.f32.mrf.mxu1 }
 0x201   :  { %602 = vst [vmem:[%s994_s5 + $0x8] sm:$0xf] %v656_v57  ;;  %v655_v61 = vpack.c.bf16 %v524_v58, %v523_v56  ;;  %v528_v62 = vadd.f32 %v519_v49, %v429_v60  ;;  %v526_v1 = vadd.f32 %v937_v50, %v367_v59 }
 0x202   :  { %v369_v63 = vpop.f32.mrf.mxu0  ;;  %v711_v0 = vpop.f32.mrf.mxu1 }
 0x203   :  { %601 = vst [vmem:[%s994_s5] sm:$0xff] %v655_v61  ;;  %v658_v2 = vpack.c.bf16 %v528_v62, %v528_v62  ;;  %v527_v3 = vadd.f32 %v939_v51, %v369_v63 }
 0x204   :  { %v373_v4 = vpop.f32.mrf.mxu0  ;;  %v434_v5 = vpop.f32.mrf.mxu1 }
 0x205   :  { %604 = vst [vmem:[%s994_s5 + $0x14] sm:$0xf] %v658_v2  ;;  %v657_v6 = vpack.c.bf16 %v527_v3, %v526_v1  ;;  %v531_v7 = vadd.f32 %v519_v49, %v434_v5  ;;  %v529_v11 = vadd.f32 %v937_v50, %v373_v4 }
 0x206   :  { %v375_v8 = vpop.f32.mrf.mxu0  ;;  %v714_v9 = vpop.f32.mrf.mxu1 }
 0x207   :  { %603 = vst [vmem:[%s994_s5 + $0xc] sm:$0xff] %v657_v6  ;;  %v660_v12 = vpack.c.bf16 %v531_v7, %v531_v7  ;;  %v530_v13 = vadd.f32 %v939_v51, %v375_v8 }
 0x208   :  { %v377_v14 = vpop.f32.mrf.mxu0  ;;  %v437_v15 = vpop.f32.mrf.mxu1 }
 0x209   :  { %606 = vst [vmem:[%s994_s5 + $0x20] sm:$0xf] %v660_v12  ;;  %v659_v16 = vpack.c.bf16 %v530_v13, %v529_v11  ;;  %v534_v19 = vadd.f32 %v519_v49, %v437_v15  ;;  %v532_v22 = vadd.f32 %v937_v50, %v377_v14 }
 0x20a   :  { %v379_v20 = vpop.f32.mrf.mxu0  ;;  %v715_v21 = vpop.f32.mrf.mxu1 }
 0x20b   :  { %605 = vst [vmem:[%s994_s5 + $0x18] sm:$0xff] %v659_v16  ;;  %v662_v23 = vpack.c.bf16 %v534_v19, %v534_v19  ;;  %v533_v26 = vadd.f32 %v939_v51, %v379_v20 }
 0x20c   :  { %v383_v27 = vpop.f32.mrf.mxu0  ;;  %v442_v28 = vpop.f32.mrf.mxu1 }
 0x20d   :  { %608 = vst [vmem:[%s994_s5 + $0x2c] sm:$0xf] %v662_v23  ;;  %v661_v29 = vpack.c.bf16 %v533_v26, %v532_v22  ;;  %v537_v30 = vadd.f32 %v519_v49, %v442_v28  ;;  %v535_v34 = vadd.f32 %v937_v50, %v383_v27 }
 0x20e   :  { %v385_v17 = vpop.f32.mrf.mxu0  ;;  %v718_v31 = vpop.f32.mrf.mxu1 }
 0x20f   :  { %607 = vst [vmem:[%s994_s5 + $0x24] sm:$0xff] %v661_v29  ;;  %v664_v35 = vpack.c.bf16 %v537_v30, %v537_v30  ;;  %v536_v24 = vadd.f32 %v939_v51, %v385_v17 }
 0x210   :  { %v387_v36 = vpop.f32.mrf.mxu0  ;;  %v445_v37 = vpop.f32.mrf.mxu1 }
 0x211   :  { %610 = vst [vmem:[%s994_s5 + $0x38] sm:$0xf] %v664_v35  ;;  %v663_v38 = vpack.c.bf16 %v536_v24, %v535_v34  ;;  %v540_v39 = vadd.f32 %v519_v49, %v445_v37  ;;  %v538_v25 = vadd.f32 %v937_v50, %v387_v36 }
 0x212   :  { %v389_v18 = vpop.f32.mrf.mxu0  ;;  %v719_v40 = vpop.f32.mrf.mxu1 }
 0x213   :  { %609 = vst [vmem:[%s994_s5 + $0x30] sm:$0xff] %v663_v38  ;;  %v666_v41 = vpack.c.bf16 %v540_v39, %v540_v39  ;;  %v539_v42 = vadd.f32 %v939_v51, %v389_v18 }
 0x215   :  { %612 = vst [vmem:[%s994_s5 + $0x44] sm:$0xf] %v666_v41  ;;  %v665_v43 = vpack.c.bf16 %v539_v42, %v538_v25 }
 0x217   :  { %611 = vst [vmem:[%s994_s5 + $0x3c] sm:$0xff] %v665_v43 }

// kernel: frozen_clip_image_embedder.18
= control target key start
LH: loop header
LB: loop body
LE: loop exit
PB: predicated region body
PF: predicated region fallthrough
CT: control target
= control target key end

     0   :  { %v388_v0 = vmov 0.0   ;;  %vm389_vm0 = vmmov 0   ;;  %s472_s1 = inlined_call_operand.vmem [shape: bf16[128,128], index: 1, kind: input, shape index: {}]   ;;  %s473_s0 = inlined_call_operand.vmem [shape: bf16[48,128], index: 0, kind: input, shape index: {}]   ;;  %s474_s2 = inlined_call_operand.vmem [shape: f32[1,128], index: 2, kind: input, shape index: {}]   ;;  %s475_s3 = inlined_call_operand.vmem [shape: bf16[48,128], index: 3, kind: input, shape index: {}]   ;;  %s476_s4 = inlined_call_operand.vmem [shape: bf16[48,128], index: 4, kind: output, shape index: {}]  }
   0x1   :  { %359 = vmatprep.subr.bf16.mxu1 %v388_v0  ;;  %v377_v1 = vld [vmem:[%s472_s1 + $0x38] sm:$0xff]   ;;  %331 = vmatprep.subr.bf16.mxu0 %v388_v0  ;;  %v378_v2 = vld [vmem:[%s472_s1 + $0x30] sm:$0xff]   ;;  %v379_v3 = vld [vmem:[%s472_s1 + $0x28] sm:$0xff]  }
   0x2   :  { %351 = vmatprep.mubr.msk.bf16.mxu1 %vm389_vm0, %v388_v0  ;;  %347 = vmatprep.mubr.msk.bf16.mxu0 %vm389_vm0, %v388_v0  ;;  %v380_v4 = vld [vmem:[%s472_s1 + $0x20] sm:$0xff]   ;;  %v381_v5 = vld [vmem:[%s472_s1 + $0x18] sm:$0xff]   ;;  %v382_v6 = vld [vmem:[%s472_s1 + $0x10] sm:$0xff]  }
   0x3   :  { %367 = vmatpush3.bf16.msra.mxu1 %v377_v1  ;;  %332 = vmatpush3.bf16.msra.mxu0 %v377_v1  ;;  %v383_v7 = vld [vmem:[%s472_s1 + $0x8] sm:$0xff]   ;;  %v384_v8 = vld [vmem:[%s472_s1] sm:$0xff]   ;;  %v387_v11 = vld [vmem:[%s473_s0 + $0x10] sm:$0xff]  }
   0x4   :  { %360 = vmatprep.subr.bf16.mxu1 %v388_v0  ;;  %333 = vmatprep.subr.bf16.mxu0 %v388_v0  ;;  %v385_v9 = vld [vmem:[%s473_s0 + $0x8] sm:$0xff]   ;;  %v386_v10 = vld [vmem:[%s473_s0] sm:$0xff]   ;;  %v317_v36 = vld [vmem:[%s475_s3 + $0x10] sm:$0xff]  }
   0x5   :  { %v290_v12 = vld [vmem:[%s475_s3] sm:$0xff]   ;;  %v316_v15 = vld [vmem:[%s475_s3 + $0x8] sm:$0xff]   ;;  %v299_v41 = vunpack.c.l.bf16 %v317_v36  ;;  %v300_v42 = vunpack.c.h.bf16 %v317_v36 }
   0x6   :  { %v276_v14 = vld [vmem:[%s474_s2] ss:$0 sm:$0xff]  ;;  %v291_v18 = vunpack.c.l.bf16 %v290_v12  ;;  %v295_v22 = vunpack.c.l.bf16 %v316_v15  ;;  %v296_v23 = vunpack.c.h.bf16 %v316_v15  ;;  %v292_v24 = vunpack.c.h.bf16 %v290_v12 }
   0x7   :  { %368 = vmatpush3.bf16.msra.mxu1 %v378_v2  ;;  %334 = vmatpush3.bf16.msra.mxu0 %v378_v2 }
   0x8   :  { %361 = vmatprep.subr.bf16.mxu1 %v388_v0  ;;  %335 = vmatprep.subr.bf16.mxu0 %v388_v0 }
   0xb   :  { %369 = vmatpush3.bf16.msra.mxu1 %v379_v3  ;;  %336 = vmatpush3.bf16.msra.mxu0 %v379_v3 }
   0xc   :  { %362 = vmatprep.subr.bf16.mxu1 %v388_v0  ;;  %337 = vmatprep.subr.bf16.mxu0 %v388_v0 }
   0xf   :  { %370 = vmatpush3.bf16.msra.mxu1 %v380_v4  ;;  %338 = vmatpush3.bf16.msra.mxu0 %v380_v4 }
  0x10   :  { %363 = vmatprep.subr.bf16.mxu1 %v388_v0  ;;  %339 = vmatprep.subr.bf16.mxu0 %v388_v0 }
  0x13   :  { %371 = vmatpush3.bf16.msra.mxu1 %v381_v5  ;;  %340 = vmatpush3.bf16.msra.mxu0 %v381_v5 }
  0x14   :  { %364 = vmatprep.subr.bf16.mxu1 %v388_v0  ;;  %341 = vmatprep.subr.bf16.mxu0 %v388_v0 }
  0x17   :  { %372 = vmatpush3.bf16.msra.mxu1 %v382_v6  ;;  %342 = vmatpush3.bf16.msra.mxu0 %v382_v6 }
  0x18   :  { %365 = vmatprep.subr.bf16.mxu1 %v388_v0  ;;  %343 = vmatprep.subr.bf16.mxu0 %v388_v0 }
  0x1b   :  { %373 = vmatpush3.bf16.msra.mxu1 %v383_v7  ;;  %344 = vmatpush3.bf16.msra.mxu0 %v383_v7 }
  0x1c   :  { %366 = vmatprep.subr.bf16.mxu1 %v388_v0  ;;  %345 = vmatprep.subr.bf16.mxu0 %v388_v0 }
  0x1f   :  { %374 = vmatpush3.bf16.msra.mxu1 %v384_v8  ;;  %346 = vmatpush3.bf16.msra.mxu0 %v384_v8 }
  0x22   :  { %352 = vmatmul.mubr.bf16.vlgmr.msra.gmra.mxu1 %v385_v9  ;;  %348 = vmatmul.mubr.bf16.vlgmr.msra.gmra.mxu0 %v386_v10 }
  0x23   :  { %355 = vmatprep.mubr.msk.bf16.mxu1 %vm389_vm0, %v388_v0 }
  0x2a   :  { %356 = vmatmul.mubr.bf16.gmra.mxu1 %v387_v11 }
  0xe2   :  { %v164_v13 = vpop.f32.mrf.mxu1  ;;  %v156_v16 = vpop.f32.mrf.mxu0 }
  0xe3   :  { %v207_v17 = vadd.f32 %v276_v14, %v156_v16  ;;  %v209_v21 = vadd.f32 %v276_v14, %v164_v13 }
  0xe4   :  { %v353_v19 = vpop.f32.mrf.mxu1  ;;  %v349_v20 = vpop.f32.mrf.mxu0 }
  0xe5   :  { %v225_v27 = vadd.f32 %v291_v18, %v207_v17  ;;  %v227_v32 = vadd.f32 %v295_v22, %v209_v21 }
  0xe6   :  { %v167_v25 = vpop.f32.mrf.mxu1  ;;  %v159_v26 = vpop.f32.mrf.mxu0 }
  0xe7   :  { %v210_v28 = vadd.f32 %v276_v14, %v167_v25  ;;  %v208_v29 = vadd.f32 %v276_v14, %v159_v26 }
  0xe8   :  { %v354_v30 = vpop.f32.mrf.mxu1  ;;  %v350_v31 = vpop.f32.mrf.mxu0 }
  0xe9   :  { %v228_v33 = vadd.f32 %v296_v23, %v210_v28  ;;  %v226_v34 = vadd.f32 %v292_v24, %v208_v29 }
  0xea   :  { %v172_v35 = vpop.f32.mrf.mxu1 }
  0xeb   :  { %v309_v37 = vpack.c.bf16 %v228_v33, %v227_v32  ;;  %v304_v38 = vpack.c.bf16 %v226_v34, %v225_v27  ;;  %v211_v40 = vadd.f32 %v276_v14, %v172_v35 }
  0xec   :  { %v357_v39 = vpop.f32.mrf.mxu1 }
  0xed   :  { %318 = vst [vmem:[%s476_s4 + $0x8] sm:$0xff] %v309_v37   ;;  %305 = vst [vmem:[%s476_s4] sm:$0xff] %v304_v38   ;;  %v229_v46 = vadd.f32 %v299_v41, %v211_v40 }
  0xee   :  { %v175_v43 = vpop.f32.mrf.mxu1 }
  0xef   :  { %v212_v44 = vadd.f32 %v276_v14, %v175_v43 }
  0xf0   :  { %v358_v45 = vpop.f32.mrf.mxu1 }
  0xf1   :  { %v230_v47 = vadd.f32 %v300_v42, %v212_v44 }
  0xf3   :  { %v314_v48 = vpack.c.bf16 %v230_v47, %v229_v46 }
  0xf5   :  { %319 = vst [vmem:[%s476_s4 + $0x10] sm:$0xff] %v314_v48  }

// kernel: frozen_clip_image_embedder.26
= control target key start
LH: loop header
LB: loop body
LE: loop exit
PB: predicated region body
PF: predicated region fallthrough
CT: control target
= control target key end

     0   :  { %vm16_vm0 = vcmask 1041408   ;;  %s89_s0 = inlined_call_operand.vmem [shape: bf16[2,128], index: 0, kind: input, shape index: {}]   ;;  %s90_s1 = inlined_call_operand.vmem [shape: f32[1,128], index: 1, kind: input, shape index: {}]   ;;  %s91_s2 = inlined_call_operand.vmem [shape: f32[1,128], index: 2, kind: input, shape index: {}]   ;;  %s92_s3 = inlined_call_operand.vmem [shape: bf16[2,128], index: 3, kind: output, shape index: {}]  }
   0x1   :  { %v14_v0 = vld [vmem:[%s89_s0] sm:$0x1] }
   0x2   :  { %v15_v1 = vunpack.c.l.bf16 %v14_v0  ;;  %v53_v12 = vld [vmem:[%s90_s1] ss:$0 sm:$0xff] }
   0x3   :  { %v54_v14 = vld [vmem:[%s91_s2] ss:$0 sm:$0xff] }
   0x4   :  { %v17_v2 = vsel %vm16_vm0, %v15_v1, 0.0 }
   0x5   :  { %18 = vadd.xlane.f32.xlu0 %v17_v2 }
  0x8e   :  { %v19_v3 = vpop.xlane.xlu0 %18 }
  0x8f   :  { %v21_v4 = vmul.f32 0.0078125, %v19_v3 }
  0x91   :  { %v22_v5 = vsub.f32 %v15_v1, %v21_v4 }
  0x93   :  { %v23_v6 = vmul.f32 %v22_v5, %v22_v5 }
  0x95   :  { %v24_v7 = vsel %vm16_vm0, %v23_v6, 0.0 }
  0x96   :  { %25 = vadd.xlane.f32.xlu0 %v24_v7 }
 0x11f   :  { %v26_v8 = vpop.xlane.xlu0 %25 }
 0x120   :  { %v27_v9 = vmul.f32 0.0078125, %v26_v8 }
 0x122   :  { %v28_v10 = vadd.f32 1e-05, %v27_v9 }
 0x124   :  { %55 = vrsqrt.f32 %v28_v10 }
 0x131   :  { %v56_v11 = vpop.eup %55 }
 0x132   :  { %v30_v13 = vmul.f32 %v56_v11, %v22_v5 }
 0x134   :  { %v38_v15 = vmul.f32 %v53_v12, %v30_v13 }
 0x136   :  { %v46_v16 = vadd.f32 %v54_v14, %v38_v15 }
 0x138   :  { %v47_v17 = vpack.c.bf16 %v46_v16, %v46_v16 }
 0x13a   :  { %48 = vst [vmem:[%s92_s3] sm:$0x1] %v47_v17 }

// kernel: frozen_clip_image_embedder.17
= control target key start
LH: loop header
LB: loop body
LE: loop exit
PB: predicated region body
PF: predicated region fallthrough
CT: control target
= control target key end

     0   :  { %s1171_s12 = smov 0   ;;  %s1173_s13 = smov 0   ;;  %s1344_s0 = inlined_call_operand.vmem [shape: bf16[2,24,384], index: 0, kind: input, shape index: {}, may-alias: {0,1,2}]   ;;  %s1345_s1 = inlined_call_operand.vmem [shape: bf16[2,24,384], index: 1, kind: input, shape index: {}, may-alias: {0,1,2}]   ;;  %s1346_s2 = inlined_call_operand.vmem [shape: bf16[2,24,384], index: 2, kind: input, shape index: {}, may-alias: {0,1,2}]   ;;  %s1347_s3 = inlined_call_operand.vmem [shape: bf16[2,24,128], index: 3, kind: output, shape index: {}]  }
   0x1   :  { %s1175_s14 = smov 0   ;;  %s1177_s15 = smov 0  }
   0x2   :  { %s1179_s16 = smov 0  }
   0x3 LB: > { %s25_s17 = sadd.s32 1, %s1144_s15  ;;  %p41_p1 = scmp.ne.s32.totalorder %s1136_s13, %s1132_s12  ;;  %s1148_s16 = sphi %s1179_s16, %s13_s16   ;;  %s1144_s15 = sphi %s1177_s15, %s1352_s15   ;;  %s1140_s14 = sphi %s1175_s14, %s1351_s14   ;;  %s1136_s13 = sphi %s1173_s13, %s1350_s13   ;;  %s1132_s12 = sphi %s1171_s12, %s1349_s12  }
   0x4   : > { %p27_p0 = scmp.ge.s32.totalorder %s25_s17, 2  ;;  %p42_p2 = scmp.eq.s32.totalorder %s1148_s16, 0 }
   0x5   : > { %s34_s20 = sadd.s32 1, %s1136_s13  ;;  %p935_p5 = scmp.ge.s32.totalorder %s1148_s16, 2 }
   0x6   : > { %s1354_s17 = smov (%p27_p0, %s25_s17), 0  ;;  %p1202_p3 = por %p42_p2, %p41_p1 }
   0x7   : > { %s29_s19 = ssub.s32 %s1144_s15, %s1354_s17  ;;  %155 = sbr.rel (%p935_p5) target bundleno = 33 (0x21), region = 16 }
   0x8   : > { %p32_p4 = scmp.eq.s32.totalorder %s29_s19, 0 }
   0xa   : > { %s1210_s21 = scalar_select %p32_p4, %s1136_s13, %s34_s20  }
   0xc   : > { %158 = sbr.rel (!%p1202_p3) target bundleno = 19 (0x13), region = 20  ;;  %s160_s22 = sand.u32 (%p1202_p3), 1, %s1136_s13  }
   0xd   : > { %s1029_s23 = smul.u32 (%p1202_p3), 36, %s1144_s15 }
   0xe   : > { %s1028_s24 = smul.u32 (%p1202_p3), 12, %s160_s22 }
   0xf   : > { %s166_s27 = scalar_lea.vmem (%p1202_p3), %s1344_s0, %s1029_s23 }
  0x10   : > { %v183_v0 = vld [vmem:[%s166_s27] sm:$0xf] (%p1202_p3)  ;;  %v185_v1 = vld [vmem:[%s166_s27 + $0xc] sm:$0xf] (%p1202_p3)  ;;  %s162_s28 = scalar_lea.vmem (%p1202_p3), [#allocation2], %s1028_s24 }
  0x11   : > { %184 = vst [vmem:[%s162_s28] sm:$0xf] %v183_v0  ;;  %186 = vst [vmem:[%s162_s28 + $0x4] sm:$0xf] %v185_v1  ;;  %v187_v2 = vld [vmem:[%s166_s27 + $0x18] sm:$0xf] }
  0x12   : > { %188 = vst [vmem:[%s162_s28 + $0x8] sm:$0xf] %v187_v2 }
  0x13 PF: > { %218 = sbr.rel (!%p1202_p3) target bundleno = 26 (0x1a), region = 61  ;;  %s220_s29 = sand.u32 (%p1202_p3), 1, %s1136_s13  }
  0x14   : > { %s937_s30 = smul.u32 (%p1202_p3), 36, %s1144_s15 }
  0x15   : > { %s1030_s4 = smul.u32 (%p1202_p3), 12, %s220_s29 }
  0x16   : > { %s843_s7 = scalar_lea.vmem (%p1202_p3), %s1345_s1, %s937_s30 }
  0x17   : > { %v938_v3 = vld [vmem:[%s843_s7 + $0x4] sm:$0xf] (%p1202_p3)  ;;  %v939_v4 = vld [vmem:[%s843_s7 + $0x10] sm:$0xf] (%p1202_p3)  ;;  %s222_s8 = scalar_lea.vmem (%p1202_p3), [#allocation3], %s1030_s4 }
  0x18   : > { %245 = vst [vmem:[%s222_s8] sm:$0xf] %v938_v3  ;;  %247 = vst [vmem:[%s222_s8 + $0x4] sm:$0xf] %v939_v4  ;;  %v940_v5 = vld [vmem:[%s843_s7 + $0x1c] sm:$0xf] }
  0x19   : > { %249 = vst [vmem:[%s222_s8 + $0x8] sm:$0xf] %v940_v5 }
  0x1a PF: > { %279 = sbr.rel (!%p1202_p3) target bundleno = 33 (0x21), region = 102  ;;  %s281_s9 = sand.u32 (%p1202_p3), 1, %s1136_s13  }
  0x1b   : > { %s941_s10 = smul.u32 (%p1202_p3), 36, %s1144_s15 }
  0x1c   : > { %s1031_s11 = smul.u32 (%p1202_p3), 12, %s281_s9 }
  0x1d   : > { %s850_s22 = scalar_lea.vmem (%p1202_p3), %s1346_s2, %s941_s10 }
  0x1e   : > { %v942_v6 = vld [vmem:[%s850_s22 + $0x8] sm:$0xf] (%p1202_p3)  ;;  %v943_v7 = vld [vmem:[%s850_s22 + $0x14] sm:$0xf] (%p1202_p3)  ;;  %s283_s23 = scalar_lea.vmem (%p1202_p3), [#allocation4], %s1031_s11 }
  0x1f   : > { %306 = vst [vmem:[%s283_s23] sm:$0xf] %v942_v6  ;;  %308 = vst [vmem:[%s283_s23 + $0x4] sm:$0xf] %v943_v7  ;;  %v944_v8 = vld [vmem:[%s850_s22 + $0x20] sm:$0xf] }
  0x20   : > { %310 = vst [vmem:[%s283_s23 + $0x8] sm:$0xf] %v944_v8 }
  0x21 PF: > { %p945_p6 = scmp.ge.s32.totalorder %s1148_s16, 1  ;;  %p339_p7 = scmp.lt.s32.totalorder %s1148_s16, 3 }
  0x23   : > { %p340_p8 = pnand %p945_p6, %p339_p7 }
  0x24   : > { %s346_s18 = sand.u32 (!%p340_p8), 1, %s1132_s12   ;;  %s1150_s27 = smov (!%p340_p8), 64  }
  0x25   : > { %343 = sbr.rel (%p340_p8) target bundleno = 1435 (0x59b), region = 143  ;;  %p396_p9 = scmp.lt.s32.totalorder (!%p340_p8), %s1140_s14, 1 }
  0x26   : > { %s1237_s24 = smul.u32 (!%p340_p8), 12, %s346_s18 }
  0x28   : > { %s355_s25 = scalar_lea.vmem (!%p340_p8), [#allocation3], %s1237_s24  ;;  %s348_s26 = scalar_lea.vmem (!%p340_p8), [#allocation2], %s1237_s24 }
  0x29   : > { %s362_s12 = scalar_lea.vmem (!%p340_p8), [#allocation4], %s1237_s24 }
  0x2a   : > { %vm430_vm0 = vcmask 523264   ;;  %v1240_v9 = vld [vmem:[%s355_s25 + $0x8] ss:$0 sps:$4 sm:$0xff]   ;;  %v1081_v10 = vld [vmem:[%s355_s25] sm:$0xff]   ;;  %v1083_v14 = vld [vmem:[%s348_s26 + $0x8] ss:$0 sps:$4 sm:$0xff]   ;;  %v494_v15 = vlaneseq }
  0x2b   : > { %1022 = vmatprep.subr.msk.bf16.mxu0 %vm430_vm0, %v1240_v9  ;;  %v441_v11 = vsel %vm430_vm0, %v1240_v9, 0  ;;  %v1082_v12 = vld [vmem:[%s348_s26] sm:$0xff]   ;;  %v438_v13 = vsel %vm430_vm0, %v1081_v10, 0  ;;  %vm500_vm2 = vcmask 195584   ;;  %vm551_vm3 = vcmask 1043456   ;;  %v1269_v46 = vld [vmem:[%s362_s12] sm:$0xff]  }
  0x2c   : > { %991 = vmatpush3.bf16.xpose.msra.mxu0 %v441_v11  ;;  %994 = vmatprep.mubr.msk.bf16.mxu0 %vm430_vm0, %v1082_v12  ;;  %v1251_v16 = vand.u32 127, %v494_v15  ;;  %v1267_v45 = vld [vmem:[%s362_s12 + $0x8] ss:$0 sps:$4 sm:$0xff]   ;;  %s1356_s14 = smov (!%p396_p9, %s1140_s14), 1 }
  0x2d   : > { %1023 = vmatprep.subr.msk.bf16.mxu0 %vm430_vm0, %v1081_v10  ;;  %1024 = vmatprep.subr.msk.bf16.mxu1 %vm551_vm3, %v1267_v45  ;;  %v553_v47 = vsel %vm551_vm3, %v1267_v45, 0  ;;  %s1033_s28 = smul.u32 12, %s1356_s14 }
  0x2e   : > { %vm496_vm1 = vcmp.lt.s32.totalorder %v1251_v16, 17  ;;  %999 = vmatpush3.bf16.msra.mxu1 %v553_v47 }
  0x2f   : > { %1000 = vmatprep.subr.bf16.mxu1 %v1269_v46  ;;  %s403_s4 = scalar_lea.vmem %s1347_s3, %s1033_s28 }
  0x32   : > { %1001 = vmatpush3.bf16.msra.mxu1 %v1269_v46 }
  0x34   : > { %993 = vmatpush3.bf16.xpose.msra.mxu0 %v438_v13 }
  0x3b   : > { %995 = vmatmul.mubr.msk.bf16.vlgmr.msra.gmra.mxu0 %vm430_vm0, %v1083_v14 }
  0xfb   : > { %v996_v17 = vpop.f32.mrf.mxu0 }
  0xfc   : > { %v493_v18 = vmul.f32 0.125, %v996_v17 }
  0xfd   : > { %v477_v19 = vpop.f32.mrf.mxu0 }
  0xfe   : > { %v491_v20 = vmul.f32 0.125, %v477_v19  ;;  %v499_v21 = vsel %vm496_vm1, %v493_v18, -1e+30 }
  0xff   : > { %v997_v22 = vpop.f32.mrf.mxu0  ;;  %v507_v23 = vsel %vm500_vm2, %v499_v21, -inf }
 0x100   : > { %508 = vmax.xlane.f32.xlu1 %v507_v23  ;;  %v497_v24 = vsel %vm496_vm1, %v491_v20, -1e+30 }
 0x101   : > { %v480_v25 = vpop.f32.mrf.mxu0  ;;  %v501_v26 = vsel %vm500_vm2, %v497_v24, -inf }
 0x102   : > { %v492_v27 = vmul.f32 0.125, %v480_v25  ;;  %502 = vmax.xlane.f32.xlu0 %v501_v26 }
 0x104   : > { %v498_v28 = vsel %vm496_vm1, %v492_v27, -1e+30 }
 0x105   : > { %v504_v29 = vsel %vm500_vm2, %v498_v28, -inf }
 0x106   : > { %505 = vmax.xlane.f32.xlu0 %v504_v29 }
 0x189   : > { %v509_v30 = vpop.xlane.xlu1 %508 }
 0x18a   : > { %v512_v31 = vsub.f32 %v499_v21, %v509_v30 }
 0x18b   : > { %v503_v32 = vpop.xlane.xlu0 %502 }
 0x18c   : > { %v510_v33 = vsub.f32 %v497_v24, %v503_v32  ;;  %v517_v34 = vmul.f32 1.442695, %v512_v31 }
 0x18e   : > { %v513_v35 = vmul.f32 1.442695, %v510_v33 }
 0x18f   : > { %v506_v36 = vpop.xlane.xlu0 %505 }
 0x190   : > { %1086 = vpow2.f32 %v513_v35  ;;  %v511_v37 = vsub.f32 %v498_v28, %v506_v36 }
 0x191   : > { %1088 = vpow2.f32 %v517_v34 }
 0x192   : > { %v515_v38 = vmul.f32 1.442695, %v511_v37 }
 0x194   : > { %1090 = vpow2.f32 %v515_v38 }
 0x19d   : > { %v1087_v39 = vpop.eup %1086 }
 0x19e   : > { %v519_v40 = vsel %vm500_vm2, %v1087_v39, 0.0  ;;  %v1089_v41 = vpop.eup %1088 }
 0x19f   : > { %520 = vadd.xlane.f32.xlu1 %v519_v40  ;;  %v525_v43 = vsel %vm500_vm2, %v1089_v41, 0.0 }
 0x1a1   : > { %v1091_v42 = vpop.eup %1090 }
 0x1a2   : > { %v522_v44 = vsel %vm500_vm2, %v1091_v42, 0.0 }
 0x1a3   : > { %526 = vadd.xlane.f32.xlu1 %v525_v43  ;;  %523 = vadd.xlane.f32.xlu0 %v522_v44 }
 0x1b4   : > { %607 = vrot.lane.b32.xlu1 %v1081_v10, %s1150_s27 }
 0x1b8   : > { %603 = vrot.lane.b32.xlu1 %v1082_v12, %s1150_s27 }
 0x1b9   : > { %609 = vrot.lane.b32.xlu0 %v1240_v9, %s1150_s27 }
 0x1bc   : > { %605 = vrot.lane.b32.xlu1 %v1083_v14, %s1150_s27 }
 0x228   : > { %v521_v48 = vpop.xlane.xlu1 %520 }
 0x229   : > { %1092 = vrcp.f32 %v521_v48 }
 0x22c   : > { %v527_v49 = vpop.xlane.xlu1 %526  ;;  %v524_v50 = vpop.xlane.xlu0 %523 }
 0x22d   : > { %1094 = vrcp.f32 %v527_v49 }
 0x22e   : > { %1096 = vrcp.f32 %v524_v50 }
 0x230   : > { %v610_v51 = vpop.permute.xlu0 %609  ;;  %v608_v53 = vpop.permute.xlu1 %607 }
 0x231   : > { %1025 = vmatprep.subr.msk.bf16.mxu1 %vm430_vm0, %v610_v51  ;;  %v621_v61 = vsel %vm430_vm0, %v610_v51, 0  ;;  %v618_v63 = vsel %vm430_vm0, %v608_v53, 0 }
 0x234   : > { %v604_v62 = vpop.permute.xlu1 %603 }
 0x236   : > { %v1093_v52 = vpop.eup %1092 }
 0x237   : > { %v531_v57 = vmul.f32 %v1093_v52, %v1087_v39 }
 0x238   : > { %v606_v0 = vpop.permute.xlu1 %605 }
 0x23a   : > { %v1095_v54 = vpop.eup %1094 }
 0x23b   : > { %v1097_v55 = vpop.eup %1096  ;;  %v533_v56 = vmul.f32 %v1095_v54, %v1089_v41 }
 0x23c   : > { %v532_v58 = vmul.f32 %v1097_v55, %v1091_v42 }
 0x23d   : > { %v535_v59 = vpack.c.bf16 %v533_v56, %v533_v56 }
 0x23e   : > { %v534_v60 = vpack.c.bf16 %v532_v58, %v531_v57 }
 0x240   : > { %1002 = vmatprep.mubr.msk.bf16.mxu1 %vm500_vm2, %v534_v60 }
 0x241   : > { %1003 = vmatmul.mubr.msk.bf16.vlgmr.msra.gmra.mxu1 %vm500_vm2, %v535_v59 }
 0x242   : > { %1007 = vmatpush3.bf16.xpose.msra.mxu1 %v621_v61  ;;  %1010 = vmatprep.mubr.msk.bf16.mxu1 %vm430_vm0, %v604_v62 }
 0x243   : > { %1026 = vmatprep.subr.msk.bf16.mxu1 %vm430_vm0, %v608_v53 }
 0x24a   : > { %1009 = vmatpush3.bf16.xpose.msra.mxu1 %v618_v63 }
 0x251   : > { %1011 = vmatmul.mubr.msk.bf16.vlgmr.msra.gmra.mxu1 %vm430_vm0, %v606_v0 }
 0x301   : > { %v1290_v1 = vpop.f32.mrf.mxu1 }
 0x303   : > { %v1292_v2 = vpop.f32.mrf.mxu1 }
 0x305   : > { %v1005_v3 = vpop.f32.mrf.mxu1 }
 0x307   : > { %v1294_v4 = vpop.f32.mrf.mxu1 }
 0x311   : > { %v1012_v5 = vpop.f32.mrf.mxu1 }
 0x312   : > { %v673_v7 = vmul.f32 0.125, %v1012_v5 }
 0x313   : > { %v657_v6 = vpop.f32.mrf.mxu1 }
 0x314   : > { %v671_v8 = vmul.f32 0.125, %v657_v6  ;;  %v676_v14 = vsel %vm496_vm1, %v673_v7, -1e+30 }
 0x315   : > { %v1013_v9 = vpop.f32.mrf.mxu1  ;;  %v683_v17 = vsel %vm500_vm2, %v676_v14, -inf }
 0x316   : > { %v674_v10 = vsel %vm496_vm1, %v671_v8, -1e+30 }
 0x317   : > { %v660_v11 = vpop.f32.mrf.mxu1  ;;  %v677_v12 = vsel %vm500_vm2, %v674_v10, -inf }
 0x318   : > { %v672_v13 = vmul.f32 0.125, %v660_v11  ;;  %678 = vmax.xlane.f32.xlu0 %v677_v12 }
 0x31a   : > { %v675_v15 = vsel %vm496_vm1, %v672_v13, -1e+30 }
 0x31b   : > { %v680_v18 = vsel %vm500_vm2, %v675_v15, -inf }
 0x31c   : > { %684 = vmax.xlane.f32.xlu0 %v683_v17  ;;  %681 = vmax.xlane.f32.xlu1 %v680_v18 }
 0x3a1   : > { %v679_v19 = vpop.xlane.xlu0 %678 }
 0x3a2   : > { %v686_v20 = vsub.f32 %v674_v10, %v679_v19 }
 0x3a4   : > { %v689_v21 = vmul.f32 1.442695, %v686_v20 }
 0x3a5   : > { %v685_v22 = vpop.xlane.xlu0 %684  ;;  %v682_v23 = vpop.xlane.xlu1 %681 }
 0x3a6   : > { %1098 = vpow2.f32 %v689_v21  ;;  %v688_v24 = vsub.f32 %v676_v14, %v685_v22  ;;  %v687_v25 = vsub.f32 %v675_v15, %v682_v23 }
 0x3a8   : > { %v693_v26 = vmul.f32 1.442695, %v688_v24  ;;  %v691_v27 = vmul.f32 1.442695, %v687_v25 }
 0x3aa   : > { %1100 = vpow2.f32 %v693_v26 }
 0x3ab   : > { %1102 = vpow2.f32 %v691_v27 }
 0x3b3   : > { %v1099_v16 = vpop.eup %1098 }
 0x3b4   : > { %v695_v28 = vsel %vm500_vm2, %v1099_v16, 0.0 }
 0x3b5   : > { %696 = vadd.xlane.f32.xlu0 %v695_v28 }
 0x3b7   : > { %v1101_v29 = vpop.eup %1100 }
 0x3b8   : > { %v1103_v30 = vpop.eup %1102  ;;  %v701_v31 = vsel %vm500_vm2, %v1101_v29, 0.0 }
 0x3b9   : > { %702 = vadd.xlane.f32.xlu1 %v701_v31  ;;  %v698_v32 = vsel %vm500_vm2, %v1103_v30, 0.0 }
 0x3ba   : > { %699 = vadd.xlane.f32.xlu0 %v698_v32 }
 0x3ca   : > { %712 = vrot.lane.b32.xlu1 %v1269_v46, %s1150_s27 }
 0x3d0   : > { %714 = vrot.lane.b32.xlu0 %v1267_v45, %s1150_s27 }
 0x43e   : > { %v697_v33 = vpop.xlane.xlu0 %696 }
 0x43f   : > { %1104 = vrcp.f32 %v697_v33 }
 0x442   : > { %v703_v34 = vpop.xlane.xlu1 %702 }
 0x443   : > { %v700_v35 = vpop.xlane.xlu0 %699  ;;  %1106 = vrcp.f32 %v703_v34 }
 0x444   : > { %1108 = vrcp.f32 %v700_v35 }
 0x446   : > { %v713_v37 = vpop.permute.xlu1 %712 }
 0x447   : > { %v715_v36 = vpop.permute.xlu0 %714 }
 0x448   : > { %v724_v38 = vsel %vm551_vm3, %v715_v36, 0  ;;  %1027 = vmatprep.subr.msk.bf16.mxu0 %vm551_vm3, %v715_v36 }
 0x449   : > { %1015 = vmatpush3.bf16.msra.mxu0 %v724_v38 }
 0x44a   : > { %1016 = vmatprep.subr.bf16.mxu0 %v713_v37 }
 0x44c   : > { %v1105_v39 = vpop.eup %1104 }
 0x44d   : > { %1017 = vmatpush3.bf16.msra.mxu0 %v713_v37  ;;  %v707_v43 = vmul.f32 %v1105_v39, %v1099_v16 }
 0x450   : > { %v1107_v40 = vpop.eup %1106 }
 0x451   : > { %v1109_v41 = vpop.eup %1108  ;;  %v709_v42 = vmul.f32 %v1107_v40, %v1101_v29 }
 0x452   : > { %v708_v44 = vmul.f32 %v1109_v41, %v1103_v30 }
 0x453   : > { %v711_v45 = vpack.c.bf16 %v709_v42, %v709_v42 }
 0x454   : > { %v710_v46 = vpack.c.bf16 %v708_v44, %v707_v43 }
 0x456   : > { %1018 = vmatprep.mubr.msk.bf16.mxu0 %vm500_vm2, %v710_v46 }
 0x457   : > { %1019 = vmatmul.mubr.msk.bf16.vlgmr.msra.gmra.mxu0 %vm500_vm2, %v711_v45 }
 0x517   : > { %v1020_v47 = vpop.f32.mrf.mxu0 }
 0x519   : > { %v760_v48 = vpop.f32.mrf.mxu0 }
 0x51b   : > { %v1021_v49 = vpop.f32.mrf.mxu0 }
 0x51d   : > { %v763_v50 = vpop.f32.mrf.mxu0 }
 0x51e   : > { %v1075_v51 = vpack.i.bf16 %v763_v50, %v760_v48 }
 0x520   : > { %1076 = vrot.lane.b32.xlu1 %v1075_v51, %s1150_s27 }
 0x524   : > { %781 = vrot.lane.b32.xlu1 %v1020_v47, %s1150_s27 }
 0x592   : > { %v1077_v52 = vpop.permute.xlu1 %1076 }
 0x593   : > { %v1079_v53 = vunpack.i.h.bf16 %v1077_v52  ;;  %v1078_v54 = vunpack.i.l.bf16 %v1077_v52 }
 0x595   : > { %v787_v55 = vsel %vm430_vm0, %v1294_v4, %v1079_v53  ;;  %v786_v56 = vsel %vm430_vm0, %v1292_v2, %v1078_v54 }
 0x596   : > { %v972_v57 = vpack.c.bf16 %v787_v55, %v786_v56  ;;  %v782_v58 = vpop.permute.xlu1 %781 }
 0x597   : > { %v788_v59 = vsel %vm430_vm0, %v1290_v1, %v782_v58 }
 0x598   : > { %v968_v60 = vpack.c.bf16 %v788_v59, %v788_v59  ;;  %973 = vst [vmem:[%s403_s4] sm:$0xff] %v972_v57  }
 0x59a   : > { %804 = vst [vmem:[%s403_s4 + $0x8] sm:$0xf] %v968_v60 }
 0x59b PF: > { %s13_s16 = sadd.s32 1, %s1148_s16   ;;  %s1349_s12 = smov %s1136_s13 }
 0x59c   : > { %p10_p10 = scmp.ge.s32.totalorder %s13_s16, 4   ;;  %s1350_s13 = smov %s1210_s21 }
 0x59d   : > { %s1351_s14 = smov %s1144_s15  ;;  %s1352_s15 = smov %s1354_s17 }
 0x59e   :  { %12 = sbr.rel (!%p10_p10) target bundleno = 3 (0x3), region = 206 }

// kernel: frozen_clip_image_embedder.20
= control target key start
LH: loop header
LB: loop body
LE: loop exit
PB: predicated region body
PF: predicated region fallthrough
CT: control target
= control target key end

     0   :  { %s946_s1 = inlined_call_operand.vmem [shape: bf16[512,128], index: 1, kind: input, shape index: {}]   ;;  %s947_s0 = inlined_call_operand.vmem [shape: bf16[48,512], index: 0, kind: input, shape index: {}]   ;;  %s948_s2 = inlined_call_operand.vmem [shape: f32[1,128], index: 2, kind: input, shape index: {}]   ;;  %s949_s3 = inlined_call_operand.vmem [shape: bf16[48,128], index: 3, kind: input, shape index: {}]   ;;  %s950_s4 = inlined_call_operand.vmem [shape: bf16[48,128], index: 4, kind: output, shape index: {}]  }
   0x1   :  { %v718_v0 = vld [vmem:[%s946_s1 + $0x78] sm:$0xff]   ;;  %v722_v4 = vld [vmem:[%s946_s1 + $0x70] sm:$0xff]   ;;  %v726_v8 = vld [vmem:[%s946_s1 + $0x68] sm:$0xff]  }
   0x2   :  { %v719_v1 = vld [vmem:[%s946_s1 + $0xf8] sm:$0xff]   ;;  %650 = vmatprep.subr.bf16.mxu0 %v718_v0  ;;  %v723_v5 = vld [vmem:[%s946_s1 + $0xf0] sm:$0xff]   ;;  %v727_v9 = vld [vmem:[%s946_s1 + $0xe8] sm:$0xff]  }
   0x3   :  { %v720_v2 = vld [vmem:[%s946_s1 + $0x38] sm:$0xff]   ;;  %684 = vmatprep.subr.bf16.mxu1 %v719_v1  ;;  %v724_v6 = vld [vmem:[%s946_s1 + $0x30] sm:$0xff]   ;;  %v728_v10 = vld [vmem:[%s946_s1 + $0x28] sm:$0xff]  }
   0x4   :  { %v721_v3 = vld [vmem:[%s946_s1 + $0xb8] sm:$0xff]   ;;  %651 = vmatpush3.bf16.msra.mxu0 %v720_v2  ;;  %v725_v7 = vld [vmem:[%s946_s1 + $0xb0] sm:$0xff]   ;;  %v729_v11 = vld [vmem:[%s946_s1 + $0xa8] sm:$0xff]  }
   0x5   :  { %685 = vmatpush3.bf16.msra.mxu1 %v721_v3  ;;  %652 = vmatprep.subr.bf16.mxu0 %v722_v4  ;;  %v730_v12 = vld [vmem:[%s946_s1 + $0x60] sm:$0xff]   ;;  %v734_v16 = vld [vmem:[%s946_s1 + $0x58] sm:$0xff]   ;;  %v738_v20 = vld [vmem:[%s946_s1 + $0x50] sm:$0xff]  }
   0x6   :  { %686 = vmatprep.subr.bf16.mxu1 %v723_v5  ;;  %v731_v13 = vld [vmem:[%s946_s1 + $0xe0] sm:$0xff]   ;;  %v735_v17 = vld [vmem:[%s946_s1 + $0xd8] sm:$0xff]   ;;  %v739_v21 = vld [vmem:[%s946_s1 + $0xd0] sm:$0xff]  }
   0x7   :  { %v732_v14 = vld [vmem:[%s946_s1 + $0x20] sm:$0xff]   ;;  %v736_v18 = vld [vmem:[%s946_s1 + $0x18] sm:$0xff]   ;;  %v740_v22 = vld [vmem:[%s946_s1 + $0x10] sm:$0xff]  }
   0x8   :  { %653 = vmatpush3.bf16.msra.mxu0 %v724_v6  ;;  %v733_v15 = vld [vmem:[%s946_s1 + $0xa0] sm:$0xff]   ;;  %v737_v19 = vld [vmem:[%s946_s1 + $0x98] sm:$0xff]   ;;  %v741_v23 = vld [vmem:[%s946_s1 + $0x90] sm:$0xff]  }
   0x9   :  { %687 = vmatpush3.bf16.msra.mxu1 %v725_v7  ;;  %654 = vmatprep.subr.bf16.mxu0 %v726_v8  ;;  %v742_v24 = vld [vmem:[%s946_s1 + $0x48] sm:$0xff]   ;;  %v746_v28 = vld [vmem:[%s946_s1 + $0x40] sm:$0xff]  }
   0xa   :  { %688 = vmatprep.subr.bf16.mxu1 %v727_v9  ;;  %v743_v25 = vld [vmem:[%s946_s1 + $0xc8] sm:$0xff]   ;;  %v747_v29 = vld [vmem:[%s946_s1 + $0xc0] sm:$0xff]  }
   0xb   :  { %v744_v26 = vld [vmem:[%s946_s1 + $0x8] sm:$0xff]   ;;  %v748_v30 = vld [vmem:[%s946_s1] sm:$0xff]  }
   0xc   :  { %655 = vmatpush3.bf16.msra.mxu0 %v728_v10  ;;  %v745_v27 = vld [vmem:[%s946_s1 + $0x88] sm:$0xff]   ;;  %v749_v31 = vld [vmem:[%s946_s1 + $0x80] sm:$0xff]  }
   0xd   :  { %689 = vmatpush3.bf16.msra.mxu1 %v729_v11  ;;  %656 = vmatprep.subr.bf16.mxu0 %v730_v12  ;;  %v750_v32 = vld [vmem:[%s947_s0] ss:$16 sps:$4 sm:$0xff]   ;;  %v752_v33 = vld [vmem:[%s947_s0 + $0x4] ss:$16 sps:$4 sm:$0xff]   ;;  %v753_v34 = vld [vmem:[%s947_s0 + $0x8] ss:$16 sps:$4 sm:$0xff]  }
   0xe   :  { %690 = vmatprep.subr.bf16.mxu1 %v731_v13  ;;  %v755_v35 = vld [vmem:[%s947_s0 + $0xc] ss:$16 sps:$4 sm:$0xff]   ;;  %394 = vmatprep.mubr.bf16.mxu0 %v752_v33  ;;  %v756_v36 = vld [vmem:[%s947_s0 + $0x24] ss:$16 sps:$4 sm:$0xff]   ;;  %v760_v38 = vld [vmem:[%s947_s0 + $0x20] ss:$16 sps:$4 sm:$0xff]  }
   0xf   :  { %451 = vmatprep.mubr.bf16.mxu1 %v755_v35  ;;  %v758_v37 = vld [vmem:[%s947_s0 + $0x2c] ss:$16 sps:$4 sm:$0xff]   ;;  %v761_v39 = vld [vmem:[%s947_s0 + $0x28] ss:$16 sps:$4 sm:$0xff]   ;;  %v762_v40 = vld [vmem:[%s947_s0 + $0x44] ss:$16 sps:$4 sm:$0xff]  }
  0x10   :  { %657 = vmatpush3.bf16.msra.mxu0 %v732_v14  ;;  %v764_v41 = vld [vmem:[%s947_s0 + $0x4c] ss:$16 sps:$4 sm:$0xff]   ;;  %v766_v42 = vld [vmem:[%s947_s0 + $0x40] ss:$16 sps:$4 sm:$0xff]   ;;  %v767_v43 = vld [vmem:[%s947_s0 + $0x48] ss:$16 sps:$4 sm:$0xff]  }
  0x11   :  { %691 = vmatpush3.bf16.msra.mxu1 %v733_v15  ;;  %658 = vmatprep.subr.bf16.mxu0 %v734_v16  ;;  %v606_v54 = vld [vmem:[%s948_s2] ss:$0 sm:$0xff]  ;;  %v646_v12 = vld [vmem:[%s949_s3 + $0x8] sm:$0xff]  }
  0x12   :  { %692 = vmatprep.subr.bf16.mxu1 %v735_v17  ;;  %v620_v55 = vld [vmem:[%s949_s3] sm:$0xff]  }
  0x13   :  { %v621_v62 = vunpack.c.l.bf16 %v620_v55  ;;  %v622_v0 = vunpack.c.h.bf16 %v620_v55 }
  0x14   :  { %659 = vmatpush3.bf16.msra.mxu0 %v736_v18 }
  0x15   :  { %693 = vmatpush3.bf16.msra.mxu1 %v737_v19  ;;  %660 = vmatprep.subr.bf16.mxu0 %v738_v20  ;;  %v625_v20 = vunpack.c.l.bf16 %v646_v12 }
  0x16   :  { %694 = vmatprep.subr.bf16.mxu1 %v739_v21 }
  0x18   :  { %661 = vmatpush3.bf16.msra.mxu0 %v740_v22  ;;  %v626_v22 = vunpack.c.h.bf16 %v646_v12 }
  0x19   :  { %695 = vmatpush3.bf16.msra.mxu1 %v741_v23  ;;  %662 = vmatprep.subr.bf16.mxu0 %v742_v24 }
  0x1a   :  { %696 = vmatprep.subr.bf16.mxu1 %v743_v25 }
  0x1c   :  { %663 = vmatpush3.bf16.msra.mxu0 %v744_v26 }
  0x1d   :  { %697 = vmatpush3.bf16.msra.mxu1 %v745_v27  ;;  %664 = vmatprep.subr.bf16.mxu0 %v746_v28 }
  0x1e   :  { %698 = vmatprep.subr.bf16.mxu1 %v747_v29 }
  0x20   :  { %665 = vmatpush3.bf16.msra.mxu0 %v748_v30 }
  0x21   :  { %699 = vmatpush3.bf16.msra.mxu1 %v749_v31 }
  0x23   :  { %395 = vmatmul.mubr.bf16.vlgmr.msra.gmra.mxu0 %v750_v32 }
  0x24   :  { %452 = vmatmul.mubr.bf16.vlgmr.msra.gmra.mxu1 %v753_v34  ;;  %402 = vmatprep.mubr.bf16.mxu0 %v756_v36  ;;  %v647_v34 = vld [vmem:[%s949_s3 + $0x10] sm:$0xff]  }
  0x25   :  { %459 = vmatprep.mubr.bf16.mxu1 %v758_v37 }
  0x2b   :  { %403 = vmatmul.mubr.bf16.gmra.mxu0 %v760_v38 }
  0x2c   :  { %460 = vmatmul.mubr.bf16.gmra.mxu1 %v761_v39  ;;  %410 = vmatprep.mubr.bf16.mxu0 %v762_v40  ;;  %v629_v40 = vunpack.c.l.bf16 %v647_v34 }
  0x2d   :  { %467 = vmatprep.mubr.bf16.mxu1 %v764_v41 }
  0x33   :  { %411 = vmatmul.mubr.bf16.gmra.mxu0 %v766_v42  ;;  %v630_v42 = vunpack.c.h.bf16 %v647_v34 }
  0x34   :  { %468 = vmatmul.mubr.bf16.gmra.mxu1 %v767_v43 }
  0xe3   :  { %v666_v44 = vpop.f32.mrf.mxu0 }
  0xe4   :  { %v700_v45 = vpop.f32.mrf.mxu1 }
  0xe5   :  { %v667_v46 = vpop.f32.mrf.mxu0 }
  0xe6   :  { %v668_v47 = vadd.f32 %v667_v46, %v666_v44  ;;  %v701_v48 = vpop.f32.mrf.mxu1 }
  0xe7   :  { %v702_v49 = vadd.f32 %v701_v48, %v700_v45  ;;  %v669_v50 = vpop.f32.mrf.mxu0 }
  0xe8   :  { %v703_v51 = vpop.f32.mrf.mxu1 }
  0xe9   :  { %v454_v52 = vadd.f32 %v702_v49, %v668_v47  ;;  %v670_v53 = vpop.f32.mrf.mxu0 }
  0xea   :  { %v671_v56 = vadd.f32 %v670_v53, %v669_v50  ;;  %v704_v57 = vpop.f32.mrf.mxu1 }
  0xeb   :  { %v705_v58 = vadd.f32 %v704_v57, %v703_v51  ;;  %v672_v59 = vpop.f32.mrf.mxu0  ;;  %v504_v61 = vadd.f32 %v606_v54, %v454_v52 }
  0xec   :  { %v706_v60 = vpop.f32.mrf.mxu1 }
  0xed   :  { %v457_v63 = vadd.f32 %v705_v58, %v671_v56  ;;  %v673_v1 = vpop.f32.mrf.mxu0  ;;  %v522_v8 = vadd.f32 %v621_v62, %v504_v61 }
  0xee   :  { %v674_v2 = vadd.f32 %v673_v1, %v672_v59  ;;  %v707_v3 = vpop.f32.mrf.mxu1 }
  0xef   :  { %v505_v4 = vadd.f32 %v606_v54, %v457_v63  ;;  %v708_v5 = vadd.f32 %v707_v3, %v706_v60  ;;  %v675_v6 = vpop.f32.mrf.mxu0 }
  0xf0   :  { %v709_v7 = vpop.f32.mrf.mxu1 }
  0xf1   :  { %v523_v9 = vadd.f32 %v622_v0, %v505_v4  ;;  %v462_v10 = vadd.f32 %v708_v5, %v674_v2  ;;  %v676_v11 = vpop.f32.mrf.mxu0 }
  0xf2   :  { %v677_v13 = vadd.f32 %v676_v11, %v675_v6  ;;  %v710_v14 = vpop.f32.mrf.mxu1 }
  0xf3   :  { %v634_v15 = vpack.c.bf16 %v523_v9, %v522_v8  ;;  %v711_v16 = vadd.f32 %v710_v14, %v709_v7  ;;  %v678_v17 = vpop.f32.mrf.mxu0  ;;  %v506_v19 = vadd.f32 %v606_v54, %v462_v10 }
  0xf4   :  { %v712_v18 = vpop.f32.mrf.mxu1 }
  0xf5   :  { %635 = vst [vmem:[%s950_s4] sm:$0xff] %v634_v15   ;;  %v465_v21 = vadd.f32 %v711_v16, %v677_v13  ;;  %v679_v23 = vpop.f32.mrf.mxu0  ;;  %v524_v30 = vadd.f32 %v625_v20, %v506_v19 }
  0xf6   :  { %v680_v24 = vadd.f32 %v679_v23, %v678_v17  ;;  %v713_v25 = vpop.f32.mrf.mxu1 }
  0xf7   :  { %v507_v26 = vadd.f32 %v606_v54, %v465_v21  ;;  %v714_v27 = vadd.f32 %v713_v25, %v712_v18  ;;  %v681_v28 = vpop.f32.mrf.mxu0 }
  0xf8   :  { %v715_v29 = vpop.f32.mrf.mxu1 }
  0xf9   :  { %v525_v31 = vadd.f32 %v626_v22, %v507_v26  ;;  %v470_v32 = vadd.f32 %v714_v27, %v680_v24  ;;  %v682_v33 = vpop.f32.mrf.mxu0 }
  0xfa   :  { %v683_v35 = vadd.f32 %v682_v33, %v681_v28  ;;  %v716_v36 = vpop.f32.mrf.mxu1 }
  0xfb   :  { %v639_v37 = vpack.c.bf16 %v525_v31, %v524_v30  ;;  %v717_v38 = vadd.f32 %v716_v36, %v715_v29  ;;  %v508_v39 = vadd.f32 %v606_v54, %v470_v32 }
  0xfd   :  { %648 = vst [vmem:[%s950_s4 + $0x8] sm:$0xff] %v639_v37   ;;  %v473_v41 = vadd.f32 %v717_v38, %v683_v35  ;;  %v526_v44 = vadd.f32 %v629_v40, %v508_v39 }
  0xff   :  { %v509_v43 = vadd.f32 %v606_v54, %v473_v41 }
 0x101   :  { %v527_v45 = vadd.f32 %v630_v42, %v509_v43 }
 0x103   :  { %v644_v46 = vpack.c.bf16 %v527_v45, %v526_v44 }
 0x105   :  { %649 = vst [vmem:[%s950_s4 + $0x10] sm:$0xff] %v644_v46  }

// kernel: frozen_clip_image_embedder.27
= control target key start
LH: loop header
LB: loop body
LE: loop exit
PB: predicated region body
PF: predicated region fallthrough
CT: control target
= control target key end

     0   :  { %v217_v1 = vmov 0.0   ;;  %vm218_vm0 = vmmov 0   ;;  %vm17_vm1 = vcmask 517120   ;;  %s268_s0 = inlined_call_operand.vmem [shape: bf16[2,128], index: 0, kind: input, shape index: {}]   ;;  %s269_s1 = inlined_call_operand.vmem [shape: bf16[128,64], index: 1, kind: input, shape index: {}]   ;;  %s270_s2 = inlined_call_operand.hbm [shape: f32[2,64], index: 2, kind: output, shape index: {}]  }
   0x1   :  { %v187_v0 = vld [vmem:[%s269_s1 + $0x38] sm:$0xff]   ;;  %164 = vmatprep.subr.bf16.mxu0 %v217_v1  ;;  %v188_v2 = vld [vmem:[%s269_s1 + $0x30] sm:$0xff]   ;;  %180 = vmatprep.mubr.msk.bf16.mxu0 %vm218_vm0, %v217_v1  ;;  %18 = vst.msk [vmem:[#allocation2] sm:$0x3] %vm17_vm1, %v217_v1  ;;  %v189_v3 = vld [vmem:[%s269_s1 + $0x28] sm:$0xff]  }
   0x2   :  { %165 = vmatpush3.bf16.msra.mxu0 %v187_v0 }
   0x3   :  { %166 = vmatprep.subr.bf16.mxu0 %v217_v1 }
   0x6   :  { %167 = vmatpush3.bf16.msra.mxu0 %v188_v2 }
   0x7   :  { %168 = vmatprep.subr.bf16.mxu0 %v217_v1 }
   0x8   :  { %7 = vsyncpa [#allocation4], 0  ;;  %v190_v4 = vld [vmem:[%s269_s1 + $0x20] sm:$0xff]   ;;  %v191_v5 = vld [vmem:[%s269_s1 + $0x18] sm:$0xff]   ;;  %s219_s27 = smov [#allocation3]  }
   0x9   :  { %v192_v6 = vld [vmem:[%s269_s1 + $0x10] sm:$0xff]   ;;  %v193_v7 = vld [vmem:[%s269_s1 + $0x8] sm:$0xff]   ;;  %v194_v8 = vld [vmem:[%s269_s1] sm:$0xff]   ;;  %s139_s28 = sshll.u32 %s219_s27, 4  ;;  %s140_s28 = int_to_ptr.vmem [resolvable:$true] %s139_s28 }
   0xa   :  { %169 = vmatpush3.bf16.msra.mxu0 %v189_v3  ;;  %v19_v9 = vld [vmem:[%s268_s0] sm:$0x1]  ;;  %s195_s1 = scalar_lea.vmem %s140_s28, 32  ;;  %p200_p1 = scmp.lt.s32.totalorder %s140_s28, %s140_s28 }
   0xb   :  { %170 = vmatprep.subr.bf16.mxu0 %v217_v1  ;;  %v20_v10 = vld [vmem:[#allocation2] sm:$0x3]  ;;  %p196_p0 = scmp.ne.s32.totalorder %s140_s28, %s195_s1  ;;  %p201_p2 = scmp.lt.s32.totalorder %s195_s1, %s195_s1 }
   0xd   :  { %p202_p3 = por %p201_p2, %p200_p1 }
   0xe   :  { %171 = vmatpush3.bf16.msra.mxu0 %v190_v4 }
   0xf   :  { %172 = vmatprep.subr.bf16.mxu0 %v217_v1  ;;  %p203_p4 = pnand %p202_p3, %p196_p0 }
  0x12   :  { %173 = vmatpush3.bf16.msra.mxu0 %v191_v5 }
  0x13   :  { %174 = vmatprep.subr.bf16.mxu0 %v217_v1 }
  0x16   :  { %175 = vmatpush3.bf16.msra.mxu0 %v192_v6 }
  0x17   :  { %176 = vmatprep.subr.bf16.mxu0 %v217_v1 }
  0x1a   :  { %177 = vmatpush3.bf16.msra.mxu0 %v193_v7 }
  0x1b   :  { %178 = vmatprep.subr.bf16.mxu0 %v217_v1 }
  0x1e   :  { %179 = vmatpush3.bf16.msra.mxu0 %v194_v8 }
  0x21   :  { %181 = vmatmul.mubr.bf16.vlgmr.msra.gmra.mxu0 %v19_v9 }
  0xe1   :  { %v119_v11 = vpop.f32.mrf.mxu0 }
  0xe2   :  { %v125_v12 = vadd.f32 %v119_v11, %v20_v10 }
  0xe3   :  { %v182_v13 = vpop.f32.mrf.mxu0 }
  0xe4   :  { %127 = vst.msk [vmem:[#allocation2] sm:$0x3] %vm17_vm1, %v125_v12 }
  0xe5   :  { %v122_v14 = vpop.f32.mrf.mxu0 }
  0xe7   :  { %v183_v15 = vpop.f32.mrf.mxu0 }
  0xeb   :  { %v131_v16 = vld [vmem:[#allocation2] sm:$0x3] }
  0xec   :  { %132 = vst.msk [vmem:[#allocation3] sm:$0x3] %vm17_vm1, %v131_v16 }
  0xed   :  { %206 = shalt.err (!%p203_p4)
}
  0xee   :  { %142 = dma.vmem_to_hbm [thread:$0]  %s140_s28, 32, %s270_s2, [#allocation4]  }
  0xef   :  { %215 = dma.done.wait [#allocation4], 32  }
  0xf0   :  { %216 = vsyncadd [#allocation4], 4294967264 }
  0xf1   :  { %146 = vsyncpa [#allocation4], 1 }

// kernel: frozen_clip_image_embedder.19
= control target key start
LH: loop header
LB: loop body
LE: loop exit
PB: predicated region body
PF: predicated region fallthrough
CT: control target
= control target key end

     0   :  { %v1153_v63 = vmov 0   ;;  %s1498_s0 = inlined_call_operand.vmem [shape: bf16[48,128], index: 0, kind: input, shape index: {}]   ;;  %s1499_s1 = inlined_call_operand.vmem [shape: bf16[128,512], index: 1, kind: input, shape index: {}]   ;;  %s1500_s2 = inlined_call_operand.vmem [shape: f32[1,128], index: 2, kind: input, shape index: {}]   ;;  %s1501_s3 = inlined_call_operand.vmem [shape: f32[1,128], index: 3, kind: input, shape index: {}]   ;;  %s1502_s4 = inlined_call_operand.vmem [shape: f32[1,512], index: 4, kind: input, shape index: {}]   ;;  %s1503_s5 = inlined_call_operand.vmem [shape: bf16[48,512], index: 5, kind: output, shape index: {}]  }
   0x1   :  { %v983_v0 = vld [vmem:[%s1498_s0] sm:$0xff]   ;;  %v994_v1 = vld [vmem:[%s1498_s0 + $0x8] sm:$0xff]   ;;  %v995_v6 = vld [vmem:[%s1498_s0 + $0x10] sm:$0xff]   ;;  %405 = vmatprep.mubr.bf16.mxu0 %v1153_v63  ;;  %468 = vmatprep.mubr.bf16.mxu1 %v1153_v63 }
   0x2   :  { %v984_v2 = vunpack.c.l.bf16 %v983_v0  ;;  %v988_v3 = vunpack.c.l.bf16 %v994_v1  ;;  %v985_v4 = vunpack.c.h.bf16 %v983_v0  ;;  %v989_v5 = vunpack.c.h.bf16 %v994_v1  ;;  %v997_v9 = vld [vmem:[%s1499_s1 + $0xe4] ss:$16 sps:$4 sm:$0xff]   ;;  %v999_v10 = vld [vmem:[%s1499_s1 + $0xec] ss:$16 sps:$4 sm:$0xff]   ;;  %v1001_v11 = vld [vmem:[%s1499_s1 + $0xe0] ss:$16 sps:$4 sm:$0xff]  }
   0x3   :  { %v992_v7 = vunpack.c.l.bf16 %v995_v6  ;;  %v993_v8 = vunpack.c.h.bf16 %v995_v6  ;;  %373 = vmatprep.subr.bf16.mxu0 %v997_v9  ;;  %v1002_v12 = vld [vmem:[%s1499_s1 + $0xe8] ss:$16 sps:$4 sm:$0xff]   ;;  %436 = vmatprep.subr.bf16.mxu1 %v999_v10  ;;  %v1003_v37 = vld [vmem:[%s1499_s1 + $0xc4] ss:$16 sps:$4 sm:$0xff]   ;;  %v1005_v38 = vld [vmem:[%s1499_s1 + $0xcc] ss:$16 sps:$4 sm:$0xff]  }
   0x4   :  { %61 = vadd.xlane.f32.xlu0 %v984_v2  ;;  %65 = vadd.xlane.f32.xlu1 %v988_v3  ;;  %v1007_v39 = vld [vmem:[%s1499_s1 + $0xc0] ss:$16 sps:$4 sm:$0xff]   ;;  %v1008_v40 = vld [vmem:[%s1499_s1 + $0xc8] ss:$16 sps:$4 sm:$0xff]   ;;  %v1009_v41 = vld [vmem:[%s1499_s1 + $0xa4] ss:$16 sps:$4 sm:$0xff]  }
   0x5   :  { %374 = vmatpush1.bf16.msra.mxu0 %v1001_v11  ;;  %437 = vmatpush1.bf16.msra.mxu1 %v1002_v12  ;;  %v1011_v42 = vld [vmem:[%s1499_s1 + $0xac] ss:$16 sps:$4 sm:$0xff]   ;;  %v1013_v43 = vld [vmem:[%s1499_s1 + $0xa0] ss:$16 sps:$4 sm:$0xff]   ;;  %v1014_v44 = vld [vmem:[%s1499_s1 + $0xa8] ss:$16 sps:$4 sm:$0xff]  }
   0x6   :  { %375 = vmatprep.subr.bf16.mxu0 %v1003_v37  ;;  %438 = vmatprep.subr.bf16.mxu1 %v1005_v38  ;;  %v1015_v45 = vld [vmem:[%s1499_s1 + $0x84] ss:$16 sps:$4 sm:$0xff]   ;;  %v1017_v46 = vld [vmem:[%s1499_s1 + $0x8c] ss:$16 sps:$4 sm:$0xff]   ;;  %v1019_v47 = vld [vmem:[%s1499_s1 + $0x80] ss:$16 sps:$4 sm:$0xff]  }
   0x7   :  { %v1020_v48 = vld [vmem:[%s1499_s1 + $0x88] ss:$16 sps:$4 sm:$0xff]   ;;  %v1021_v49 = vld [vmem:[%s1499_s1 + $0x64] ss:$16 sps:$4 sm:$0xff]   ;;  %v1023_v50 = vld [vmem:[%s1499_s1 + $0x6c] ss:$16 sps:$4 sm:$0xff]  }
   0x8   :  { %63 = vadd.xlane.f32.xlu0 %v985_v4  ;;  %67 = vadd.xlane.f32.xlu1 %v989_v5  ;;  %v1025_v51 = vld [vmem:[%s1499_s1 + $0x60] ss:$16 sps:$4 sm:$0xff]   ;;  %v1026_v52 = vld [vmem:[%s1499_s1 + $0x68] ss:$16 sps:$4 sm:$0xff]   ;;  %v1027_v53 = vld [vmem:[%s1499_s1 + $0x44] ss:$16 sps:$4 sm:$0xff]  }
   0x9   :  { %376 = vmatpush1.bf16.msra.mxu0 %v1007_v39  ;;  %439 = vmatpush1.bf16.msra.mxu1 %v1008_v40  ;;  %v1029_v54 = vld [vmem:[%s1499_s1 + $0x4c] ss:$16 sps:$4 sm:$0xff]   ;;  %v1031_v55 = vld [vmem:[%s1499_s1 + $0x40] ss:$16 sps:$4 sm:$0xff]   ;;  %v1032_v56 = vld [vmem:[%s1499_s1 + $0x48] ss:$16 sps:$4 sm:$0xff]  }
   0xa   :  { %377 = vmatprep.subr.bf16.mxu0 %v1009_v41  ;;  %440 = vmatprep.subr.bf16.mxu1 %v1011_v42  ;;  %v1033_v57 = vld [vmem:[%s1499_s1 + $0x24] ss:$16 sps:$4 sm:$0xff]   ;;  %v1035_v58 = vld [vmem:[%s1499_s1 + $0x2c] ss:$16 sps:$4 sm:$0xff]   ;;  %v1037_v59 = vld [vmem:[%s1499_s1 + $0x20] ss:$16 sps:$4 sm:$0xff]  }
   0xb   :  { %v1038_v60 = vld [vmem:[%s1499_s1 + $0x28] ss:$16 sps:$4 sm:$0xff]   ;;  %v1039_v61 = vld [vmem:[%s1499_s1 + $0x4] ss:$16 sps:$4 sm:$0xff]   ;;  %v1041_v62 = vld [vmem:[%s1499_s1 + $0xc] ss:$16 sps:$4 sm:$0xff]  }
   0xc   :  { %69 = vadd.xlane.f32.xlu0 %v992_v7  ;;  %71 = vadd.xlane.f32.xlu1 %v993_v8  ;;  %v1043_v0 = vld [vmem:[%s1499_s1] ss:$16 sps:$4 sm:$0xff]   ;;  %v1044_v1 = vld [vmem:[%s1499_s1 + $0x8] ss:$16 sps:$4 sm:$0xff]  }
   0xd   :  { %378 = vmatpush1.bf16.msra.mxu0 %v1013_v43  ;;  %441 = vmatpush1.bf16.msra.mxu1 %v1014_v44 }
   0xe   :  { %379 = vmatprep.subr.bf16.mxu0 %v1015_v45  ;;  %442 = vmatprep.subr.bf16.mxu1 %v1017_v46 }
  0x11   :  { %380 = vmatpush1.bf16.msra.mxu0 %v1019_v47  ;;  %443 = vmatpush1.bf16.msra.mxu1 %v1020_v48 }
  0x12   :  { %381 = vmatprep.subr.bf16.mxu0 %v1021_v49  ;;  %444 = vmatprep.subr.bf16.mxu1 %v1023_v50 }
  0x15   :  { %382 = vmatpush1.bf16.msra.mxu0 %v1025_v51  ;;  %445 = vmatpush1.bf16.msra.mxu1 %v1026_v52  ;;  %v576_v51 = vlaneseq }
  0x16   :  { %383 = vmatprep.subr.bf16.mxu0 %v1027_v53  ;;  %446 = vmatprep.subr.bf16.mxu1 %v1029_v54 }
  0x17   :  { %v577_v52 = vshrl.u32 %v576_v51, 7 }
  0x19   :  { %384 = vmatpush1.bf16.msra.mxu0 %v1031_v55  ;;  %447 = vmatpush1.bf16.msra.mxu1 %v1032_v56  ;;  %v586_v53 = vsub.s32 2, %v577_v52  ;;  %v582_v54 = vsub.s32 1, %v577_v52  ;;  %v590_v55 = vsub.s32 3, %v577_v52 }
  0x1a   :  { %385 = vmatprep.subr.bf16.mxu0 %v1033_v57  ;;  %448 = vmatprep.subr.bf16.mxu1 %v1035_v58 }
  0x1d   :  { %386 = vmatpush1.bf16.msra.mxu0 %v1037_v59  ;;  %449 = vmatpush1.bf16.msra.mxu1 %v1038_v60 }
  0x1e   :  { %387 = vmatprep.subr.bf16.mxu0 %v1039_v61  ;;  %450 = vmatprep.subr.bf16.mxu1 %v1041_v62 }
  0x21   :  { %388 = vmatpush1.bf16.msra.mxu0 %v1043_v0  ;;  %451 = vmatpush1.bf16.msra.mxu1 %v1044_v1 }
  0x8d   :  { %v62_v13 = vpop.xlane.xlu0 %61  ;;  %v66_v14 = vpop.xlane.xlu1 %65 }
  0x8e   :  { %v74_v15 = vmul.f32 0.0078125, %v62_v13  ;;  %v76_v16 = vmul.f32 0.0078125, %v66_v14 }
  0x90   :  { %v1205_v17 = vsub.f32 %v984_v2, %v74_v15  ;;  %v1207_v18 = vsub.f32 %v988_v3, %v76_v16 }
  0x91   :  { %v64_v19 = vpop.xlane.xlu0 %63  ;;  %v68_v20 = vpop.xlane.xlu1 %67 }
  0x92   :  { %v75_v21 = vmul.f32 0.0078125, %v64_v19  ;;  %v86_v22 = vmul.f32 %v1205_v17, %v1205_v17  ;;  %v77_v23 = vmul.f32 0.0078125, %v68_v20  ;;  %v88_v26 = vmul.f32 %v1207_v18, %v1207_v18 }
  0x94   :  { %v1211_v24 = vsub.f32 %v985_v4, %v75_v21  ;;  %92 = vadd.xlane.f32.xlu0 %v86_v22  ;;  %v1213_v25 = vsub.f32 %v989_v5, %v77_v23 }
  0x95   :  { %v70_v27 = vpop.xlane.xlu0 %69  ;;  %v72_v28 = vpop.xlane.xlu1 %71 }
  0x96   :  { %v78_v29 = vmul.f32 0.0078125, %v70_v27  ;;  %v87_v30 = vmul.f32 %v1211_v24, %v1211_v24  ;;  %v79_v31 = vmul.f32 0.0078125, %v72_v28  ;;  %v89_v34 = vmul.f32 %v1213_v25, %v1213_v25 }
  0x98   :  { %v1219_v32 = vsub.f32 %v992_v7, %v78_v29  ;;  %96 = vadd.xlane.f32.xlu0 %v88_v26  ;;  %94 = vadd.xlane.f32.xlu1 %v87_v30  ;;  %v1221_v33 = vsub.f32 %v993_v8, %v79_v31  ;;  %v900_v26 = vld [vmem:[%s1500_s2] ss:$0 sm:$0xff] }
  0x99   :  { %v901_v31 = vld [vmem:[%s1501_s3] ss:$0 sm:$0xff] }
  0x9a   :  { %v90_v35 = vmul.f32 %v1219_v32, %v1219_v32  ;;  %v91_v36 = vmul.f32 %v1221_v33, %v1221_v33 }
  0x9c   :  { %98 = vadd.xlane.f32.xlu1 %v89_v34  ;;  %100 = vadd.xlane.f32.xlu0 %v90_v35 }
  0xa0   :  { %102 = vadd.xlane.f32.xlu1 %v91_v36 }
 0x11d   :  { %v93_v2 = vpop.xlane.xlu0 %92 }
 0x11e   :  { %v104_v3 = vmul.f32 0.0078125, %v93_v2 }
 0x120   :  { %v110_v4 = vadd.f32 1e-05, %v104_v3 }
 0x121   :  { %v95_v5 = vpop.xlane.xlu1 %94  ;;  %v97_v6 = vpop.xlane.xlu0 %96 }
 0x122   :  { %1045 = vrsqrt.f32 %v110_v4  ;;  %v105_v7 = vmul.f32 0.0078125, %v95_v5  ;;  %v106_v8 = vmul.f32 0.0078125, %v97_v6 }
 0x124   :  { %v111_v9 = vadd.f32 1e-05, %v105_v7  ;;  %v112_v10 = vadd.f32 1e-05, %v106_v8 }
 0x125   :  { %v99_v11 = vpop.xlane.xlu1 %98  ;;  %v101_v12 = vpop.xlane.xlu0 %100 }
 0x126   :  { %1047 = vrsqrt.f32 %v111_v9  ;;  %v107_v13 = vmul.f32 0.0078125, %v99_v11  ;;  %v108_v15 = vmul.f32 0.0078125, %v101_v12 }
 0x127   :  { %1049 = vrsqrt.f32 %v112_v10 }
 0x128   :  { %v113_v14 = vadd.f32 1e-05, %v107_v13  ;;  %v114_v20 = vadd.f32 1e-05, %v108_v15 }
 0x129   :  { %v103_v16 = vpop.xlane.xlu1 %102 }
 0x12a   :  { %1051 = vrsqrt.f32 %v113_v14  ;;  %v109_v19 = vmul.f32 0.0078125, %v103_v16 }
 0x12c   :  { %v115_v21 = vadd.f32 1e-05, %v109_v19 }
 0x12e   :  { %1053 = vrsqrt.f32 %v115_v21 }
 0x12f   :  { %v1046_v22 = vpop.eup %1045  ;;  %1055 = vrsqrt.f32 %v114_v20 }
 0x130   :  { %v122_v23 = vmul.f32 %v1046_v22, %v1205_v17 }
 0x132   :  { %v135_v29 = vmul.f32 %v900_v26, %v122_v23 }
 0x133   :  { %v1048_v27 = vpop.eup %1047 }
 0x134   :  { %v123_v28 = vmul.f32 %v1048_v27, %v1211_v24  ;;  %v1050_v30 = vpop.eup %1049  ;;  %v148_v36 = vadd.f32 %v901_v31, %v135_v29 }
 0x135   :  { %v124_v38 = vmul.f32 %v1050_v30, %v1207_v18 }
 0x136   :  { %v136_v34 = vmul.f32 %v900_v26, %v123_v28 }
 0x137   :  { %v1052_v35 = vpop.eup %1051  ;;  %v137_v24 = vmul.f32 %v900_v26, %v124_v38 }
 0x138   :  { %v149_v37 = vadd.f32 %v901_v31, %v136_v34  ;;  %v125_v17 = vmul.f32 %v1052_v35, %v1213_v25 }
 0x139   :  { %v150_v45 = vadd.f32 %v901_v31, %v137_v24 }
 0x13a   :  { %v154_v39 = vpack.c.bf16 %v149_v37, %v148_v36  ;;  %v138_v40 = vmul.f32 %v900_v26, %v125_v17 }
 0x13b   :  { %v1054_v41 = vpop.eup %1053 }
 0x13c   :  { %406 = vmatmul.mubr.bf16.vlgmr.msra.gmra.mxu0 %v154_v39  ;;  %469 = vmatmul.mubr.bf16.vlgmr.msra.gmra.mxu1 %v154_v39  ;;  %v1056_v42 = vpop.eup %1055  ;;  %v151_v43 = vadd.f32 %v901_v31, %v138_v40  ;;  %v127_v44 = vmul.f32 %v1054_v41, %v1221_v33  ;;  %v578_v33 = vsub.s32 0, %v577_v52 }
 0x13d   :  { %415 = vmatprep.mubr.bf16.mxu0 %v1153_v63  ;;  %478 = vmatprep.mubr.bf16.mxu1 %v1153_v63  ;;  %v126_v46 = vmul.f32 %v1056_v42, %v1219_v32  ;;  %v574_v32 = vld [vmem:[%s1502_s4] sm:$0xf] }
 0x13e   :  { %v155_v18 = vpack.c.bf16 %v151_v43, %v150_v45  ;;  %v140_v47 = vmul.f32 %v900_v26, %v127_v44  ;;  %v1334_v56 = vrot.slane %v574_v32, %v578_v33  ;;  %v1336_v57 = vrot.slane %v574_v32, %v586_v53 }
 0x13f   :  { %v139_v25 = vmul.f32 %v900_v26, %v126_v46  ;;  %v1338_v58 = vrot.slane %v574_v32, %v582_v54  ;;  %v1340_v59 = vrot.slane %v574_v32, %v590_v55 }
 0x140   :  { %v153_v48 = vadd.f32 %v901_v31, %v140_v47 }
 0x141   :  { %v152_v49 = vadd.f32 %v901_v31, %v139_v25 }
 0x143   :  { %v156_v50 = vpack.c.bf16 %v153_v48, %v152_v49 }
 0x144   :  { %416 = vmatmul.mubr.bf16.gmra.mxu0 %v155_v18  ;;  %479 = vmatmul.mubr.bf16.gmra.mxu1 %v155_v18 }
 0x145   :  { %425 = vmatprep.mubr.bf16.mxu0 %v1153_v63  ;;  %488 = vmatprep.mubr.bf16.mxu1 %v1153_v63 }
 0x14c   :  { %426 = vmatmul.mubr.bf16.gmra.mxu0 %v156_v50  ;;  %489 = vmatmul.mubr.bf16.gmra.mxu1 %v156_v50 }
 0x1fc   :  { %v407_v60 = vpop.f32.mrf.mxu0  ;;  %v470_v61 = vpop.f32.mrf.mxu1 }
 0x1fd   :  { %v1343_v62 = vadd.f32 %v1334_v56, %v407_v60  ;;  %v1346_v63 = vadd.f32 %v1336_v57, %v470_v61 }
 0x1fe   :  { %v409_v0 = vpop.f32.mrf.mxu0  ;;  %v472_v1 = vpop.f32.mrf.mxu1 }
 0x1ff   :  { %v934_v2 = vmul.f32 -1.702, %v1343_v62  ;;  %v936_v3 = vmul.f32 -1.702, %v1346_v63  ;;  %v1351_v4 = vadd.f32 %v1338_v58, %v409_v0  ;;  %v1354_v5 = vadd.f32 %v1340_v59, %v472_v1 }
 0x200   :  { %v411_v6 = vpop.f32.mrf.mxu0  ;;  %v474_v7 = vpop.f32.mrf.mxu1 }
 0x201   :  { %v668_v8 = vmul.f32 1.442695, %v934_v2  ;;  %v672_v9 = vmul.f32 1.442695, %v936_v3  ;;  %v935_v10 = vmul.f32 -1.702, %v1351_v4  ;;  %v1358_v11 = vadd.f32 %v1334_v56, %v411_v6 }
 0x202   :  { %v937_v12 = vmul.f32 -1.702, %v1354_v5  ;;  %v1362_v13 = vadd.f32 %v1336_v57, %v474_v7  ;;  %v413_v14 = vpop.f32.mrf.mxu0  ;;  %v476_v15 = vpop.f32.mrf.mxu1 }
 0x203   :  { %1057 = vpow2.f32 %v668_v8  ;;  %v670_v16 = vmul.f32 1.442695, %v935_v10  ;;  %v938_v19 = vmul.f32 -1.702, %v1358_v11  ;;  %v1366_v20 = vadd.f32 %v1338_v58, %v413_v14 }
 0x204   :  { %1059 = vpow2.f32 %v672_v9  ;;  %v674_v21 = vmul.f32 1.442695, %v937_v12  ;;  %v940_v22 = vmul.f32 -1.702, %v1362_v13  ;;  %v1370_v23 = vadd.f32 %v1340_v59, %v476_v15  ;;  %v417_v26 = vpop.f32.mrf.mxu0  ;;  %v480_v27 = vpop.f32.mrf.mxu1 }
 0x205   :  { %1061 = vpow2.f32 %v670_v16  ;;  %v676_v28 = vmul.f32 1.442695, %v938_v19  ;;  %v939_v29 = vmul.f32 -1.702, %v1366_v20  ;;  %v1374_v30 = vadd.f32 %v1334_v56, %v417_v26 }
 0x206   :  { %1063 = vpow2.f32 %v674_v21  ;;  %v680_v31 = vmul.f32 1.442695, %v940_v22  ;;  %v941_v34 = vmul.f32 -1.702, %v1370_v23  ;;  %v1378_v35 = vadd.f32 %v1336_v57, %v480_v27  ;;  %v419_v36 = vpop.f32.mrf.mxu0  ;;  %v482_v37 = vpop.f32.mrf.mxu1 }
 0x207   :  { %1065 = vpow2.f32 %v676_v28  ;;  %v678_v38 = vmul.f32 1.442695, %v939_v29  ;;  %v942_v17 = vmul.f32 -1.702, %v1374_v30  ;;  %v1382_v39 = vadd.f32 %v1338_v58, %v419_v36 }
 0x208   :  { %1067 = vpow2.f32 %v680_v31  ;;  %v682_v40 = vmul.f32 1.442695, %v941_v34  ;;  %v944_v41 = vmul.f32 -1.702, %v1378_v35  ;;  %v1386_v24 = vadd.f32 %v1340_v59, %v482_v37  ;;  %v421_v42 = vpop.f32.mrf.mxu0  ;;  %v484_v43 = vpop.f32.mrf.mxu1 }
 0x209   :  { %1069 = vpow2.f32 %v678_v38  ;;  %v684_v44 = vmul.f32 1.442695, %v942_v17  ;;  %v943_v45 = vmul.f32 -1.702, %v1382_v39  ;;  %v1390_v46 = vadd.f32 %v1334_v56, %v421_v42 }
 0x20a   :  { %1071 = vpow2.f32 %v682_v40  ;;  %v688_v18 = vmul.f32 1.442695, %v944_v41  ;;  %v945_v47 = vmul.f32 -1.702, %v1386_v24  ;;  %v1394_v25 = vadd.f32 %v1336_v57, %v484_v43  ;;  %v423_v48 = vpop.f32.mrf.mxu0  ;;  %v486_v49 = vpop.f32.mrf.mxu1 }
 0x20b   :  { %1073 = vpow2.f32 %v684_v44  ;;  %v686_v50 = vmul.f32 1.442695, %v943_v45  ;;  %v946_v51 = vmul.f32 -1.702, %v1390_v46  ;;  %v1398_v52 = vadd.f32 %v1338_v58, %v423_v48 }
 0x20c   :  { %1075 = vpow2.f32 %v688_v18  ;;  %v690_v33 = vmul.f32 1.442695, %v945_v47  ;;  %v948_v53 = vmul.f32 -1.702, %v1394_v25  ;;  %v1402_v32 = vadd.f32 %v1340_v59, %v486_v49  ;;  %v427_v0 = vpop.f32.mrf.mxu0  ;;  %v490_v2 = vpop.f32.mrf.mxu1 }
 0x20d   :  { %1077 = vpow2.f32 %v686_v50  ;;  %v692_v54 = vmul.f32 1.442695, %v946_v51  ;;  %v947_v55 = vmul.f32 -1.702, %v1398_v52  ;;  %v1407_v36 = vadd.f32 %v1334_v56, %v427_v0 }
 0x20e   :  { %1079 = vpow2.f32 %v690_v33  ;;  %v696_v60 = vmul.f32 1.442695, %v948_v53  ;;  %v949_v61 = vmul.f32 -1.702, %v1402_v32  ;;  %v429_v12 = vpop.f32.mrf.mxu0  ;;  %v492_v16 = vpop.f32.mrf.mxu1  ;;  %v1410_v40 = vadd.f32 %v1336_v57, %v490_v2 }
 0x20f   :  { %1081 = vpow2.f32 %v692_v54  ;;  %v694_v1 = vmul.f32 1.442695, %v947_v55  ;;  %v1413_v43 = vadd.f32 %v1338_v58, %v429_v12  ;;  %v1416_v18 = vadd.f32 %v1340_v59, %v492_v16 }
 0x210   :  { %v1058_v3 = vpop.eup %1057  ;;  %1083 = vpow2.f32 %v696_v60  ;;  %v698_v6 = vmul.f32 1.442695, %v949_v61  ;;  %v431_v29 = vpop.f32.mrf.mxu0  ;;  %v950_v50 = vmul.f32 -1.702, %v1407_v36  ;;  %v952_v55 = vmul.f32 -1.702, %v1410_v40 }
 0x211   :  { %v1060_v7 = vpop.eup %1059  ;;  %v716_v8 = vadd.f32 1.0, %v1058_v3  ;;  %1085 = vpow2.f32 %v694_v1  ;;  %v494_v37 = vpop.f32.mrf.mxu1  ;;  %v1420_v51 = vadd.f32 %v1334_v56, %v431_v29  ;;  %v951_v1 = vmul.f32 -1.702, %v1413_v43 }
 0x212   :  { %v1062_v9 = vpop.eup %1061  ;;  %v718_v10 = vadd.f32 1.0, %v1060_v7  ;;  %1087 = vpow2.f32 %v698_v6  ;;  %v433_v47 = vpop.f32.mrf.mxu0  ;;  %v1424_v60 = vadd.f32 %v1336_v57, %v494_v37  ;;  %v953_v6 = vmul.f32 -1.702, %v1416_v18 }
 0x213   :  { %v1064_v14 = vpop.eup %1063  ;;  %1089 = vrcp.f32 %v716_v8  ;;  %v717_v15 = vadd.f32 1.0, %v1062_v9  ;;  %v496_v33 = vpop.f32.mrf.mxu1  ;;  %v1428_v2 = vadd.f32 %v1338_v58, %v433_v47  ;;  %v700_v9 = vmul.f32 1.442695, %v950_v50 }
 0x214   :  { %v1066_v19 = vpop.eup %1065  ;;  %1091 = vrcp.f32 %v718_v10  ;;  %v719_v21 = vadd.f32 1.0, %v1064_v14  ;;  %v1432_v7 = vadd.f32 %v1340_v59, %v496_v33  ;;  %v954_v10 = vmul.f32 -1.702, %v1420_v51 }
 0x215   :  { %v1068_v22 = vpop.eup %1067  ;;  %1093 = vrcp.f32 %v717_v15  ;;  %v720_v26 = vadd.f32 1.0, %v1066_v19  ;;  %v704_v15 = vmul.f32 1.442695, %v952_v55  ;;  %v956_v58 = vmul.f32 -1.702, %v1424_v60 }
 0x216   :  { %v1070_v27 = vpop.eup %1069  ;;  %1095 = vrcp.f32 %v719_v21  ;;  %v722_v28 = vadd.f32 1.0, %v1068_v22  ;;  %v702_v19 = vmul.f32 1.442695, %v951_v1  ;;  %v955_v21 = vmul.f32 -1.702, %v1428_v2 }
 0x217   :  { %v1072_v31 = vpop.eup %1071  ;;  %1097 = vrcp.f32 %v720_v26  ;;  %v721_v34 = vadd.f32 1.0, %v1070_v27  ;;  %v706_v59 = vmul.f32 1.442695, %v953_v6  ;;  %v957_v26 = vmul.f32 -1.702, %v1432_v7 }
 0x218   :  { %v1074_v38 = vpop.eup %1073  ;;  %1099 = vrcp.f32 %v722_v28  ;;  %v723_v17 = vadd.f32 1.0, %v1072_v31  ;;  %v708_v31 = vmul.f32 1.442695, %v954_v10 }
 0x219   :  { %v1076_v41 = vpop.eup %1075  ;;  %1101 = vrcp.f32 %v721_v34  ;;  %v724_v42 = vadd.f32 1.0, %v1074_v38 }
 0x21a   :  { %v1078_v44 = vpop.eup %1077  ;;  %1103 = vrcp.f32 %v723_v17  ;;  %v726_v45 = vadd.f32 1.0, %v1076_v41  ;;  %v712_v17 = vmul.f32 1.442695, %v956_v58 }
 0x21b   :  { %v1080_v48 = vpop.eup %1079  ;;  %1105 = vrcp.f32 %v724_v42  ;;  %v725_v49 = vadd.f32 1.0, %v1078_v44  ;;  %v710_v44 = vmul.f32 1.442695, %v955_v21 }
 0x21c   :  { %v1082_v53 = vpop.eup %1081  ;;  %1107 = vrcp.f32 %v726_v45  ;;  %v727_v54 = vadd.f32 1.0, %v1080_v48  ;;  %v714_v48 = vmul.f32 1.442695, %v957_v26 }
 0x21d   :  { %v1084_v61 = vpop.eup %1083  ;;  %1109 = vrcp.f32 %v725_v49  ;;  %v728_v0 = vadd.f32 1.0, %v1082_v53 }
 0x21e   :  { %v1086_v3 = vpop.eup %1085  ;;  %1111 = vrcp.f32 %v727_v54  ;;  %v730_v56 = vadd.f32 1.0, %v1084_v61 }
 0x21f   :  { %v1088_v8 = vpop.eup %1087  ;;  %1113 = vrcp.f32 %v728_v0  ;;  %v729_v57 = vadd.f32 1.0, %v1086_v3 }
 0x220   :  { %v1090_v12 = vpop.eup %1089  ;;  %1115 = vrcp.f32 %v730_v56  ;;  %v731_v14 = vadd.f32 1.0, %v1088_v8 }
 0x221   :  { %v1092_v16 = vpop.eup %1091  ;;  %1117 = vrcp.f32 %v729_v57  ;;  %v788_v28 = vmul.f32 %v1090_v12, %v1343_v62 }
 0x222   :  { %v1094_v22 = vpop.eup %1093  ;;  %1119 = vrcp.f32 %v731_v14  ;;  %v790_v37 = vmul.f32 %v1092_v16, %v1346_v63 }
 0x223   :  { %v1096_v27 = vpop.eup %1095  ;;  %v789_v29 = vmul.f32 %v1094_v22, %v1351_v4  ;;  %1121 = vpow2.f32 %v700_v9 }
 0x224   :  { %v1098_v34 = vpop.eup %1097  ;;  %v791_v38 = vmul.f32 %v1096_v27, %v1354_v5  ;;  %1123 = vpow2.f32 %v704_v15 }
 0x225   :  { %v1100_v41 = vpop.eup %1099  ;;  %v970_v42 = vpack.c.bf16 %v789_v29, %v788_v28  ;;  %1125 = vpow2.f32 %v702_v19  ;;  %v792_v4 = vmul.f32 %v1098_v34, %v1358_v11 }
 0x226   :  { %v1102_v45 = vpop.eup %1101  ;;  %v971_v47 = vpack.c.bf16 %v791_v38, %v790_v37  ;;  %1127 = vpow2.f32 %v706_v59  ;;  %v794_v49 = vmul.f32 %v1100_v41, %v1362_v13 }
 0x227   :  { %v1104_v62 = vpop.eup %1103  ;;  %884 = vst [vmem:[%s1503_s5] sm:$0xff] %v970_v42  ;;  %v793_v63 = vmul.f32 %v1102_v45, %v1366_v20  ;;  %1129 = vpow2.f32 %v708_v31 }
 0x228   :  { %v1106_v5 = vpop.eup %1105  ;;  %885 = vst [vmem:[%s1503_s5 + $0x8] sm:$0xff] %v971_v47  ;;  %v795_v50 = vmul.f32 %v1104_v62, %v1370_v23  ;;  %1131 = vpow2.f32 %v712_v17 }
 0x229   :  { %v1108_v33 = vpop.eup %1107  ;;  %v972_v53 = vpack.c.bf16 %v793_v63, %v792_v4  ;;  %1133 = vpow2.f32 %v710_v44  ;;  %v796_v20 = vmul.f32 %v1106_v5, %v1374_v30 }
 0x22a   :  { %v1110_v54 = vpop.eup %1109  ;;  %v973_v55 = vpack.c.bf16 %v795_v50, %v794_v49  ;;  %1135 = vpow2.f32 %v714_v48  ;;  %v798_v13 = vmul.f32 %v1108_v33, %v1378_v35 }
 0x22b   :  { %v1112_v11 = vpop.eup %1111  ;;  %886 = vst [vmem:[%s1503_s5 + $0x10] sm:$0xff] %v972_v53  ;;  %v797_v61 = vmul.f32 %v1110_v54, %v1382_v39 }
 0x22c   :  { %v1114_v0 = vpop.eup %1113  ;;  %887 = vst [vmem:[%s1503_s5 + $0x18] sm:$0xff] %v973_v55  ;;  %v799_v23 = vmul.f32 %v1112_v11, %v1386_v24 }
 0x22d   :  { %v1116_v1 = vpop.eup %1115  ;;  %v974_v3 = vpack.c.bf16 %v797_v61, %v796_v20  ;;  %v800_v30 = vmul.f32 %v1114_v0, %v1390_v46 }
 0x22e   :  { %v1118_v56 = vpop.eup %1117  ;;  %v975_v6 = vpack.c.bf16 %v799_v23, %v798_v13  ;;  %v802_v35 = vmul.f32 %v1116_v1, %v1394_v25 }
 0x22f   :  { %v1120_v8 = vpop.eup %1119  ;;  %888 = vst [vmem:[%s1503_s5 + $0x20] sm:$0xff] %v974_v3  ;;  %v801_v39 = vmul.f32 %v1118_v56, %v1398_v52 }
 0x230   :  { %v1122_v57 = vpop.eup %1121  ;;  %889 = vst [vmem:[%s1503_s5 + $0x28] sm:$0xff] %v975_v6  ;;  %v803_v24 = vmul.f32 %v1120_v8, %v1402_v32 }
 0x231   :  { %v1124_v9 = vpop.eup %1123  ;;  %v976_v10 = vpack.c.bf16 %v801_v39, %v800_v30  ;;  %v732_v12 = vadd.f32 1.0, %v1122_v57 }
 0x232   :  { %v1126_v14 = vpop.eup %1125  ;;  %v977_v15 = vpack.c.bf16 %v803_v24, %v802_v35  ;;  %v734_v58 = vadd.f32 1.0, %v1124_v9 }
 0x233   :  { %v1128_v16 = vpop.eup %1127  ;;  %890 = vst [vmem:[%s1503_s5 + $0x30] sm:$0xff] %v976_v10  ;;  %1137 = vrcp.f32 %v732_v12  ;;  %v733_v46 = vadd.f32 1.0, %v1126_v14 }
 0x234   :  { %v1130_v52 = vpop.eup %1129  ;;  %891 = vst [vmem:[%s1503_s5 + $0x38] sm:$0xff] %v977_v15  ;;  %1139 = vrcp.f32 %v734_v58  ;;  %v735_v25 = vadd.f32 1.0, %v1128_v16 }
 0x235   :  { %v1132_v32 = vpop.eup %1131  ;;  %1141 = vrcp.f32 %v733_v46  ;;  %v736_v19 = vadd.f32 1.0, %v1130_v52 }
 0x236   :  { %v1134_v21 = vpop.eup %1133  ;;  %1143 = vrcp.f32 %v735_v25  ;;  %v738_v22 = vadd.f32 1.0, %v1132_v32 }
 0x237   :  { %v1136_v59 = vpop.eup %1135  ;;  %1145 = vrcp.f32 %v736_v19  ;;  %v737_v26 = vadd.f32 1.0, %v1134_v21 }
 0x238   :  { %1147 = vrcp.f32 %v738_v22  ;;  %v739_v27 = vadd.f32 1.0, %v1136_v59 }
 0x239   :  { %1149 = vrcp.f32 %v737_v26 }
 0x23a   :  { %1151 = vrcp.f32 %v739_v27 }
 0x240   :  { %v1138_v28 = vpop.eup %1137 }
 0x241   :  { %v1140_v29 = vpop.eup %1139  ;;  %v804_v37 = vmul.f32 %v1138_v28, %v1407_v36 }
 0x242   :  { %v1142_v31 = vpop.eup %1141  ;;  %v806_v41 = vmul.f32 %v1140_v29, %v1410_v40 }
 0x243   :  { %v1144_v34 = vpop.eup %1143  ;;  %v805_v38 = vmul.f32 %v1142_v31, %v1413_v43 }
 0x244   :  { %v1146_v17 = vpop.eup %1145  ;;  %v807_v42 = vmul.f32 %v1144_v34, %v1416_v18 }
 0x245   :  { %v1148_v44 = vpop.eup %1147  ;;  %v978_v45 = vpack.c.bf16 %v805_v38, %v804_v37  ;;  %v808_v4 = vmul.f32 %v1146_v17, %v1420_v51 }
 0x246   :  { %v1150_v47 = vpop.eup %1149  ;;  %v979_v48 = vpack.c.bf16 %v807_v42, %v806_v41  ;;  %v810_v40 = vmul.f32 %v1148_v44, %v1424_v60 }
 0x247   :  { %v1152_v62 = vpop.eup %1151  ;;  %892 = vst [vmem:[%s1503_s5 + $0x40] sm:$0xff] %v978_v45  ;;  %v809_v36 = vmul.f32 %v1150_v47, %v1428_v2 }
 0x248   :  { %893 = vst [vmem:[%s1503_s5 + $0x48] sm:$0xff] %v979_v48  ;;  %v811_v43 = vmul.f32 %v1152_v62, %v1432_v7 }
 0x249   :  { %v980_v18 = vpack.c.bf16 %v809_v36, %v808_v4 }
 0x24a   :  { %v981_v63 = vpack.c.bf16 %v811_v43, %v810_v40 }
 0x24b   :  { %894 = vst [vmem:[%s1503_s5 + $0x50] sm:$0xff] %v980_v18 }
 0x24c   :  { %895 = vst [vmem:[%s1503_s5 + $0x58] sm:$0xff] %v981_v63 }

</bundles_post_ra>
